<compile_context>
chip_gen: v5e
topology: v5e:2x2
jax: 0.10.0
libtpu: 0.0.40
codegen_flags: <defaults>
</compile_context>

<pallas_src>
import functools

import jax
import jax.numpy as jnp
from jax import lax
from jax.experimental import pallas as pl
from jax.experimental.pallas import tpu as pltpu

NEG_INF = -1e30  # additive bias for padded keys (matches -inf pre-softmax semantics)

# x[M, K] contracted with w[N, K] -> [M, N]  (i.e. x @ w^T without an explicit transpose)
_CONTRACT_T = (((1,), (1,)), ((), ()))


def _matmul_t_bf16(x, w):
    """MXU matmul with bf16 operands and f32 accumulation: x @ w^T."""
    return lax.dot_general(x.astype(jnp.bfloat16), w.astype(jnp.bfloat16),
                           _CONTRACT_T, preferred_element_type=jnp.float32)


def _layernorm(z, g, b, eps):
    mu = jnp.mean(z, axis=-1, keepdims=True)
    var = jnp.mean((z - mu) ** 2, axis=-1, keepdims=True)
    return (z - mu) * lax.rsqrt(var + eps) * g + b


def _round_up(x, m):
    return ((x + m - 1) // m) * m


# --------------------------------------------------------------------- Buffered(1) probe

def _probe_buffered():
    """Check (once, at import, outside any jit trace) whether pipeline_mode=Buffered(1)
    on a constant-index BlockSpec compiles on this Pallas/Mosaic build."""
    try:
        spec = pl.BlockSpec((8, 128), lambda i: (0, 0), pipeline_mode=pl.Buffered(1))
    except Exception:
        return False
    try:
        def k(x_ref, o_ref):
            o_ref[...] = x_ref[...] + 1.0
        out = pl.pallas_call(
            k, out_shape=jax.ShapeDtypeStruct((8, 128), jnp.float32),
            grid=(1,), in_specs=[spec],
            out_specs=pl.BlockSpec((8, 128), lambda i: (0, 0)),
        )(jnp.zeros((8, 128), jnp.float32))
        jax.block_until_ready(out)
        return True
    except Exception:
        return False


_HAS_BUFFERED = _probe_buffered()


def _const_spec(block_shape, index_map):
    """BlockSpec for grid-invariant operands (weights / biases / norm params).

    These blocks never change across grid steps, so double-buffering them only doubles
    their VMEM footprint; single-buffer them when the feature is available."""
    if _HAS_BUFFERED:
        return pl.BlockSpec(block_shape, index_map, pipeline_mode=pl.Buffered(1))
    return pl.BlockSpec(block_shape, index_map)


# --------------------------------------------------------------------- attention sub-layer

def _attn_block_kernel(*refs, nhead, tQ, eps, has_pos):
    if has_pos:
        (x_ref, pos_ref, bias_ref, wqkv_ref, bqkv_ref, wo_ref, bo_ref,
         g_ref, b_ref, o_ref, k_s, v_s, o_s) = refs
    else:
        (x_ref, bias_ref, wqkv_ref, bqkv_ref, wo_ref, bo_ref,
         g_ref, b_ref, o_ref, k_s, v_s, o_s) = refs
        pos_ref = None

    Lp = x_ref.shape[1]
    D = x_ref.shape[2]
    dh = D // nhead
    scale = 1.0 / (dh ** 0.5)
    qi = pl.program_id(1)

    # ---- K/V projection: once per batch element (query-tile axis is the inner grid axis).
    @pl.when(qi == 0)
    def _():
        xkv = x_ref[0]                                  # [Lp, D] f32 (resident in VMEM)
        if has_pos:
            kin = xkv + pos_ref[0]                      # pos added to k only (DETR)
        else:
            kin = xkv
        k = _matmul_t_bf16(kin, wqkv_ref[D:2 * D, :]) + bqkv_ref[:, D:2 * D]
        v = _matmul_t_bf16(xkv, wqkv_ref[2 * D:3 * D, :]) + bqkv_ref[:, 2 * D:3 * D]
        k_s[...] = k.astype(jnp.bfloat16)
        v_s[...] = v.astype(jnp.bfloat16)

    # ---- Q projection for this query tile; 1/sqrt(dh) folded into q.
    q0 = pl.multiple_of(qi * tQ, tQ)
    xq = x_ref[0, pl.ds(q0, tQ), :]                     # [tQ, D] f32 residual input
    if has_pos:
        qin = xq + pos_ref[0, pl.ds(q0, tQ), :]
    else:
        qin = xq
    q = (_matmul_t_bf16(qin, wqkv_ref[0:D, :]) + bqkv_ref[:, 0:D]) * scale
    qb = q.astype(jnp.bfloat16)

    kb = k_s[...]                                       # [Lp, D] bf16
    vb = v_s[...]                                       # [Lp, D] bf16
    bias_tile = jnp.broadcast_to(bias_ref[0], (tQ, Lp)) # hoisted broadcast, f32

    # Static per-head loop; each head's live set is only [tQ, Lp] and the result is
    # immediately stored into a static lane slice of the VMEM slab (lane-dense output).
    for h in range(nhead):
        lo, hi = h * dh, (h + 1) * dh
        s = lax.dot_general(qb[:, lo:hi], kb[:, lo:hi], _CONTRACT_T,
                            preferred_element_type=jnp.float32)      # [tQ, Lp]
        s = s + bias_tile
        s = s - jnp.max(s, axis=-1, keepdims=True)
        p = jnp.exp(s)
        p = p * pl.reciprocal(jnp.sum(p, axis=-1, keepdims=True), approx=True)
        o_s[:, lo:hi] = jnp.dot(p.astype(jnp.bfloat16), vb[:, lo:hi],
                                preferred_element_type=jnp.float32)

    attn = _matmul_t_bf16(o_s[...], wo_ref[...]) + bo_ref[...]        # out projection
    o_ref[0] = _layernorm(xq + attn, g_ref[...], b_ref[...], eps)     # residual + LN


def attn_block(x, pos, key_bias, p, nhead, eps=1e-5, q_tile=128):
    """x, pos: [B, L, D]; key_bias: [B, 1, L]; returns LayerNorm(x + SelfAttn(x))."""
    B, L, D = x.shape
    tQ = min(q_tile, _round_up(L, 8))
    Lp = _round_up(L, tQ)
    if Lp != L:                                  # padded queries discarded; padded keys masked
        pad = Lp - L
        x = jnp.pad(x, ((0, 0), (0, pad), (0, 0)))
        if pos is not None:
            pos = jnp.pad(pos, ((0, 0), (0, pad), (0, 0)))
        key_bias = jnp.pad(key_bias, ((0, 0), (0, 0), (0, pad)), constant_values=NEG_INF)

    has_pos = pos is not None
    args = [x]
    in_specs = [pl.BlockSpec((1, Lp, D), lambda b, qi: (b, 0, 0))]
    if has_pos:
        args.append(pos)
        in_specs.append(pl.BlockSpec((1, Lp, D), lambda b, qi: (b, 0, 0)))
    args += [key_bias,
             p["in_proj_weight"].astype(jnp.bfloat16), p["in_proj_bias"].reshape(1, 3 * D),
             p["out_proj_weight"].astype(jnp.bfloat16), p["out_proj_bias"].reshape(1, D),
             p["norm1_g"].reshape(1, D), p["norm1_b"].reshape(1, D)]
    in_specs += [
        pl.BlockSpec((1, 1, Lp), lambda b, qi: (b, 0, 0)),
        _const_spec((3 * D, D), lambda b, qi: (0, 0)),
        _const_spec((1, 3 * D), lambda b, qi: (0, 0)),
        _const_spec((D, D), lambda b, qi: (0, 0)),
        _const_spec((1, D), lambda b, qi: (0, 0)),
        _const_spec((1, D), lambda b, qi: (0, 0)),
        _const_spec((1, D), lambda b, qi: (0, 0)),
    ]

    kern = functools.partial(_attn_block_kernel, nhead=nhead, tQ=tQ, eps=eps, has_pos=has_pos)
    out = pl.pallas_call(
        kern,
        out_shape=jax.ShapeDtypeStruct((B, Lp, D), jnp.float32),
        grid=(B, Lp // tQ),
        in_specs=in_specs,
        out_specs=pl.BlockSpec((1, tQ, D), lambda b, qi: (b, qi, 0)),
        scratch_shapes=[
            pltpu.VMEM((Lp, D), jnp.bfloat16),   # K (per batch element, reused across q tiles)
            pltpu.VMEM((Lp, D), jnp.bfloat16),   # V
            pltpu.VMEM((tQ, D), jnp.float32),    # lane-dense head-output slab
        ],
        compiler_params=pltpu.CompilerParams(
            dimension_semantics=("parallel", "arbitrary")),
    )(*args)
    return out[:, :L] if Lp != L else out


# --------------------------------------------------------------------- FFN sub-layer

def _ffn_block_kernel(*refs, eps, final_ln):
    if final_ln:
        (x_ref, w1_ref, b1_ref, w2_ref, b2_ref, g1_ref, be1_ref,
         g2_ref, be2_ref, o_ref) = refs
    else:
        (x_ref, w1_ref, b1_ref, w2_ref, b2_ref, g1_ref, be1_ref, o_ref) = refs

    x = x_ref[...]                                                   # [tM, D] f32
    h = jnp.maximum(_matmul_t_bf16(x, w1_ref[...]) + b1_ref[...], 0.0)   # [tM, dff] in VMEM
    y = _matmul_t_bf16(h, w2_ref[...]) + b2_ref[...]                 # [tM, D]
    z = _layernorm(x + y, g1_ref[...], be1_ref[...], eps)            # residual + LN (f32)
    if final_ln:                                                     # fused final encoder norm
        z = _layernorm(z, g2_ref[...], be2_ref[...], eps)
    o_ref[...] = z


def ffn_block(x, p, final_norm=None, eps=1e-5, row_tile=256):
    """x: [M, D]; returns LayerNorm(x + linear2(relu(linear1(x)))) [optionally + final LN]."""
    M, D = x.shape
    dff = p["linear1_w"].shape[0]
    tM = min(row_tile, _round_up(M, 8))
    Mp = _round_up(M, tM)
    xp = x if Mp == M else jnp.pad(x, ((0, Mp - M), (0, 0)))

    final_ln = final_norm is not None
    args = [xp,
            p["linear1_w"].astype(jnp.bfloat16), p["linear1_b"].reshape(1, dff),
            p["linear2_w"].astype(jnp.bfloat16), p["linear2_b"].reshape(1, D),
            p["norm2_g"].reshape(1, D), p["norm2_b"].reshape(1, D)]
    in_specs = [
        pl.BlockSpec((tM, D), lambda i: (i, 0)),
        _const_spec((dff, D), lambda i: (0, 0)),
        _const_spec((1, dff), lambda i: (0, 0)),
        _const_spec((D, dff), lambda i: (0, 0)),
        _const_spec((1, D), lambda i: (0, 0)),
        _const_spec((1, D), lambda i: (0, 0)),
        _const_spec((1, D), lambda i: (0, 0)),
    ]
    if final_ln:
        g2, b2 = final_norm
        args += [g2.reshape(1, D), b2.reshape(1, D)]
        in_specs += [_const_spec((1, D), lambda i: (0, 0)),
                     _const_spec((1, D), lambda i: (0, 0))]

    out = pl.pallas_call(
        functools.partial(_ffn_block_kernel, eps=eps, final_ln=final_ln),
        out_shape=jax.ShapeDtypeStruct((Mp, D), jnp.float32),
        grid=(Mp // tM,),
        in_specs=in_specs,
        out_specs=pl.BlockSpec((tM, D), lambda i: (i, 0)),
        compiler_params=pltpu.CompilerParams(dimension_semantics=("parallel",)),
    )(*args)
    return out[:M] if Mp != M else out


# --------------------------------------------------------------------- encoder forward

def transformer_encoder_forward(params, src, src_key_padding_mask=None, pos=None, *, nhead):
    """Mirrors TransformerEncoder.forward (DETR encoder layer, post-LN, eval mode).

    src: [L, B, D] (PyTorch nn.MultiheadAttention convention)
    src_key_padding_mask: [B, L] bool (True = padded key) or None
    pos: [L, B, D] or None
    returns: [L, B, D]
    """
    L, B, D = src.shape
    x = jnp.transpose(src, (1, 0, 2))                       # single layout change: [B, L, D]
    pos_b = None if pos is None else jnp.transpose(pos, (1, 0, 2))
    if src_key_padding_mask is None:
        key_bias = jnp.zeros((B, 1, L), jnp.float32)
    else:
        key_bias = jnp.where(src_key_padding_mask, NEG_INF, 0.0).astype(jnp.float32)
        key_bias = key_bias.reshape(B, 1, L)

    final_norm = None
    if params.get("norm_g") is not None:
        final_norm = (params["norm_g"], params["norm_b"])

    n_layers = len(params["layers"])
    for idx, lp in enumerate(params["layers"]):
        x = attn_block(x, pos_b, key_bias, lp, nhead)                   # fused attn sub-layer
        fuse = final_norm if idx == n_layers - 1 else None              # fuse final LN into last FFN
        x = ffn_block(x.reshape(B * L, D), lp, final_norm=fuse).reshape(B, L, D)

    return jnp.transpose(x, (1, 0, 2))                      # back to [L, B, D]


# --------------------------------------------------------------------- parameter init

def xavier_uniform(key, shape):
    fan_out, fan_in = shape
    limit = (6.0 / (fan_in + fan_out)) ** 0.5
    return jax.random.uniform(key, shape, jnp.float32, -limit, limit)


def encoder_layer_params(key, d, dff):
    ks = jax.random.split(key, 8)
    return {
        "in_proj_weight": xavier_uniform(ks[0], (3 * d, d)),
        "in_proj_bias": 0.02 * jax.random.normal(ks[1], (3 * d,), jnp.float32),
        "out_proj_weight": xavier_uniform(ks[2], (d, d)),
        "out_proj_bias": 0.02 * jax.random.normal(ks[3], (d,), jnp.float32),
        "linear1_w": xavier_uniform(ks[4], (dff, d)),
        "linear1_b": 0.02 * jax.random.normal(ks[5], (dff,), jnp.float32),
        "linear2_w": xavier_uniform(ks[6], (d, dff)),
        "linear2_b": 0.02 * jax.random.normal(ks[7], (d,), jnp.float32),
        "norm1_g": jnp.ones((d,), jnp.float32),
        "norm1_b": jnp.zeros((d,), jnp.float32),
        "norm2_g": jnp.ones((d,), jnp.float32),
        "norm2_b": jnp.zeros((d,), jnp.float32),
    }


def init_params(key, d, dff, num_layers, with_final_norm=True):
    keys = jax.random.split(key, num_layers)
    params = {"layers": [encoder_layer_params(k, d, dff) for k in keys]}
    if with_final_norm:
        params["norm_g"] = jnp.ones((d,), jnp.float32)
        params["norm_b"] = jnp.zeros((d,), jnp.float32)
    return params


# --------------------------------------------------------------------- main

if __name__ == "__main__":
    # Small, TPU-friendly config (last dim multiple of 128, rows multiple of 8).
    seq_len, bs, d_model = 16, 2, 128
    nhead = 8
    dim_feedforward = 256
    num_layers = 2

    key = jax.random.PRNGKey(0)
    k_src, k_pos, k_params = jax.random.split(key, 3)

    src = jax.random.normal(k_src, (seq_len, bs, d_model), jnp.float32)
    pos = jax.random.normal(k_pos, (seq_len, bs, d_model), jnp.float32)

    # Deterministic key-padding mask: trailing positions are padded (True).
    idx = lax.broadcasted_iota(jnp.int32, (bs, seq_len), 1)
    valid_len = jnp.array([[seq_len - 3], [seq_len - 5]], jnp.int32)
    src_key_padding_mask = idx >= valid_len

    params = init_params(k_params, d_model, dim_feedforward, num_layers)

    fwd = jax.jit(functools.partial(transformer_encoder_forward, nhead=nhead))
    out = fwd(params, src, src_key_padding_mask, pos)
    out = jax.block_until_ready(out)

    assert out.shape == (seq_len, bs, d_model), out.shape
    assert bool(jnp.isfinite(out).all())
    print("KERNEL_OK")
</pallas_src>

<mosaic_0001>
module attributes {stable_mosaic.version = 11 : i64} {
  func.func @k(%arg0: i32, %arg1: memref<8x128xf32, #tpu.memory_space<vmem>>, %arg2: memref<8x128xf32, #tpu.memory_space<vmem>>) attributes {dimension_semantics = [#tpu.dimension_semantics<arbitrary>], iteration_bounds = array<i64: 1>, scalar_prefetch = 0 : i64, scratch_operands = 0 : i64, tpu.core_type = #tpu.core_type<tc>, window_params = [{pipeline_mode = #tpu.pipeline_mode<synchronous>, transform_indices = @transform_0, window_bounds = array<i64: 8, 128>}, {pipeline_mode = #tpu.pipeline_mode<synchronous>, transform_indices = @transform_1, window_bounds = array<i64: 8, 128>}]} {
    %c0 = arith.constant 0 : index
    %c0_0 = arith.constant 0 : index
    %0 = vector.load %arg1[%c0, %c0_0] : memref<8x128xf32, #tpu.memory_space<vmem>>, vector<8x128xf32>
    %cst = arith.constant 1.000000e+00 : f32
    %1 = vector.broadcast %cst : f32 to vector<8x128xf32>
    %2 = arith.addf %0, %1 : vector<8x128xf32>
    %c0_1 = arith.constant 0 : index
    %c0_2 = arith.constant 0 : index
    %3 = vector.load %arg2[%c0_1, %c0_2] : memref<8x128xf32, #tpu.memory_space<vmem>>, vector<8x128xf32>
    tpu.vector_store %arg2[%c0_1, %c0_2], %2 {strides = array<i32>} : memref<8x128xf32, #tpu.memory_space<vmem>>, vector<8x128xf32>,
    return
  }
  func.func @transform_0(%arg0: i32) -> (i32, i32) {
    %c0_i32 = arith.constant 0 : i32
    %c0_i32_0 = arith.constant 0 : i32
    %c0_i32_1 = arith.constant 0 : i32
    return %c0_i32, %c0_i32_0 : i32, i32
  }
  func.func @transform_1(%arg0: i32) -> (i32, i32) {
    %c0_i32 = arith.constant 0 : i32
    %c0_i32_0 = arith.constant 0 : i32
    %c0_i32_1 = arith.constant 0 : i32
    return %c0_i32, %c0_i32_0 : i32, i32
  }
}

module attributes {stable_mosaic.version = 11 : i64} {
  func.func @_ffn_block_kernel(%arg0: i32, %arg1: memref<32x128xf32, #tpu.memory_space<vmem>>, %arg2: memref<256x128xbf16, #tpu.memory_space<vmem>>, %arg3: memref<1x256xf32, #tpu.memory_space<vmem>>, %arg4: memref<128x256xbf16, #tpu.memory_space<vmem>>, %arg5: memref<1x128xf32, #tpu.memory_space<vmem>>, %arg6: memref<1x128xf32, #tpu.memory_space<vmem>>, %arg7: memref<1x128xf32, #tpu.memory_space<vmem>>, %arg8: memref<1x128xf32, #tpu.memory_space<vmem>>, %arg9: memref<1x128xf32, #tpu.memory_space<vmem>>, %arg10: memref<32x128xf32, #tpu.memory_space<vmem>>) attributes {dimension_semantics = [#tpu.dimension_semantics<parallel>], iteration_bounds = array<i64: 1>, scalar_prefetch = 0 : i64, scratch_operands = 0 : i64, tpu.core_type = #tpu.core_type<tc>, window_params = [{transform_indices = @transform_0, window_bounds = array<i64: 32, 128>}, {pipeline_mode = #tpu.pipeline_mode<synchronous>, transform_indices = @transform_1, window_bounds = array<i64: 256, 128>}, {pipeline_mode = #tpu.pipeline_mode<synchronous>, transform_indices = @transform_2, window_bounds = array<i64: 1, 256>}, {pipeline_mode = #tpu.pipeline_mode<synchronous>, transform_indices = @transform_3, window_bounds = array<i64: 128, 256>}, {pipeline_mode = #tpu.pipeline_mode<synchronous>, transform_indices = @transform_4, window_bounds = array<i64: 1, 128>}, {pipeline_mode = #tpu.pipeline_mode<synchronous>, transform_indices = @transform_5, window_bounds = array<i64: 1, 128>}, {pipeline_mode = #tpu.pipeline_mode<synchronous>, transform_indices = @transform_6, window_bounds = array<i64: 1, 128>}, {pipeline_mode = #tpu.pipeline_mode<synchronous>, transform_indices = @transform_7, window_bounds = array<i64: 1, 128>}, {pipeline_mode = #tpu.pipeline_mode<synchronous>, transform_indices = @transform_8, window_bounds = array<i64: 1, 128>}, {transform_indices = @transform_9, window_bounds = array<i64: 32, 128>}]} {
    %c0 = arith.constant 0 : index
    %c0_0 = arith.constant 0 : index
    %0 = vector.load %arg1[%c0, %c0_0] : memref<32x128xf32, #tpu.memory_space<vmem>>, vector<32x128xf32>
    %c0_1 = arith.constant 0 : index
    %c0_2 = arith.constant 0 : index
    %1 = vector.load %arg2[%c0_1, %c0_2] : memref<256x128xbf16, #tpu.memory_space<vmem>>, vector<256x128xbf16>
    %2 = arith.truncf %0 : vector<32x128xf32> to vector<32x128xbf16>
    %cst = arith.constant dense<0.000000e+00> : vector<32x256xf32>
    %3 = tpu.matmul %2, %1, %cst {dimension_numbers = #tpu.dot_dimension_numbers<[1], [1], [0], [0], [0, 0, 1, 0], [], []>} : vector<32x128xbf16>, vector<256x128xbf16>, vector<32x256xf32> -> vector<32x256xf32>
    %c0_3 = arith.constant 0 : index
    %c0_4 = arith.constant 0 : index
    %4 = vector.load %arg3[%c0_3, %c0_4] : memref<1x256xf32, #tpu.memory_space<vmem>>, vector<1x256xf32>
    %5 = vector.broadcast %4 : vector<1x256xf32> to vector<32x256xf32>
    %6 = arith.addf %3, %5 : vector<32x256xf32>
    %cst_5 = arith.constant 0.000000e+00 : f32
    %7 = vector.broadcast %cst_5 : f32 to vector<32x256xf32>
    %8 = arith.maximumf %6, %7 : vector<32x256xf32>
    %c0_6 = arith.constant 0 : index
    %c0_7 = arith.constant 0 : index
    %9 = vector.load %arg4[%c0_6, %c0_7] : memref<128x256xbf16, #tpu.memory_space<vmem>>, vector<128x256xbf16>
    %10 = arith.truncf %8 : vector<32x256xf32> to vector<32x256xbf16>
    %cst_8 = arith.constant dense<0.000000e+00> : vector<32x128xf32>
    %11 = tpu.matmul %10, %9, %cst_8 {dimension_numbers = #tpu.dot_dimension_numbers<[1], [1], [0], [0], [0, 0, 1, 0], [], []>} : vector<32x256xbf16>, vector<128x256xbf16>, vector<32x128xf32> -> vector<32x128xf32>
    %c0_9 = arith.constant 0 : index
    %c0_10 = arith.constant 0 : index
    %12 = vector.load %arg5[%c0_9, %c0_10] : memref<1x128xf32, #tpu.memory_space<vmem>>, vector<1x128xf32>
    %13 = vector.broadcast %12 : vector<1x128xf32> to vector<32x128xf32>
    %14 = arith.addf %11, %13 : vector<32x128xf32>
    %15 = arith.addf %0, %14 : vector<32x128xf32>
    %c0_11 = arith.constant 0 : index
    %c0_12 = arith.constant 0 : index
    %16 = vector.load %arg6[%c0_11, %c0_12] : memref<1x128xf32, #tpu.memory_space<vmem>>, vector<1x128xf32>
    %c0_13 = arith.constant 0 : index
    %c0_14 = arith.constant 0 : index
    %17 = vector.load %arg7[%c0_13, %c0_14] : memref<1x128xf32, #tpu.memory_space<vmem>>, vector<1x128xf32>
    %cst_15 = arith.constant dense<0.000000e+00> : vector<32xf32>
    %18 = vector.multi_reduction <add>, %15, %cst_15 [1] : vector<32x128xf32> to vector<32xf32>
    %19 = vector.shape_cast %18 : vector<32xf32> to vector<32x1xf32>
    %cst_16 = arith.constant 1.280000e+02 : f32
    %20 = vector.broadcast %cst_16 : f32 to vector<32x1xf32>
    %21 = arith.divf %19, %20 : vector<32x1xf32>
    %22 = vector.broadcast %21 : vector<32x1xf32> to vector<32x128xf32>
    %23 = arith.subf %15, %22 : vector<32x128xf32>
    %24 = arith.mulf %23, %23 : vector<32x128xf32>
    %cst_17 = arith.constant dense<0.000000e+00> : vector<32xf32>
    %25 = vector.multi_reduction <add>, %24, %cst_17 [1] : vector<32x128xf32> to vector<32xf32>
    %26 = vector.shape_cast %25 : vector<32xf32> to vector<32x1xf32>
    %cst_18 = arith.constant 1.280000e+02 : f32
    %27 = vector.broadcast %cst_18 : f32 to vector<32x1xf32>
    %28 = arith.divf %26, %27 : vector<32x1xf32>
    %29 = vector.broadcast %21 : vector<32x1xf32> to vector<32x128xf32>
    %30 = arith.subf %15, %29 : vector<32x128xf32>
    %cst_19 = arith.constant 9.99999974E-6 : f32
    %31 = vector.broadcast %cst_19 : f32 to vector<32x1xf32>
    %32 = arith.addf %28, %31 : vector<32x1xf32>
    %33 = math.rsqrt %32 : vector<32x1xf32>
    %34 = vector.broadcast %33 : vector<32x1xf32> to vector<32x128xf32>
    %35 = arith.mulf %30, %34 : vector<32x128xf32>
    %36 = vector.broadcast %16 : vector<1x128xf32> to vector<32x128xf32>
    %37 = arith.mulf %35, %36 : vector<32x128xf32>
    %38 = vector.broadcast %17 : vector<1x128xf32> to vector<32x128xf32>
    %39 = arith.addf %37, %38 : vector<32x128xf32>
    %c0_20 = arith.constant 0 : index
    %c0_21 = arith.constant 0 : index
    %40 = vector.load %arg8[%c0_20, %c0_21] : memref<1x128xf32, #tpu.memory_space<vmem>>, vector<1x128xf32>
    %c0_22 = arith.constant 0 : index
    %c0_23 = arith.constant 0 : index
    %41 = vector.load %arg9[%c0_22, %c0_23] : memref<1x128xf32, #tpu.memory_space<vmem>>, vector<1x128xf32>
    %cst_24 = arith.constant dense<0.000000e+00> : vector<32xf32>
    %42 = vector.multi_reduction <add>, %39, %cst_24 [1] : vector<32x128xf32> to vector<32xf32>
    %43 = vector.shape_cast %42 : vector<32xf32> to vector<32x1xf32>
    %cst_25 = arith.constant 1.280000e+02 : f32
    %44 = vector.broadcast %cst_25 : f32 to vector<32x1xf32>
    %45 = arith.divf %43, %44 : vector<32x1xf32>
    %46 = vector.broadcast %45 : vector<32x1xf32> to vector<32x128xf32>
    %47 = arith.subf %39, %46 : vector<32x128xf32>
    %48 = arith.mulf %47, %47 : vector<32x128xf32>
    %cst_26 = arith.constant dense<0.000000e+00> : vector<32xf32>
    %49 = vector.multi_reduction <add>, %48, %cst_26 [1] : vector<32x128xf32> to vector<32xf32>
    %50 = vector.shape_cast %49 : vector<32xf32> to vector<32x1xf32>
    %cst_27 = arith.constant 1.280000e+02 : f32
    %51 = vector.broadcast %cst_27 : f32 to vector<32x1xf32>
    %52 = arith.divf %50, %51 : vector<32x1xf32>
    %53 = vector.broadcast %45 : vector<32x1xf32> to vector<32x128xf32>
    %54 = arith.subf %39, %53 : vector<32x128xf32>
    %cst_28 = arith.constant 9.99999974E-6 : f32
    %55 = vector.broadcast %cst_28 : f32 to vector<32x1xf32>
    %56 = arith.addf %52, %55 : vector<32x1xf32>
    %57 = math.rsqrt %56 : vector<32x1xf32>
    %58 = vector.broadcast %57 : vector<32x1xf32> to vector<32x128xf32>
    %59 = arith.mulf %54, %58 : vector<32x128xf32>
    %60 = vector.broadcast %40 : vector<1x128xf32> to vector<32x128xf32>
    %61 = arith.mulf %59, %60 : vector<32x128xf32>
    %62 = vector.broadcast %41 : vector<1x128xf32> to vector<32x128xf32>
    %63 = arith.addf %61, %62 : vector<32x128xf32>
    %c0_29 = arith.constant 0 : index
    %c0_30 = arith.constant 0 : index
    %64 = vector.load %arg10[%c0_29, %c0_30] : memref<32x128xf32, #tpu.memory_space<vmem>>, vector<32x128xf32>
    tpu.vector_store %arg10[%c0_29, %c0_30], %63 {strides = array<i32>} : memref<32x128xf32, #tpu.memory_space<vmem>>, vector<32x128xf32>,
    return
  }
  func.func @transform_0(%arg0: i32) -> (i32, i32) {
    %c0_i32 = arith.constant 0 : i32
    %c0_i32_0 = arith.constant 0 : i32
    return %arg0, %c0_i32 : i32, i32
  }
  func.func @transform_1(%arg0: i32) -> (i32, i32) {
    %c0_i32 = arith.constant 0 : i32
    %c0_i32_0 = arith.constant 0 : i32
    %c0_i32_1 = arith.constant 0 : i32
    return %c0_i32, %c0_i32_0 : i32, i32
  }
  func.func @transform_2(%arg0: i32) -> (i32, i32) {
    %c0_i32 = arith.constant 0 : i32
    %c0_i32_0 = arith.constant 0 : i32
    %c0_i32_1 = arith.constant 0 : i32
    return %c0_i32, %c0_i32_0 : i32, i32
  }
  func.func @transform_3(%arg0: i32) -> (i32, i32) {
    %c0_i32 = arith.constant 0 : i32
    %c0_i32_0 = arith.constant 0 : i32
    %c0_i32_1 = arith.constant 0 : i32
    return %c0_i32, %c0_i32_0 : i32, i32
  }
  func.func @transform_4(%arg0: i32) -> (i32, i32) {
    %c0_i32 = arith.constant 0 : i32
    %c0_i32_0 = arith.constant 0 : i32
    %c0_i32_1 = arith.constant 0 : i32
    return %c0_i32, %c0_i32_0 : i32, i32
  }
  func.func @transform_5(%arg0: i32) -> (i32, i32) {
    %c0_i32 = arith.constant 0 : i32
    %c0_i32_0 = arith.constant 0 : i32
    %c0_i32_1 = arith.constant 0 : i32
    return %c0_i32, %c0_i32_0 : i32, i32
  }
  func.func @transform_6(%arg0: i32) -> (i32, i32) {
    %c0_i32 = arith.constant 0 : i32
    %c0_i32_0 = arith.constant 0 : i32
    %c0_i32_1 = arith.constant 0 : i32
    return %c0_i32, %c0_i32_0 : i32, i32
  }
  func.func @transform_7(%arg0: i32) -> (i32, i32) {
    %c0_i32 = arith.constant 0 : i32
    %c0_i32_0 = arith.constant 0 : i32
    %c0_i32_1 = arith.constant 0 : i32
    return %c0_i32, %c0_i32_0 : i32, i32
  }
  func.func @transform_8(%arg0: i32) -> (i32, i32) {
    %c0_i32 = arith.constant 0 : i32
    %c0_i32_0 = arith.constant 0 : i32
    %c0_i32_1 = arith.constant 0 : i32
    return %c0_i32, %c0_i32_0 : i32, i32
  }
  func.func @transform_9(%arg0: i32) -> (i32, i32) {
    %c0_i32 = arith.constant 0 : i32
    %c0_i32_0 = arith.constant 0 : i32
    return %arg0, %c0_i32 : i32, i32
  }
}

module attributes {stable_mosaic.version = 11 : i64} {
  func.func @_attn_block_kernel(%arg0: i32, %arg1: i32, %arg2: memref<1x16x128xf32, #tpu.memory_space<vmem>>, %arg3: memref<1x16x128xf32, #tpu.memory_space<vmem>>, %arg4: memref<1x1x16xf32, #tpu.memory_space<vmem>>, %arg5: memref<384x128xbf16, #tpu.memory_space<vmem>>, %arg6: memref<1x384xf32, #tpu.memory_space<vmem>>, %arg7: memref<128x128xbf16, #tpu.memory_space<vmem>>, %arg8: memref<1x128xf32, #tpu.memory_space<vmem>>, %arg9: memref<1x128xf32, #tpu.memory_space<vmem>>, %arg10: memref<1x128xf32, #tpu.memory_space<vmem>>, %arg11: memref<1x16x128xf32, #tpu.memory_space<vmem>>, %arg12: memref<16x128xbf16, #tpu.memory_space<vmem>>, %arg13: memref<16x128xbf16, #tpu.memory_space<vmem>>, %arg14: memref<16x128xf32, #tpu.memory_space<vmem>>) attributes {dimension_semantics = [#tpu.dimension_semantics<parallel>, #tpu.dimension_semantics<arbitrary>], iteration_bounds = array<i64: 2, 1>, scalar_prefetch = 0 : i64, scratch_operands = 3 : i64, tpu.core_type = #tpu.core_type<tc>, window_params = [{transform_indices = @transform_0, window_bounds = array<i64: 1, 16, 128>}, {transform_indices = @transform_1, window_bounds = array<i64: 1, 16, 128>}, {transform_indices = @transform_2, window_bounds = array<i64: 1, 1, 16>}, {pipeline_mode = #tpu.pipeline_mode<synchronous>, transform_indices = @transform_3, window_bounds = array<i64: 384, 128>}, {pipeline_mode = #tpu.pipeline_mode<synchronous>, transform_indices = @transform_4, window_bounds = array<i64: 1, 384>}, {pipeline_mode = #tpu.pipeline_mode<synchronous>, transform_indices = @transform_5, window_bounds = array<i64: 128, 128>}, {pipeline_mode = #tpu.pipeline_mode<synchronous>, transform_indices = @transform_6, window_bounds = array<i64: 1, 128>}, {pipeline_mode = #tpu.pipeline_mode<synchronous>, transform_indices = @transform_7, window_bounds = array<i64: 1, 128>}, {pipeline_mode = #tpu.pipeline_mode<synchronous>, transform_indices = @transform_8, window_bounds = array<i64: 1, 128>}, {transform_indices = @transform_9, window_bounds = array<i64: 1, 16, 128>}]} {
    %c0_i32 = arith.constant 0 : i32
    %0 = arith.cmpi eq, %arg1, %c0_i32 : i32
    %1 = arith.extui %0 : i1 to i32
    %c0_i32_0 = arith.constant 0 : i32
    %2 = arith.cmpi ne, %1, %c0_i32_0 : i32
    scf.if %2 {
      %c0_76 = arith.constant 0 : index
      %c0_77 = arith.constant 0 : index
      %c0_78 = arith.constant 0 : index
      %206 = vector.load %arg2[%c0_76, %c0_77, %c0_78] : memref<1x16x128xf32, #tpu.memory_space<vmem>>, vector<1x16x128xf32>
      %207 = vector.shape_cast %206 : vector<1x16x128xf32> to vector<16x128xf32>
      %c0_79 = arith.constant 0 : index
      %c0_80 = arith.constant 0 : index
      %c0_81 = arith.constant 0 : index
      %208 = vector.load %arg3[%c0_79, %c0_80, %c0_81] : memref<1x16x128xf32, #tpu.memory_space<vmem>>, vector<1x16x128xf32>
      %209 = vector.shape_cast %208 : vector<1x16x128xf32> to vector<16x128xf32>
      %210 = arith.addf %207, %209 : vector<16x128xf32>
      %c128 = arith.constant 128 : index
      %c0_82 = arith.constant 0 : index
      %211 = vector.load %arg5[%c128, %c0_82] : memref<384x128xbf16, #tpu.memory_space<vmem>>, vector<128x128xbf16>
      %212 = arith.truncf %210 : vector<16x128xf32> to vector<16x128xbf16>
      %cst_83 = arith.constant dense<0.000000e+00> : vector<16x128xf32>
      %213 = tpu.matmul %212, %211, %cst_83 {dimension_numbers = #tpu.dot_dimension_numbers<[1], [1], [0], [0], [0, 0, 1, 0], [], []>} : vector<16x128xbf16>, vector<128x128xbf16>, vector<16x128xf32> -> vector<16x128xf32>
      %c0_84 = arith.constant 0 : index
      %c128_85 = arith.constant 128 : index
      %214 = vector.load %arg6[%c0_84, %c128_85] : memref<1x384xf32, #tpu.memory_space<vmem>>, vector<1x128xf32>
      %215 = vector.broadcast %214 : vector<1x128xf32> to vector<16x128xf32>
      %216 = arith.addf %213, %215 : vector<16x128xf32>
      %c256 = arith.constant 256 : index
      %c0_86 = arith.constant 0 : index
      %217 = vector.load %arg5[%c256, %c0_86] : memref<384x128xbf16, #tpu.memory_space<vmem>>, vector<128x128xbf16>
      %218 = arith.truncf %207 : vector<16x128xf32> to vector<16x128xbf16>
      %cst_87 = arith.constant dense<0.000000e+00> : vector<16x128xf32>
      %219 = tpu.matmul %218, %217, %cst_87 {dimension_numbers = #tpu.dot_dimension_numbers<[1], [1], [0], [0], [0, 0, 1, 0], [], []>} : vector<16x128xbf16>, vector<128x128xbf16>, vector<16x128xf32> -> vector<16x128xf32>
      %c0_88 = arith.constant 0 : index
      %c256_89 = arith.constant 256 : index
      %220 = vector.load %arg6[%c0_88, %c256_89] : memref<1x384xf32, #tpu.memory_space<vmem>>, vector<1x128xf32>
      %221 = vector.broadcast %220 : vector<1x128xf32> to vector<16x128xf32>
      %222 = arith.addf %219, %221 : vector<16x128xf32>
      %223 = arith.truncf %216 : vector<16x128xf32> to vector<16x128xbf16>
      %c0_90 = arith.constant 0 : index
      %c0_91 = arith.constant 0 : index
      %224 = vector.load %arg12[%c0_90, %c0_91] : memref<16x128xbf16, #tpu.memory_space<vmem>>, vector<16x128xbf16>
      tpu.vector_store %arg12[%c0_90, %c0_91], %223 {strides = array<i32>} : memref<16x128xbf16, #tpu.memory_space<vmem>>, vector<16x128xbf16>,
      %225 = arith.truncf %222 : vector<16x128xf32> to vector<16x128xbf16>
      %c0_92 = arith.constant 0 : index
      %c0_93 = arith.constant 0 : index
      %226 = vector.load %arg13[%c0_92, %c0_93] : memref<16x128xbf16, #tpu.memory_space<vmem>>, vector<16x128xbf16>
      tpu.vector_store %arg13[%c0_92, %c0_93], %225 {strides = array<i32>} : memref<16x128xbf16, #tpu.memory_space<vmem>>, vector<16x128xbf16>,
    } else {
    }
    %c16_i32 = arith.constant 16 : i32
    %3 = arith.muli %arg1, %c16_i32 : i32
    %4 = tpu.assume_multiple %3, 16 : i32
    %c0 = arith.constant 0 : index
    %5 = arith.index_cast %4 : i32 to index
    %c0_1 = arith.constant 0 : index
    %6 = vector.load %arg2[%c0, %5, %c0_1] : memref<1x16x128xf32, #tpu.memory_space<vmem>>, vector<1x16x128xf32>
    %7 = vector.shape_cast %6 : vector<1x16x128xf32> to vector<16x128xf32>
    %c0_2 = arith.constant 0 : index
    %8 = arith.index_cast %4 : i32 to index
    %c0_3 = arith.constant 0 : index
    %9 = vector.load %arg3[%c0_2, %8, %c0_3] : memref<1x16x128xf32, #tpu.memory_space<vmem>>, vector<1x16x128xf32>
    %10 = vector.shape_cast %9 : vector<1x16x128xf32> to vector<16x128xf32>
    %11 = arith.addf %7, %10 : vector<16x128xf32>
    %c0_4 = arith.constant 0 : index
    %c0_5 = arith.constant 0 : index
    %12 = vector.load %arg5[%c0_4, %c0_5] : memref<384x128xbf16, #tpu.memory_space<vmem>>, vector<128x128xbf16>
    %13 = arith.truncf %11 : vector<16x128xf32> to vector<16x128xbf16>
    %cst = arith.constant dense<0.000000e+00> : vector<16x128xf32>
    %14 = tpu.matmul %13, %12, %cst {dimension_numbers = #tpu.dot_dimension_numbers<[1], [1], [0], [0], [0, 0, 1, 0], [], []>} : vector<16x128xbf16>, vector<128x128xbf16>, vector<16x128xf32> -> vector<16x128xf32>
    %c0_6 = arith.constant 0 : index
    %c0_7 = arith.constant 0 : index
    %15 = vector.load %arg6[%c0_6, %c0_7] : memref<1x384xf32, #tpu.memory_space<vmem>>, vector<1x128xf32>
    %16 = vector.broadcast %15 : vector<1x128xf32> to vector<16x128xf32>
    %17 = arith.addf %14, %16 : vector<16x128xf32>
    %cst_8 = arith.constant 2.500000e-01 : f32
    %18 = vector.broadcast %cst_8 : f32 to vector<16x128xf32>
    %19 = arith.mulf %17, %18 : vector<16x128xf32>
    %20 = arith.truncf %19 : vector<16x128xf32> to vector<16x128xbf16>
    %c0_9 = arith.constant 0 : index
    %c0_10 = arith.constant 0 : index
    %21 = vector.load %arg12[%c0_9, %c0_10] : memref<16x128xbf16, #tpu.memory_space<vmem>>, vector<16x128xbf16>
    %c0_11 = arith.constant 0 : index
    %c0_12 = arith.constant 0 : index
    %22 = vector.load %arg13[%c0_11, %c0_12] : memref<16x128xbf16, #tpu.memory_space<vmem>>, vector<16x128xbf16>
    %c0_13 = arith.constant 0 : index
    %c0_14 = arith.constant 0 : index
    %c0_15 = arith.constant 0 : index
    %23 = vector.load %arg4[%c0_13, %c0_14, %c0_15] : memref<1x1x16xf32, #tpu.memory_space<vmem>>, vector<1x1x16xf32>
    %24 = vector.shape_cast %23 : vector<1x1x16xf32> to vector<1x16xf32>
    %25 = vector.shape_cast %24 : vector<1x16xf32> to vector<1x16xf32>
    %26 = vector.broadcast %25 : vector<1x16xf32> to vector<16x16xf32>
    %27 = vector.extract_strided_slice %20 {offsets = [0, 0], sizes = [16, 16], strides = [1, 1]} : vector<16x128xbf16> to vector<16x16xbf16>
    %28 = vector.extract_strided_slice %21 {offsets = [0, 0], sizes = [16, 16], strides = [1, 1]} : vector<16x128xbf16> to vector<16x16xbf16>
    %cst_16 = arith.constant dense<0.000000e+00> : vector<16x16xf32>
    %29 = tpu.matmul %27, %28, %cst_16 {dimension_numbers = #tpu.dot_dimension_numbers<[1], [1], [0], [0], [0, 0, 1, 0], [], []>} : vector<16x16xbf16>, vector<16x16xbf16>, vector<16x16xf32> -> vector<16x16xf32>
    %30 = arith.addf %29, %26 : vector<16x16xf32>
    %cst_17 = arith.constant dense<0xFF800000> : vector<16xf32>
    %31 = vector.multi_reduction <maximumf>, %30, %cst_17 [1] : vector<16x16xf32> to vector<16xf32>
    %32 = vector.shape_cast %31 : vector<16xf32> to vector<16x1xf32>
    %33 = vector.broadcast %32 : vector<16x1xf32> to vector<16x16xf32>
    %34 = arith.subf %30, %33 : vector<16x16xf32>
    %35 = math.exp %34 : vector<16x16xf32>
    %cst_18 = arith.constant dense<0.000000e+00> : vector<16xf32>
    %36 = vector.multi_reduction <add>, %35, %cst_18 [1] : vector<16x16xf32> to vector<16xf32>
    %37 = vector.shape_cast %36 : vector<16xf32> to vector<16x1xf32>
    %38 = tpu.reciprocal %37 {approx = true} : vector<16x1xf32> -> vector<16x1xf32>
    %39 = vector.broadcast %38 : vector<16x1xf32> to vector<16x16xf32>
    %40 = arith.mulf %35, %39 : vector<16x16xf32>
    %41 = arith.truncf %40 : vector<16x16xf32> to vector<16x16xbf16>
    %42 = vector.extract_strided_slice %22 {offsets = [0, 0], sizes = [16, 16], strides = [1, 1]} : vector<16x128xbf16> to vector<16x16xbf16>
    %cst_19 = arith.constant dense<0.000000e+00> : vector<16x16xf32>
    %43 = tpu.matmul %41, %42, %cst_19 {dimension_numbers = #tpu.dot_dimension_numbers<[1], [0], [0], [1], [0, 0, 1, 1], [], []>} : vector<16x16xbf16>, vector<16x16xbf16>, vector<16x16xf32> -> vector<16x16xf32>
    %c0_20 = arith.constant 0 : index
    %c0_21 = arith.constant 0 : index
    %44 = vector.load %arg14[%c0_20, %c0_21] : memref<16x128xf32, #tpu.memory_space<vmem>>, vector<16x16xf32>
    tpu.vector_store %arg14[%c0_20, %c0_21], %43 {strides = array<i32>} : memref<16x128xf32, #tpu.memory_space<vmem>>, vector<16x16xf32>,
    %45 = vector.extract_strided_slice %20 {offsets = [0, 16], sizes = [16, 16], strides = [1, 1]} : vector<16x128xbf16> to vector<16x16xbf16>
    %46 = vector.extract_strided_slice %21 {offsets = [0, 16], sizes = [16, 16], strides = [1, 1]} : vector<16x128xbf16> to vector<16x16xbf16>
    %cst_22 = arith.constant dense<0.000000e+00> : vector<16x16xf32>
    %47 = tpu.matmul %45, %46, %cst_22 {dimension_numbers = #tpu.dot_dimension_numbers<[1], [1], [0], [0], [0, 0, 1, 0], [], []>} : vector<16x16xbf16>, vector<16x16xbf16>, vector<16x16xf32> -> vector<16x16xf32>
    %48 = arith.addf %47, %26 : vector<16x16xf32>
    %cst_23 = arith.constant dense<0xFF800000> : vector<16xf32>
    %49 = vector.multi_reduction <maximumf>, %48, %cst_23 [1] : vector<16x16xf32> to vector<16xf32>
    %50 = vector.shape_cast %49 : vector<16xf32> to vector<16x1xf32>
    %51 = vector.broadcast %50 : vector<16x1xf32> to vector<16x16xf32>
    %52 = arith.subf %48, %51 : vector<16x16xf32>
    %53 = math.exp %52 : vector<16x16xf32>
    %cst_24 = arith.constant dense<0.000000e+00> : vector<16xf32>
    %54 = vector.multi_reduction <add>, %53, %cst_24 [1] : vector<16x16xf32> to vector<16xf32>
    %55 = vector.shape_cast %54 : vector<16xf32> to vector<16x1xf32>
    %56 = tpu.reciprocal %55 {approx = true} : vector<16x1xf32> -> vector<16x1xf32>
    %57 = vector.broadcast %56 : vector<16x1xf32> to vector<16x16xf32>
    %58 = arith.mulf %53, %57 : vector<16x16xf32>
    %59 = arith.truncf %58 : vector<16x16xf32> to vector<16x16xbf16>
    %60 = vector.extract_strided_slice %22 {offsets = [0, 16], sizes = [16, 16], strides = [1, 1]} : vector<16x128xbf16> to vector<16x16xbf16>
    %cst_25 = arith.constant dense<0.000000e+00> : vector<16x16xf32>
    %61 = tpu.matmul %59, %60, %cst_25 {dimension_numbers = #tpu.dot_dimension_numbers<[1], [0], [0], [1], [0, 0, 1, 1], [], []>} : vector<16x16xbf16>, vector<16x16xbf16>, vector<16x16xf32> -> vector<16x16xf32>
    %c0_26 = arith.constant 0 : index
    %c16 = arith.constant 16 : index
    %62 = vector.load %arg14[%c0_26, %c16] : memref<16x128xf32, #tpu.memory_space<vmem>>, vector<16x16xf32>
    tpu.vector_store %arg14[%c0_26, %c16], %61 {strides = array<i32>} : memref<16x128xf32, #tpu.memory_space<vmem>>, vector<16x16xf32>,
    %63 = vector.extract_strided_slice %20 {offsets = [0, 32], sizes = [16, 16], strides = [1, 1]} : vector<16x128xbf16> to vector<16x16xbf16>
    %64 = vector.extract_strided_slice %21 {offsets = [0, 32], sizes = [16, 16], strides = [1, 1]} : vector<16x128xbf16> to vector<16x16xbf16>
    %cst_27 = arith.constant dense<0.000000e+00> : vector<16x16xf32>
    %65 = tpu.matmul %63, %64, %cst_27 {dimension_numbers = #tpu.dot_dimension_numbers<[1], [1], [0], [0], [0, 0, 1, 0], [], []>} : vector<16x16xbf16>, vector<16x16xbf16>, vector<16x16xf32> -> vector<16x16xf32>
    %66 = arith.addf %65, %26 : vector<16x16xf32>
    %cst_28 = arith.constant dense<0xFF800000> : vector<16xf32>
    %67 = vector.multi_reduction <maximumf>, %66, %cst_28 [1] : vector<16x16xf32> to vector<16xf32>
    %68 = vector.shape_cast %67 : vector<16xf32> to vector<16x1xf32>
    %69 = vector.broadcast %68 : vector<16x1xf32> to vector<16x16xf32>
    %70 = arith.subf %66, %69 : vector<16x16xf32>
    %71 = math.exp %70 : vector<16x16xf32>
    %cst_29 = arith.constant dense<0.000000e+00> : vector<16xf32>
    %72 = vector.multi_reduction <add>, %71, %cst_29 [1] : vector<16x16xf32> to vector<16xf32>
    %73 = vector.shape_cast %72 : vector<16xf32> to vector<16x1xf32>
    %74 = tpu.reciprocal %73 {approx = true} : vector<16x1xf32> -> vector<16x1xf32>
    %75 = vector.broadcast %74 : vector<16x1xf32> to vector<16x16xf32>
    %76 = arith.mulf %71, %75 : vector<16x16xf32>
    %77 = arith.truncf %76 : vector<16x16xf32> to vector<16x16xbf16>
    %78 = vector.extract_strided_slice %22 {offsets = [0, 32], sizes = [16, 16], strides = [1, 1]} : vector<16x128xbf16> to vector<16x16xbf16>
    %cst_30 = arith.constant dense<0.000000e+00> : vector<16x16xf32>
    %79 = tpu.matmul %77, %78, %cst_30 {dimension_numbers = #tpu.dot_dimension_numbers<[1], [0], [0], [1], [0, 0, 1, 1], [], []>} : vector<16x16xbf16>, vector<16x16xbf16>, vector<16x16xf32> -> vector<16x16xf32>
    %c0_31 = arith.constant 0 : index
    %c32 = arith.constant 32 : index
    %80 = vector.load %arg14[%c0_31, %c32] : memref<16x128xf32, #tpu.memory_space<vmem>>, vector<16x16xf32>
    tpu.vector_store %arg14[%c0_31, %c32], %79 {strides = array<i32>} : memref<16x128xf32, #tpu.memory_space<vmem>>, vector<16x16xf32>,
    %81 = vector.extract_strided_slice %20 {offsets = [0, 48], sizes = [16, 16], strides = [1, 1]} : vector<16x128xbf16> to vector<16x16xbf16>
    %82 = vector.extract_strided_slice %21 {offsets = [0, 48], sizes = [16, 16], strides = [1, 1]} : vector<16x128xbf16> to vector<16x16xbf16>
    %cst_32 = arith.constant dense<0.000000e+00> : vector<16x16xf32>
    %83 = tpu.matmul %81, %82, %cst_32 {dimension_numbers = #tpu.dot_dimension_numbers<[1], [1], [0], [0], [0, 0, 1, 0], [], []>} : vector<16x16xbf16>, vector<16x16xbf16>, vector<16x16xf32> -> vector<16x16xf32>
    %84 = arith.addf %83, %26 : vector<16x16xf32>
    %cst_33 = arith.constant dense<0xFF800000> : vector<16xf32>
    %85 = vector.multi_reduction <maximumf>, %84, %cst_33 [1] : vector<16x16xf32> to vector<16xf32>
    %86 = vector.shape_cast %85 : vector<16xf32> to vector<16x1xf32>
    %87 = vector.broadcast %86 : vector<16x1xf32> to vector<16x16xf32>
    %88 = arith.subf %84, %87 : vector<16x16xf32>
    %89 = math.exp %88 : vector<16x16xf32>
    %cst_34 = arith.constant dense<0.000000e+00> : vector<16xf32>
    %90 = vector.multi_reduction <add>, %89, %cst_34 [1] : vector<16x16xf32> to vector<16xf32>
    %91 = vector.shape_cast %90 : vector<16xf32> to vector<16x1xf32>
    %92 = tpu.reciprocal %91 {approx = true} : vector<16x1xf32> -> vector<16x1xf32>
    %93 = vector.broadcast %92 : vector<16x1xf32> to vector<16x16xf32>
    %94 = arith.mulf %89, %93 : vector<16x16xf32>
    %95 = arith.truncf %94 : vector<16x16xf32> to vector<16x16xbf16>
    %96 = vector.extract_strided_slice %22 {offsets = [0, 48], sizes = [16, 16], strides = [1, 1]} : vector<16x128xbf16> to vector<16x16xbf16>
    %cst_35 = arith.constant dense<0.000000e+00> : vector<16x16xf32>
    %97 = tpu.matmul %95, %96, %cst_35 {dimension_numbers = #tpu.dot_dimension_numbers<[1], [0], [0], [1], [0, 0, 1, 1], [], []>} : vector<16x16xbf16>, vector<16x16xbf16>, vector<16x16xf32> -> vector<16x16xf32>
    %c0_36 = arith.constant 0 : index
    %c48 = arith.constant 48 : index
    %98 = vector.load %arg14[%c0_36, %c48] : memref<16x128xf32, #tpu.memory_space<vmem>>, vector<16x16xf32>
    tpu.vector_store %arg14[%c0_36, %c48], %97 {strides = array<i32>} : memref<16x128xf32, #tpu.memory_space<vmem>>, vector<16x16xf32>,
    %99 = vector.extract_strided_slice %20 {offsets = [0, 64], sizes = [16, 16], strides = [1, 1]} : vector<16x128xbf16> to vector<16x16xbf16>
    %100 = vector.extract_strided_slice %21 {offsets = [0, 64], sizes = [16, 16], strides = [1, 1]} : vector<16x128xbf16> to vector<16x16xbf16>
    %cst_37 = arith.constant dense<0.000000e+00> : vector<16x16xf32>
    %101 = tpu.matmul %99, %100, %cst_37 {dimension_numbers = #tpu.dot_dimension_numbers<[1], [1], [0], [0], [0, 0, 1, 0], [], []>} : vector<16x16xbf16>, vector<16x16xbf16>, vector<16x16xf32> -> vector<16x16xf32>
    %102 = arith.addf %101, %26 : vector<16x16xf32>
    %cst_38 = arith.constant dense<0xFF800000> : vector<16xf32>
    %103 = vector.multi_reduction <maximumf>, %102, %cst_38 [1] : vector<16x16xf32> to vector<16xf32>
    %104 = vector.shape_cast %103 : vector<16xf32> to vector<16x1xf32>
    %105 = vector.broadcast %104 : vector<16x1xf32> to vector<16x16xf32>
    %106 = arith.subf %102, %105 : vector<16x16xf32>
    %107 = math.exp %106 : vector<16x16xf32>
    %cst_39 = arith.constant dense<0.000000e+00> : vector<16xf32>
    %108 = vector.multi_reduction <add>, %107, %cst_39 [1] : vector<16x16xf32> to vector<16xf32>
    %109 = vector.shape_cast %108 : vector<16xf32> to vector<16x1xf32>
    %110 = tpu.reciprocal %109 {approx = true} : vector<16x1xf32> -> vector<16x1xf32>
    %111 = vector.broadcast %110 : vector<16x1xf32> to vector<16x16xf32>
    %112 = arith.mulf %107, %111 : vector<16x16xf32>
    %113 = arith.truncf %112 : vector<16x16xf32> to vector<16x16xbf16>
    %114 = vector.extract_strided_slice %22 {offsets = [0, 64], sizes = [16, 16], strides = [1, 1]} : vector<16x128xbf16> to vector<16x16xbf16>
    %cst_40 = arith.constant dense<0.000000e+00> : vector<16x16xf32>
    %115 = tpu.matmul %113, %114, %cst_40 {dimension_numbers = #tpu.dot_dimension_numbers<[1], [0], [0], [1], [0, 0, 1, 1], [], []>} : vector<16x16xbf16>, vector<16x16xbf16>, vector<16x16xf32> -> vector<16x16xf32>
    %c0_41 = arith.constant 0 : index
    %c64 = arith.constant 64 : index
    %116 = vector.load %arg14[%c0_41, %c64] : memref<16x128xf32, #tpu.memory_space<vmem>>, vector<16x16xf32>
    tpu.vector_store %arg14[%c0_41, %c64], %115 {strides = array<i32>} : memref<16x128xf32, #tpu.memory_space<vmem>>, vector<16x16xf32>,
    %117 = vector.extract_strided_slice %20 {offsets = [0, 80], sizes = [16, 16], strides = [1, 1]} : vector<16x128xbf16> to vector<16x16xbf16>
    %118 = vector.extract_strided_slice %21 {offsets = [0, 80], sizes = [16, 16], strides = [1, 1]} : vector<16x128xbf16> to vector<16x16xbf16>
    %cst_42 = arith.constant dense<0.000000e+00> : vector<16x16xf32>
    %119 = tpu.matmul %117, %118, %cst_42 {dimension_numbers = #tpu.dot_dimension_numbers<[1], [1], [0], [0], [0, 0, 1, 0], [], []>} : vector<16x16xbf16>, vector<16x16xbf16>, vector<16x16xf32> -> vector<16x16xf32>
    %120 = arith.addf %119, %26 : vector<16x16xf32>
    %cst_43 = arith.constant dense<0xFF800000> : vector<16xf32>
    %121 = vector.multi_reduction <maximumf>, %120, %cst_43 [1] : vector<16x16xf32> to vector<16xf32>
    %122 = vector.shape_cast %121 : vector<16xf32> to vector<16x1xf32>
    %123 = vector.broadcast %122 : vector<16x1xf32> to vector<16x16xf32>
    %124 = arith.subf %120, %123 : vector<16x16xf32>
    %125 = math.exp %124 : vector<16x16xf32>
    %cst_44 = arith.constant dense<0.000000e+00> : vector<16xf32>
    %126 = vector.multi_reduction <add>, %125, %cst_44 [1] : vector<16x16xf32> to vector<16xf32>
    %127 = vector.shape_cast %126 : vector<16xf32> to vector<16x1xf32>
    %128 = tpu.reciprocal %127 {approx = true} : vector<16x1xf32> -> vector<16x1xf32>
    %129 = vector.broadcast %128 : vector<16x1xf32> to vector<16x16xf32>
    %130 = arith.mulf %125, %129 : vector<16x16xf32>
    %131 = arith.truncf %130 : vector<16x16xf32> to vector<16x16xbf16>
    %132 = vector.extract_strided_slice %22 {offsets = [0, 80], sizes = [16, 16], strides = [1, 1]} : vector<16x128xbf16> to vector<16x16xbf16>
    %cst_45 = arith.constant dense<0.000000e+00> : vector<16x16xf32>
    %133 = tpu.matmul %131, %132, %cst_45 {dimension_numbers = #tpu.dot_dimension_numbers<[1], [0], [0], [1], [0, 0, 1, 1], [], []>} : vector<16x16xbf16>, vector<16x16xbf16>, vector<16x16xf32> -> vector<16x16xf32>
    %c0_46 = arith.constant 0 : index
    %c80 = arith.constant 80 : index
    %134 = vector.load %arg14[%c0_46, %c80] : memref<16x128xf32, #tpu.memory_space<vmem>>, vector<16x16xf32>
    tpu.vector_store %arg14[%c0_46, %c80], %133 {strides = array<i32>} : memref<16x128xf32, #tpu.memory_space<vmem>>, vector<16x16xf32>,
    %135 = vector.extract_strided_slice %20 {offsets = [0, 96], sizes = [16, 16], strides = [1, 1]} : vector<16x128xbf16> to vector<16x16xbf16>
    %136 = vector.extract_strided_slice %21 {offsets = [0, 96], sizes = [16, 16], strides = [1, 1]} : vector<16x128xbf16> to vector<16x16xbf16>
    %cst_47 = arith.constant dense<0.000000e+00> : vector<16x16xf32>
    %137 = tpu.matmul %135, %136, %cst_47 {dimension_numbers = #tpu.dot_dimension_numbers<[1], [1], [0], [0], [0, 0, 1, 0], [], []>} : vector<16x16xbf16>, vector<16x16xbf16>, vector<16x16xf32> -> vector<16x16xf32>
    %138 = arith.addf %137, %26 : vector<16x16xf32>
    %cst_48 = arith.constant dense<0xFF800000> : vector<16xf32>
    %139 = vector.multi_reduction <maximumf>, %138, %cst_48 [1] : vector<16x16xf32> to vector<16xf32>
    %140 = vector.shape_cast %139 : vector<16xf32> to vector<16x1xf32>
    %141 = vector.broadcast %140 : vector<16x1xf32> to vector<16x16xf32>
    %142 = arith.subf %138, %141 : vector<16x16xf32>
    %143 = math.exp %142 : vector<16x16xf32>
    %cst_49 = arith.constant dense<0.000000e+00> : vector<16xf32>
    %144 = vector.multi_reduction <add>, %143, %cst_49 [1] : vector<16x16xf32> to vector<16xf32>
    %145 = vector.shape_cast %144 : vector<16xf32> to vector<16x1xf32>
    %146 = tpu.reciprocal %145 {approx = true} : vector<16x1xf32> -> vector<16x1xf32>
    %147 = vector.broadcast %146 : vector<16x1xf32> to vector<16x16xf32>
    %148 = arith.mulf %143, %147 : vector<16x16xf32>
    %149 = arith.truncf %148 : vector<16x16xf32> to vector<16x16xbf16>
    %150 = vector.extract_strided_slice %22 {offsets = [0, 96], sizes = [16, 16], strides = [1, 1]} : vector<16x128xbf16> to vector<16x16xbf16>
    %cst_50 = arith.constant dense<0.000000e+00> : vector<16x16xf32>
    %151 = tpu.matmul %149, %150, %cst_50 {dimension_numbers = #tpu.dot_dimension_numbers<[1], [0], [0], [1], [0, 0, 1, 1], [], []>} : vector<16x16xbf16>, vector<16x16xbf16>, vector<16x16xf32> -> vector<16x16xf32>
    %c0_51 = arith.constant 0 : index
    %c96 = arith.constant 96 : index
    %152 = vector.load %arg14[%c0_51, %c96] : memref<16x128xf32, #tpu.memory_space<vmem>>, vector<16x16xf32>
    tpu.vector_store %arg14[%c0_51, %c96], %151 {strides = array<i32>} : memref<16x128xf32, #tpu.memory_space<vmem>>, vector<16x16xf32>,
    %153 = vector.extract_strided_slice %20 {offsets = [0, 112], sizes = [16, 16], strides = [1, 1]} : vector<16x128xbf16> to vector<16x16xbf16>
    %154 = vector.extract_strided_slice %21 {offsets = [0, 112], sizes = [16, 16], strides = [1, 1]} : vector<16x128xbf16> to vector<16x16xbf16>
    %cst_52 = arith.constant dense<0.000000e+00> : vector<16x16xf32>
    %155 = tpu.matmul %153, %154, %cst_52 {dimension_numbers = #tpu.dot_dimension_numbers<[1], [1], [0], [0], [0, 0, 1, 0], [], []>} : vector<16x16xbf16>, vector<16x16xbf16>, vector<16x16xf32> -> vector<16x16xf32>
    %156 = arith.addf %155, %26 : vector<16x16xf32>
    %cst_53 = arith.constant dense<0xFF800000> : vector<16xf32>
    %157 = vector.multi_reduction <maximumf>, %156, %cst_53 [1] : vector<16x16xf32> to vector<16xf32>
    %158 = vector.shape_cast %157 : vector<16xf32> to vector<16x1xf32>
    %159 = vector.broadcast %158 : vector<16x1xf32> to vector<16x16xf32>
    %160 = arith.subf %156, %159 : vector<16x16xf32>
    %161 = math.exp %160 : vector<16x16xf32>
    %cst_54 = arith.constant dense<0.000000e+00> : vector<16xf32>
    %162 = vector.multi_reduction <add>, %161, %cst_54 [1] : vector<16x16xf32> to vector<16xf32>
    %163 = vector.shape_cast %162 : vector<16xf32> to vector<16x1xf32>
    %164 = tpu.reciprocal %163 {approx = true} : vector<16x1xf32> -> vector<16x1xf32>
    %165 = vector.broadcast %164 : vector<16x1xf32> to vector<16x16xf32>
    %166 = arith.mulf %161, %165 : vector<16x16xf32>
    %167 = arith.truncf %166 : vector<16x16xf32> to vector<16x16xbf16>
    %168 = vector.extract_strided_slice %22 {offsets = [0, 112], sizes = [16, 16], strides = [1, 1]} : vector<16x128xbf16> to vector<16x16xbf16>
    %cst_55 = arith.constant dense<0.000000e+00> : vector<16x16xf32>
    %169 = tpu.matmul %167, %168, %cst_55 {dimension_numbers = #tpu.dot_dimension_numbers<[1], [0], [0], [1], [0, 0, 1, 1], [], []>} : vector<16x16xbf16>, vector<16x16xbf16>, vector<16x16xf32> -> vector<16x16xf32>
    %c0_56 = arith.constant 0 : index
    %c112 = arith.constant 112 : index
    %170 = vector.load %arg14[%c0_56, %c112] : memref<16x128xf32, #tpu.memory_space<vmem>>, vector<16x16xf32>
    tpu.vector_store %arg14[%c0_56, %c112], %169 {strides = array<i32>} : memref<16x128xf32, #tpu.memory_space<vmem>>, vector<16x16xf32>,
    %c0_57 = arith.constant 0 : index
    %c0_58 = arith.constant 0 : index
    %171 = vector.load %arg14[%c0_57, %c0_58] : memref<16x128xf32, #tpu.memory_space<vmem>>, vector<16x128xf32>
    %c0_59 = arith.constant 0 : index
    %c0_60 = arith.constant 0 : index
    %172 = vector.load %arg7[%c0_59, %c0_60] : memref<128x128xbf16, #tpu.memory_space<vmem>>, vector<128x128xbf16>
    %173 = arith.truncf %171 : vector<16x128xf32> to vector<16x128xbf16>
    %cst_61 = arith.constant dense<0.000000e+00> : vector<16x128xf32>
    %174 = tpu.matmul %173, %172, %cst_61 {dimension_numbers = #tpu.dot_dimension_numbers<[1], [1], [0], [0], [0, 0, 1, 0], [], []>} : vector<16x128xbf16>, vector<128x128xbf16>, vector<16x128xf32> -> vector<16x128xf32>
    %c0_62 = arith.constant 0 : index
    %c0_63 = arith.constant 0 : index
    %175 = vector.load %arg8[%c0_62, %c0_63] : memref<1x128xf32, #tpu.memory_space<vmem>>, vector<1x128xf32>
    %176 = vector.broadcast %175 : vector<1x128xf32> to vector<16x128xf32>
    %177 = arith.addf %174, %176 : vector<16x128xf32>
    %178 = arith.addf %7, %177 : vector<16x128xf32>
    %c0_64 = arith.constant 0 : index
    %c0_65 = arith.constant 0 : index
    %179 = vector.load %arg9[%c0_64, %c0_65] : memref<1x128xf32, #tpu.memory_space<vmem>>, vector<1x128xf32>
    %c0_66 = arith.constant 0 : index
    %c0_67 = arith.constant 0 : index
    %180 = vector.load %arg10[%c0_66, %c0_67] : memref<1x128xf32, #tpu.memory_space<vmem>>, vector<1x128xf32>
    %cst_68 = arith.constant dense<0.000000e+00> : vector<16xf32>
    %181 = vector.multi_reduction <add>, %178, %cst_68 [1] : vector<16x128xf32> to vector<16xf32>
    %182 = vector.shape_cast %181 : vector<16xf32> to vector<16x1xf32>
    %cst_69 = arith.constant 1.280000e+02 : f32
    %183 = vector.broadcast %cst_69 : f32 to vector<16x1xf32>
    %184 = arith.divf %182, %183 : vector<16x1xf32>
    %185 = vector.broadcast %184 : vector<16x1xf32> to vector<16x128xf32>
    %186 = arith.subf %178, %185 : vector<16x128xf32>
    %187 = arith.mulf %186, %186 : vector<16x128xf32>
    %cst_70 = arith.constant dense<0.000000e+00> : vector<16xf32>
    %188 = vector.multi_reduction <add>, %187, %cst_70 [1] : vector<16x128xf32> to vector<16xf32>
    %189 = vector.shape_cast %188 : vector<16xf32> to vector<16x1xf32>
    %cst_71 = arith.constant 1.280000e+02 : f32
    %190 = vector.broadcast %cst_71 : f32 to vector<16x1xf32>
    %191 = arith.divf %189, %190 : vector<16x1xf32>
    %192 = vector.broadcast %184 : vector<16x1xf32> to vector<16x128xf32>
    %193 = arith.subf %178, %192 : vector<16x128xf32>
    %cst_72 = arith.constant 9.99999974E-6 : f32
    %194 = vector.broadcast %cst_72 : f32 to vector<16x1xf32>
    %195 = arith.addf %191, %194 : vector<16x1xf32>
    %196 = math.rsqrt %195 : vector<16x1xf32>
    %197 = vector.broadcast %196 : vector<16x1xf32> to vector<16x128xf32>
    %198 = arith.mulf %193, %197 : vector<16x128xf32>
    %199 = vector.broadcast %179 : vector<1x128xf32> to vector<16x128xf32>
    %200 = arith.mulf %198, %199 : vector<16x128xf32>
    %201 = vector.broadcast %180 : vector<1x128xf32> to vector<16x128xf32>
    %202 = arith.addf %200, %201 : vector<16x128xf32>
    %c0_73 = arith.constant 0 : index
    %c0_74 = arith.constant 0 : index
    %c0_75 = arith.constant 0 : index
    %203 = vector.load %arg11[%c0_73, %c0_74, %c0_75] : memref<1x16x128xf32, #tpu.memory_space<vmem>>, vector<1x16x128xf32>
    %204 = vector.shape_cast %203 : vector<1x16x128xf32> to vector<16x128xf32>
    %205 = vector.shape_cast %202 : vector<16x128xf32> to vector<1x16x128xf32>
    tpu.vector_store %arg11[%c0_73, %c0_74, %c0_75], %205 {strides = array<i32>} : memref<1x16x128xf32, #tpu.memory_space<vmem>>, vector<1x16x128xf32>,
    return
  }
  func.func @transform_0(%arg0: i32, %arg1: i32) -> (i32, i32, i32) {
    %c0_i32 = arith.constant 0 : i32
    %c0_i32_0 = arith.constant 0 : i32
    %c0_i32_1 = arith.constant 0 : i32
    return %arg0, %c0_i32, %c0_i32_0 : i32, i32, i32
  }
  func.func @transform_1(%arg0: i32, %arg1: i32) -> (i32, i32, i32) {
    %c0_i32 = arith.constant 0 : i32
    %c0_i32_0 = arith.constant 0 : i32
    %c0_i32_1 = arith.constant 0 : i32
    return %arg0, %c0_i32, %c0_i32_0 : i32, i32, i32
  }
  func.func @transform_2(%arg0: i32, %arg1: i32) -> (i32, i32, i32) {
    %c0_i32 = arith.constant 0 : i32
    %c0_i32_0 = arith.constant 0 : i32
    %c0_i32_1 = arith.constant 0 : i32
    return %arg0, %c0_i32, %c0_i32_0 : i32, i32, i32
  }
  func.func @transform_3(%arg0: i32, %arg1: i32) -> (i32, i32) {
    %c0_i32 = arith.constant 0 : i32
    %c0_i32_0 = arith.constant 0 : i32
    %c0_i32_1 = arith.constant 0 : i32
    return %c0_i32, %c0_i32_0 : i32, i32
  }
  func.func @transform_4(%arg0: i32, %arg1: i32) -> (i32, i32) {
    %c0_i32 = arith.constant 0 : i32
    %c0_i32_0 = arith.constant 0 : i32
    %c0_i32_1 = arith.constant 0 : i32
    return %c0_i32, %c0_i32_0 : i32, i32
  }
  func.func @transform_5(%arg0: i32, %arg1: i32) -> (i32, i32) {
    %c0_i32 = arith.constant 0 : i32
    %c0_i32_0 = arith.constant 0 : i32
    %c0_i32_1 = arith.constant 0 : i32
    return %c0_i32, %c0_i32_0 : i32, i32
  }
  func.func @transform_6(%arg0: i32, %arg1: i32) -> (i32, i32) {
    %c0_i32 = arith.constant 0 : i32
    %c0_i32_0 = arith.constant 0 : i32
    %c0_i32_1 = arith.constant 0 : i32
    return %c0_i32, %c0_i32_0 : i32, i32
  }
  func.func @transform_7(%arg0: i32, %arg1: i32) -> (i32, i32) {
    %c0_i32 = arith.constant 0 : i32
    %c0_i32_0 = arith.constant 0 : i32
    %c0_i32_1 = arith.constant 0 : i32
    return %c0_i32, %c0_i32_0 : i32, i32
  }
  func.func @transform_8(%arg0: i32, %arg1: i32) -> (i32, i32) {
    %c0_i32 = arith.constant 0 : i32
    %c0_i32_0 = arith.constant 0 : i32
    %c0_i32_1 = arith.constant 0 : i32
    return %c0_i32, %c0_i32_0 : i32, i32
  }
  func.func @transform_9(%arg0: i32, %arg1: i32) -> (i32, i32, i32) {
    %c0_i32 = arith.constant 0 : i32
    %c0_i32_0 = arith.constant 0 : i32
    return %arg0, %arg1, %c0_i32 : i32, i32, i32
  }
}

module attributes {stable_mosaic.version = 11 : i64} {
  func.func @_ffn_block_kernel(%arg0: i32, %arg1: memref<32x128xf32, #tpu.memory_space<vmem>>, %arg2: memref<256x128xbf16, #tpu.memory_space<vmem>>, %arg3: memref<1x256xf32, #tpu.memory_space<vmem>>, %arg4: memref<128x256xbf16, #tpu.memory_space<vmem>>, %arg5: memref<1x128xf32, #tpu.memory_space<vmem>>, %arg6: memref<1x128xf32, #tpu.memory_space<vmem>>, %arg7: memref<1x128xf32, #tpu.memory_space<vmem>>, %arg8: memref<32x128xf32, #tpu.memory_space<vmem>>) attributes {dimension_semantics = [#tpu.dimension_semantics<parallel>], iteration_bounds = array<i64: 1>, scalar_prefetch = 0 : i64, scratch_operands = 0 : i64, tpu.core_type = #tpu.core_type<tc>, window_params = [{transform_indices = @transform_0, window_bounds = array<i64: 32, 128>}, {pipeline_mode = #tpu.pipeline_mode<synchronous>, transform_indices = @transform_1, window_bounds = array<i64: 256, 128>}, {pipeline_mode = #tpu.pipeline_mode<synchronous>, transform_indices = @transform_2, window_bounds = array<i64: 1, 256>}, {pipeline_mode = #tpu.pipeline_mode<synchronous>, transform_indices = @transform_3, window_bounds = array<i64: 128, 256>}, {pipeline_mode = #tpu.pipeline_mode<synchronous>, transform_indices = @transform_4, window_bounds = array<i64: 1, 128>}, {pipeline_mode = #tpu.pipeline_mode<synchronous>, transform_indices = @transform_5, window_bounds = array<i64: 1, 128>}, {pipeline_mode = #tpu.pipeline_mode<synchronous>, transform_indices = @transform_6, window_bounds = array<i64: 1, 128>}, {transform_indices = @transform_7, window_bounds = array<i64: 32, 128>}]} {
    %c0 = arith.constant 0 : index
    %c0_0 = arith.constant 0 : index
    %0 = vector.load %arg1[%c0, %c0_0] : memref<32x128xf32, #tpu.memory_space<vmem>>, vector<32x128xf32>
    %c0_1 = arith.constant 0 : index
    %c0_2 = arith.constant 0 : index
    %1 = vector.load %arg2[%c0_1, %c0_2] : memref<256x128xbf16, #tpu.memory_space<vmem>>, vector<256x128xbf16>
    %2 = arith.truncf %0 : vector<32x128xf32> to vector<32x128xbf16>
    %cst = arith.constant dense<0.000000e+00> : vector<32x256xf32>
    %3 = tpu.matmul %2, %1, %cst {dimension_numbers = #tpu.dot_dimension_numbers<[1], [1], [0], [0], [0, 0, 1, 0], [], []>} : vector<32x128xbf16>, vector<256x128xbf16>, vector<32x256xf32> -> vector<32x256xf32>
    %c0_3 = arith.constant 0 : index
    %c0_4 = arith.constant 0 : index
    %4 = vector.load %arg3[%c0_3, %c0_4] : memref<1x256xf32, #tpu.memory_space<vmem>>, vector<1x256xf32>
    %5 = vector.broadcast %4 : vector<1x256xf32> to vector<32x256xf32>
    %6 = arith.addf %3, %5 : vector<32x256xf32>
    %cst_5 = arith.constant 0.000000e+00 : f32
    %7 = vector.broadcast %cst_5 : f32 to vector<32x256xf32>
    %8 = arith.maximumf %6, %7 : vector<32x256xf32>
    %c0_6 = arith.constant 0 : index
    %c0_7 = arith.constant 0 : index
    %9 = vector.load %arg4[%c0_6, %c0_7] : memref<128x256xbf16, #tpu.memory_space<vmem>>, vector<128x256xbf16>
    %10 = arith.truncf %8 : vector<32x256xf32> to vector<32x256xbf16>
    %cst_8 = arith.constant dense<0.000000e+00> : vector<32x128xf32>
    %11 = tpu.matmul %10, %9, %cst_8 {dimension_numbers = #tpu.dot_dimension_numbers<[1], [1], [0], [0], [0, 0, 1, 0], [], []>} : vector<32x256xbf16>, vector<128x256xbf16>, vector<32x128xf32> -> vector<32x128xf32>
    %c0_9 = arith.constant 0 : index
    %c0_10 = arith.constant 0 : index
    %12 = vector.load %arg5[%c0_9, %c0_10] : memref<1x128xf32, #tpu.memory_space<vmem>>, vector<1x128xf32>
    %13 = vector.broadcast %12 : vector<1x128xf32> to vector<32x128xf32>
    %14 = arith.addf %11, %13 : vector<32x128xf32>
    %15 = arith.addf %0, %14 : vector<32x128xf32>
    %c0_11 = arith.constant 0 : index
    %c0_12 = arith.constant 0 : index
    %16 = vector.load %arg6[%c0_11, %c0_12] : memref<1x128xf32, #tpu.memory_space<vmem>>, vector<1x128xf32>
    %c0_13 = arith.constant 0 : index
    %c0_14 = arith.constant 0 : index
    %17 = vector.load %arg7[%c0_13, %c0_14] : memref<1x128xf32, #tpu.memory_space<vmem>>, vector<1x128xf32>
    %cst_15 = arith.constant dense<0.000000e+00> : vector<32xf32>
    %18 = vector.multi_reduction <add>, %15, %cst_15 [1] : vector<32x128xf32> to vector<32xf32>
    %19 = vector.shape_cast %18 : vector<32xf32> to vector<32x1xf32>
    %cst_16 = arith.constant 1.280000e+02 : f32
    %20 = vector.broadcast %cst_16 : f32 to vector<32x1xf32>
    %21 = arith.divf %19, %20 : vector<32x1xf32>
    %22 = vector.broadcast %21 : vector<32x1xf32> to vector<32x128xf32>
    %23 = arith.subf %15, %22 : vector<32x128xf32>
    %24 = arith.mulf %23, %23 : vector<32x128xf32>
    %cst_17 = arith.constant dense<0.000000e+00> : vector<32xf32>
    %25 = vector.multi_reduction <add>, %24, %cst_17 [1] : vector<32x128xf32> to vector<32xf32>
    %26 = vector.shape_cast %25 : vector<32xf32> to vector<32x1xf32>
    %cst_18 = arith.constant 1.280000e+02 : f32
    %27 = vector.broadcast %cst_18 : f32 to vector<32x1xf32>
    %28 = arith.divf %26, %27 : vector<32x1xf32>
    %29 = vector.broadcast %21 : vector<32x1xf32> to vector<32x128xf32>
    %30 = arith.subf %15, %29 : vector<32x128xf32>
    %cst_19 = arith.constant 9.99999974E-6 : f32
    %31 = vector.broadcast %cst_19 : f32 to vector<32x1xf32>
    %32 = arith.addf %28, %31 : vector<32x1xf32>
    %33 = math.rsqrt %32 : vector<32x1xf32>
    %34 = vector.broadcast %33 : vector<32x1xf32> to vector<32x128xf32>
    %35 = arith.mulf %30, %34 : vector<32x128xf32>
    %36 = vector.broadcast %16 : vector<1x128xf32> to vector<32x128xf32>
    %37 = arith.mulf %35, %36 : vector<32x128xf32>
    %38 = vector.broadcast %17 : vector<1x128xf32> to vector<32x128xf32>
    %39 = arith.addf %37, %38 : vector<32x128xf32>
    %c0_20 = arith.constant 0 : index
    %c0_21 = arith.constant 0 : index
    %40 = vector.load %arg8[%c0_20, %c0_21] : memref<32x128xf32, #tpu.memory_space<vmem>>, vector<32x128xf32>
    tpu.vector_store %arg8[%c0_20, %c0_21], %39 {strides = array<i32>} : memref<32x128xf32, #tpu.memory_space<vmem>>, vector<32x128xf32>,
    return
  }
  func.func @transform_0(%arg0: i32) -> (i32, i32) {
    %c0_i32 = arith.constant 0 : i32
    %c0_i32_0 = arith.constant 0 : i32
    return %arg0, %c0_i32 : i32, i32
  }
  func.func @transform_1(%arg0: i32) -> (i32, i32) {
    %c0_i32 = arith.constant 0 : i32
    %c0_i32_0 = arith.constant 0 : i32
    %c0_i32_1 = arith.constant 0 : i32
    return %c0_i32, %c0_i32_0 : i32, i32
  }
  func.func @transform_2(%arg0: i32) -> (i32, i32) {
    %c0_i32 = arith.constant 0 : i32
    %c0_i32_0 = arith.constant 0 : i32
    %c0_i32_1 = arith.constant 0 : i32
    return %c0_i32, %c0_i32_0 : i32, i32
  }
  func.func @transform_3(%arg0: i32) -> (i32, i32) {
    %c0_i32 = arith.constant 0 : i32
    %c0_i32_0 = arith.constant 0 : i32
    %c0_i32_1 = arith.constant 0 : i32
    return %c0_i32, %c0_i32_0 : i32, i32
  }
  func.func @transform_4(%arg0: i32) -> (i32, i32) {
    %c0_i32 = arith.constant 0 : i32
    %c0_i32_0 = arith.constant 0 : i32
    %c0_i32_1 = arith.constant 0 : i32
    return %c0_i32, %c0_i32_0 : i32, i32
  }
  func.func @transform_5(%arg0: i32) -> (i32, i32) {
    %c0_i32 = arith.constant 0 : i32
    %c0_i32_0 = arith.constant 0 : i32
    %c0_i32_1 = arith.constant 0 : i32
    return %c0_i32, %c0_i32_0 : i32, i32
  }
  func.func @transform_6(%arg0: i32) -> (i32, i32) {
    %c0_i32 = arith.constant 0 : i32
    %c0_i32_0 = arith.constant 0 : i32
    %c0_i32_1 = arith.constant 0 : i32
    return %c0_i32, %c0_i32_0 : i32, i32
  }
  func.func @transform_7(%arg0: i32) -> (i32, i32) {
    %c0_i32 = arith.constant 0 : i32
    %c0_i32_0 = arith.constant 0 : i32
    return %arg0, %c0_i32 : i32, i32
  }
}

</mosaic_0001>

<bundles_post_ra>
// kernel: tpu_custom_call.1
= control target key start
LH: loop header
LB: loop body
LE: loop exit
PB: predicated region body
PF: predicated region fallthrough
CT: control target
= control target key end

     0   :  { %6 = vsyncpa [#allocation3], 0  ;;  %s115_s0 = inlined_call_operand.hbm [shape: f32[8,128], index: 0, kind: input, shape index: {}]   ;;  %s116_s1 = inlined_call_operand.hbm [shape: f32[8,128], index: 1, kind: output, shape index: {}]  }
   0x1   :  { %7 = vsyncpa [#allocation4], 0  ;;  %s13_s8 = sshll.u32 %s115_s0, 4  ;;  %s97_s9 = smov [#allocation2]   ;;  %s14_s8 = int_to_ptr.hbm [resolvable:$true] %s13_s8 }
   0x2   :  { %s15_s10 = sshll.u32 %s97_s9, 4  ;;  %s16_s10 = int_to_ptr.vmem [resolvable:$true] %s15_s10 }
   0x3   :  { %18 = dma.hbm_to_vmem [thread:$0]  %s14_s8, 128, %s16_s10, [#allocation3]  }
   0x4   :  { %93 = dma.done.wait [#allocation3], 128  }
   0x5   :  { %94 = vsyncadd [#allocation3], 4294967168  ;;  %s98_s11 = smov [#allocation5]   ;;  %s33_s15 = sshll.u32 %s116_s1, 4  ;;  %v23_v0 = vld [vmem:[#allocation2] sm:$0xff]  ;;  %s34_s15 = int_to_ptr.hbm [resolvable:$true] %s33_s15 }
   0x6   :  { %s31_s12 = sshll.u32 %s98_s11, 4  ;;  %v24_v1 = vadd.f32 1.0, %v23_v0  ;;  %s32_s12 = int_to_ptr.vmem [resolvable:$true] %s31_s12 }
   0x8   :  { %25 = vst [vmem:[#allocation5] sm:$0xff] %v24_v1 }
   0x9   :  { %36 = dma.vmem_to_hbm [thread:$0]  %s32_s12, 128, %s34_s15, [#allocation4]  }
   0xa   :  { %95 = dma.done.wait [#allocation4], 128  }
   0xb   :  { %96 = vsyncadd [#allocation4], 4294967168 }
   0xc   :  { %41 = vsyncpa [#allocation3], 1 }
   0xd   :  { %42 = vsyncpa [#allocation4], 1 }

// kernel: transformer_encoder_forward.7
= control target key start
LH: loop header
LB: loop body
LE: loop exit
PB: predicated region body
PF: predicated region fallthrough
CT: control target
= control target key end

     0   :  { %s1046_s1 = inlined_call_operand.vmem [shape: bf16[256,128], index: 1, kind: input, shape index: {}]   ;;  %s1047_s3 = inlined_call_operand.vmem [shape: bf16[128,256], index: 3, kind: input, shape index: {}]   ;;  %s1048_s0 = inlined_call_operand.vmem [shape: f32[32,128], index: 0, kind: input, shape index: {}]   ;;  %s1049_s4 = inlined_call_operand.vmem [shape: f32[1,128], index: 4, kind: input, shape index: {}]   ;;  %s1050_s2 = inlined_call_operand.vmem [shape: f32[1,256], index: 2, kind: input, shape index: {}]   ;;  %s1051_s5 = inlined_call_operand.vmem [shape: f32[1,128], index: 5, kind: input, shape index: {}]   ;;  %s1052_s6 = inlined_call_operand.vmem [shape: f32[1,128], index: 6, kind: input, shape index: {}]   ;;  %s1053_s7 = inlined_call_operand.vmem [shape: f32[1,128], index: 7, kind: input, shape index: {}]   ;;  %s1054_s8 = inlined_call_operand.vmem [shape: f32[1,128], index: 8, kind: input, shape index: {}]   ;;  %s1055_s9 = inlined_call_operand.vmem [shape: f32[32,128], index: 9, kind: output, shape index: {}]  }
   0x1   :  { %v706_v0 = vld [vmem:[%s1046_s1 + $0x38] sm:$0xff]  ;;  %v705_v2 = vld [vmem:[%s1046_s1 + $0x30] sm:$0xff]  ;;  %v704_v4 = vld [vmem:[%s1046_s1 + $0x28] sm:$0xff] }
   0x2   :  { %v714_v1 = vld [vmem:[%s1046_s1 + $0x78] sm:$0xff]  ;;  %172 = vmatpush.bf16.xpose.msra.mxu0 %v706_v0  ;;  %v713_v3 = vld [vmem:[%s1046_s1 + $0x70] sm:$0xff]  ;;  %v712_v5 = vld [vmem:[%s1046_s1 + $0x68] sm:$0xff] }
   0x3   :  { %191 = vmatpush.bf16.xpose.msra.mxu1 %v714_v1  ;;  %v703_v6 = vld [vmem:[%s1046_s1 + $0x20] sm:$0xff]  ;;  %v702_v8 = vld [vmem:[%s1046_s1 + $0x18] sm:$0xff]  ;;  %v701_v10 = vld [vmem:[%s1046_s1 + $0x10] sm:$0xff] }
   0x4   :  { %v711_v7 = vld [vmem:[%s1046_s1 + $0x60] sm:$0xff]  ;;  %v710_v9 = vld [vmem:[%s1046_s1 + $0x58] sm:$0xff]  ;;  %v709_v11 = vld [vmem:[%s1046_s1 + $0x50] sm:$0xff] }
   0x5   :  { %v700_v12 = vld [vmem:[%s1046_s1 + $0x8] sm:$0xff]  ;;  %v693_v14 = vld [vmem:[%s1047_s3 + $0x70] sm:$0xf]  ;;  %v730_v15 = vld [vmem:[%s1047_s3 + $0x74] sm:$0xf0] }
   0x6   :  { %v708_v13 = vld [vmem:[%s1046_s1 + $0x48] sm:$0xff]  ;;  %v729_v16 = vld [vmem:[%s1047_s3 + $0x74] sm:$0xf]  ;;  %v694_v17 = vor.u32 %v730_v15, %v693_v14  ;;  %v695_v18 = vld [vmem:[%s1047_s3 + $0x78] sm:$0xf0] }
   0x7   :  { %v698_v19 = vor.u32 %v729_v16, %v695_v18  ;;  %v699_v20 = vld [vmem:[%s1046_s1] sm:$0xff]  ;;  %v728_v22 = vld [vmem:[%s1047_s3 + $0x64] sm:$0xf0]  ;;  %v687_v25 = vld [vmem:[%s1047_s3 + $0x68] sm:$0xf0] }
   0x8   :  { %322 = vmatpush.bf16.xpose.msra.mxu2 %v694_v17  ;;  %v685_v21 = vld [vmem:[%s1047_s3 + $0x60] sm:$0xf]  ;;  %v727_v24 = vld [vmem:[%s1047_s3 + $0x64] sm:$0xf]  ;;  %v886_v29 = vld [vmem:[%s1048_s0 + $0x8] sm:$0xff] }
   0x9   :  { %341 = vmatpush.bf16.xpose.msra.mxu3 %v698_v19  ;;  %v707_v23 = vld [vmem:[%s1046_s1 + $0x40] sm:$0xff]  ;;  %v686_v26 = vor.u32 %v728_v22, %v685_v21  ;;  %v690_v27 = vor.u32 %v727_v24, %v687_v25  ;;  %v677_v31 = vld [vmem:[%s1047_s3 + $0x50] sm:$0xf]  ;;  %v726_v32 = vld [vmem:[%s1047_s3 + $0x54] sm:$0xf0] }
   0xa   :  { %173 = vmatpush.bf16.xpose.msra.mxu0 %v705_v2  ;;  %v881_v28 = vld [vmem:[%s1048_s0] sm:$0xff]  ;;  %v725_v33 = vld [vmem:[%s1047_s3 + $0x54] sm:$0xf]  ;;  %v679_v34 = vld [vmem:[%s1047_s3 + $0x58] sm:$0xf0]  ;;  %v678_v35 = vor.u32 %v726_v32, %v677_v31 }
   0xb   :  { %192 = vmatpush.bf16.xpose.msra.mxu1 %v713_v3  ;;  %v68_v30 = vpack.c.bf16 %v886_v29, %v881_v28  ;;  %v682_v36 = vor.u32 %v725_v33, %v679_v34  ;;  %v669_v37 = vld [vmem:[%s1047_s3 + $0x40] sm:$0xf]  ;;  %v724_v38 = vld [vmem:[%s1047_s3 + $0x44] sm:$0xf0]  ;;  %v723_v39 = vld [vmem:[%s1047_s3 + $0x44] sm:$0xf] }
   0xc   :  { %v671_v40 = vld [vmem:[%s1047_s3 + $0x48] sm:$0xf0]  ;;  %v670_v41 = vor.u32 %v724_v38, %v669_v37  ;;  %v917_v43 = vld [vmem:[%s1048_s0 + $0x10] sm:$0xff]  ;;  %v922_v44 = vld [vmem:[%s1048_s0 + $0x18] sm:$0xff] }
   0xd   :  { %v674_v42 = vor.u32 %v723_v39, %v671_v40  ;;  %v69_v45 = vpack.c.bf16 %v922_v44, %v917_v43  ;;  %v661_v46 = vld [vmem:[%s1047_s3 + $0x30] sm:$0xf]  ;;  %v722_v47 = vld [vmem:[%s1047_s3 + $0x34] sm:$0xf0]  ;;  %v721_v48 = vld [vmem:[%s1047_s3 + $0x34] sm:$0xf] }
   0xe   :  { %v663_v49 = vld [vmem:[%s1047_s3 + $0x38] sm:$0xf0]  ;;  %v662_v50 = vor.u32 %v722_v47, %v661_v46  ;;  %v653_v52 = vld [vmem:[%s1047_s3 + $0x20] sm:$0xf]  ;;  %v720_v53 = vld [vmem:[%s1047_s3 + $0x24] sm:$0xf0] }
   0xf   :  { %v666_v51 = vor.u32 %v721_v48, %v663_v49  ;;  %v719_v54 = vld [vmem:[%s1047_s3 + $0x24] sm:$0xf]  ;;  %v655_v55 = vld [vmem:[%s1047_s3 + $0x28] sm:$0xf0]  ;;  %v654_v56 = vor.u32 %v720_v53, %v653_v52  ;;  %v645_v58 = vld [vmem:[%s1047_s3 + $0x10] sm:$0xf] }
  0x10   :  { %323 = vmatpush.bf16.xpose.msra.mxu2 %v686_v26  ;;  %v658_v57 = vor.u32 %v719_v54, %v655_v55  ;;  %v718_v59 = vld [vmem:[%s1047_s3 + $0x14] sm:$0xf0]  ;;  %v717_v60 = vld [vmem:[%s1047_s3 + $0x14] sm:$0xf]  ;;  %v647_v62 = vld [vmem:[%s1047_s3 + $0x18] sm:$0xf0] }
  0x11   :  { %342 = vmatpush.bf16.xpose.msra.mxu3 %v690_v27  ;;  %v646_v61 = vor.u32 %v718_v59, %v645_v58  ;;  %v650_v63 = vor.u32 %v717_v60, %v647_v62  ;;  %v637_v0 = vld [vmem:[%s1047_s3] sm:$0xf]  ;;  %v716_v1 = vld [vmem:[%s1047_s3 + $0x4] sm:$0xf0]  ;;  %v715_v2 = vld [vmem:[%s1047_s3 + $0x4] sm:$0xf] }
  0x12   :  { %174 = vmatpush.bf16.xpose.msra.mxu0 %v704_v4  ;;  %v638_v3 = vor.u32 %v716_v1, %v637_v0  ;;  %v639_v4 = vld [vmem:[%s1047_s3 + $0x8] sm:$0xf0]  ;;  %v732_v39 = vld [vmem:[%s1049_s4] ss:$0 sm:$0xff] }
  0x13   :  { %193 = vmatpush.bf16.xpose.msra.mxu1 %v712_v5  ;;  %v642_v5 = vor.u32 %v715_v2, %v639_v4 }
  0x18   :  { %324 = vmatpush.bf16.xpose.msra.mxu2 %v678_v35 }
  0x19   :  { %343 = vmatpush.bf16.xpose.msra.mxu3 %v682_v36 }
  0x1a   :  { %175 = vmatpush.bf16.xpose.msra.mxu0 %v703_v6  ;;  %v70_v6 = vld [vmem:[%s1050_s2] sm:$0x3] }
  0x1b   :  { %194 = vmatpush.bf16.xpose.msra.mxu1 %v711_v7 }
  0x20   :  { %325 = vmatpush.bf16.xpose.msra.mxu2 %v670_v41 }
  0x21   :  { %344 = vmatpush.bf16.xpose.msra.mxu3 %v674_v42 }
  0x22   :  { %176 = vmatpush.bf16.xpose.msra.mxu0 %v702_v8 }
  0x23   :  { %195 = vmatpush.bf16.xpose.msra.mxu1 %v710_v9  ;;  %v72_v9 = vperm.slane %v70_v6, 0 }
  0x28   :  { %326 = vmatpush.bf16.xpose.msra.mxu2 %v662_v50 }
  0x29   :  { %345 = vmatpush.bf16.xpose.msra.mxu3 %v666_v51 }
  0x2a   :  { %177 = vmatpush.bf16.xpose.msra.mxu0 %v701_v10  ;;  %v73_v10 = vperm.slane %v70_v6, 1 }
  0x2b   :  { %196 = vmatpush.bf16.xpose.msra.mxu1 %v709_v11 }
  0x30   :  { %327 = vmatpush.bf16.xpose.msra.mxu2 %v654_v56 }
  0x31   :  { %346 = vmatpush.bf16.xpose.msra.mxu3 %v658_v57 }
  0x32   :  { %178 = vmatpush.bf16.xpose.msra.mxu0 %v700_v12 }
  0x33   :  { %197 = vmatpush.bf16.xpose.msra.mxu1 %v708_v13 }
  0x38   :  { %328 = vmatpush.bf16.xpose.msra.mxu2 %v646_v61  ;;  %v755_v61 = vmov 128.0  }
  0x39   :  { %347 = vmatpush.bf16.xpose.msra.mxu3 %v650_v63  ;;  %737 = vrcp.f32 %v755_v61 }
  0x3a   :  { %179 = vmatpush.bf16.xpose.msra.mxu0 %v699_v20 }
  0x3b   :  { %198 = vmatpush.bf16.xpose.msra.mxu1 %v707_v23 }
  0x3f   :  { %v738_v62 = vpop.eup %737 }
  0x40   :  { %329 = vmatpush.bf16.xpose.msra.mxu2 %v638_v3  ;;  %v375_v63 = vmul.f32 128.0, %v738_v62  ;;  %vm379_vm0 = vweird.f32 %v738_v62 }
  0x41   :  { %180 = vmatmul.bf16.vlgmr.msra.gmra.mxu0 %v68_v30  ;;  %348 = vmatpush.bf16.xpose.msra.mxu3 %v642_v5 }
  0x42   :  { %199 = vmatmul.bf16.vlgmr.msra.gmra.mxu1 %v68_v30 }
  0x51   :  { %185 = vmatmul.bf16.gmra.mxu0 %v69_v45 }
  0x52   :  { %204 = vmatmul.bf16.gmra.mxu1 %v69_v45 }
  0xbe   :  { %v181_v7 = vpop.f32.mrf.mxu0 }
  0xbf   :  { %v200_v8 = vpop.f32.mrf.mxu1  ;;  %v182_v11 = vadd.f32 %v181_v7, %v72_v9 }
  0xc0   :  { %v201_v12 = vadd.f32 %v200_v8, %v73_v10 }
  0xc1   :  { %v210_v17 = vmax.f32 %v182_v11, 0.0 }
  0xc2   :  { %v211_v18 = vmax.f32 %v201_v12, 0.0 }
  0xc6   :  { %v183_v13 = vpop.f32.mrf.mxu0 }
  0xc7   :  { %v202_v14 = vpop.f32.mrf.mxu1  ;;  %v184_v15 = vadd.f32 %v183_v13, %v72_v9 }
  0xc8   :  { %v203_v16 = vadd.f32 %v202_v14, %v73_v10 }
  0xc9   :  { %v212_v19 = vmax.f32 %v184_v15, 0.0 }
  0xca   :  { %v213_v20 = vmax.f32 %v203_v16, 0.0 }
  0xcb   :  { %v234_v21 = vpack.c.bf16 %v212_v19, %v210_v17 }
  0xcc   :  { %v235_v22 = vpack.c.bf16 %v213_v20, %v211_v18 }
  0xcd   :  { %330 = vmatmul.bf16.vlgmr.msra.gmra.mxu2 %v234_v21 }
  0xce   :  { %349 = vmatmul.bf16.vlgmr.msra.gmra.mxu3 %v235_v22  ;;  %v186_v23 = vpop.f32.mrf.mxu0 }
  0xcf   :  { %v205_v24 = vpop.f32.mrf.mxu1  ;;  %v187_v25 = vadd.f32 %v186_v23, %v72_v9 }
  0xd0   :  { %v206_v26 = vadd.f32 %v205_v24, %v73_v10 }
  0xd1   :  { %v214_v33 = vmax.f32 %v187_v25, 0.0 }
  0xd2   :  { %v215_v34 = vmax.f32 %v206_v26, 0.0 }
  0xd6   :  { %v188_v27 = vpop.f32.mrf.mxu0 }
  0xd7   :  { %v207_v30 = vpop.f32.mrf.mxu1  ;;  %v189_v31 = vadd.f32 %v188_v27, %v72_v9 }
  0xd8   :  { %v208_v32 = vadd.f32 %v207_v30, %v73_v10 }
  0xd9   :  { %v216_v35 = vmax.f32 %v189_v31, 0.0 }
  0xda   :  { %v217_v36 = vmax.f32 %v208_v32, 0.0 }
  0xdb   :  { %v236_v37 = vpack.c.bf16 %v216_v35, %v214_v33 }
  0xdc   :  { %v237_v38 = vpack.c.bf16 %v217_v36, %v215_v34  ;;  %v733_v36 = vld [vmem:[%s1051_s5] ss:$0 sm:$0xff] }
  0xdd   :  { %335 = vmatmul.bf16.gmra.mxu2 %v236_v37 }
  0xde   :  { %354 = vmatmul.bf16.gmra.mxu3 %v237_v38 }
 0x150   :  { %v331_v40 = vpop.f32.mrf.mxu2 }
 0x151   :  { %v350_v41 = vpop.f32.mrf.mxu3  ;;  %v332_v42 = vadd.f32 %v732_v39, %v331_v40  ;;  %v734_v40 = vld [vmem:[%s1052_s6] ss:$0 sm:$0xff] }
 0x153   :  { %v351_v45 = vadd.f32 %v350_v41, %v332_v42 }
 0x155   :  { %v360_v46 = vadd.f32 %v351_v45, %v881_v28 }
 0x157   :  { %366 = vadd.xlane.f32.xlu0 %v360_v46 }
 0x158   :  { %v333_v47 = vpop.f32.mrf.mxu2 }
 0x159   :  { %v352_v48 = vpop.f32.mrf.mxu3  ;;  %v334_v49 = vadd.f32 %v732_v39, %v333_v47 }
 0x15b   :  { %v353_v50 = vadd.f32 %v352_v48, %v334_v49 }
 0x15d   :  { %v361_v51 = vadd.f32 %v353_v50, %v886_v29  ;;  %v376_v29 = vsub.f32 1.0, %v375_v63 }
 0x15f   :  { %368 = vadd.xlane.f32.xlu0 %v361_v51  ;;  %v377_v0 = vmul.f32 %v738_v62, %v376_v29 }
 0x160   :  { %v336_v52 = vpop.f32.mrf.mxu2 }
 0x161   :  { %v355_v53 = vpop.f32.mrf.mxu3  ;;  %v337_v54 = vadd.f32 %v732_v39, %v336_v52  ;;  %v378_v1 = vadd.f32 %v738_v62, %v377_v0 }
 0x163   :  { %v356_v55 = vadd.f32 %v355_v53, %v337_v54  ;;  %v984_v2 = vsel %vm379_vm0, %v738_v62, %v378_v1 }
 0x165   :  { %v362_v56 = vadd.f32 %v356_v55, %v917_v43 }
 0x167   :  { %370 = vadd.xlane.f32.xlu1 %v362_v56 }
 0x168   :  { %v338_v57 = vpop.f32.mrf.mxu2 }
 0x169   :  { %v339_v58 = vadd.f32 %v732_v39, %v338_v57  ;;  %v357_v59 = vpop.f32.mrf.mxu3 }
 0x16b   :  { %v358_v60 = vadd.f32 %v357_v59, %v339_v58 }
 0x16d   :  { %v363_v28 = vadd.f32 %v358_v60, %v922_v44 }
 0x16f   :  { %372 = vadd.xlane.f32.xlu1 %v363_v28 }
 0x1ca   :  { %v367_v3 = vpop.xlane.xlu0 %366 }
 0x1cb   :  { %v381_v43 = vmul.f32 %v984_v2, %v367_v3 }
 0x1cd   :  { %v385_v4 = vsub.f32 %v360_v46, %v381_v43 }
 0x1cf   :  { %v389_v5 = vmul.f32 %v385_v4, %v385_v4 }
 0x1d1   :  { %393 = vadd.xlane.f32.xlu2 %v389_v5 }
 0x1d2   :  { %v369_v6 = vpop.xlane.xlu0 %368 }
 0x1d3   :  { %v382_v44 = vmul.f32 %v984_v2, %v369_v6 }
 0x1d5   :  { %v386_v7 = vsub.f32 %v361_v51, %v382_v44 }
 0x1d7   :  { %v390_v8 = vmul.f32 %v386_v7, %v386_v7 }
 0x1d9   :  { %395 = vadd.xlane.f32.xlu2 %v390_v8 }
 0x1da   :  { %v371_v9 = vpop.xlane.xlu1 %370 }
 0x1db   :  { %v383_v10 = vmul.f32 %v984_v2, %v371_v9 }
 0x1dd   :  { %v989_v11 = vsub.f32 %v362_v56, %v383_v10 }
 0x1df   :  { %v391_v12 = vmul.f32 %v989_v11, %v989_v11 }
 0x1e1   :  { %397 = vadd.xlane.f32.xlu0 %v391_v12 }
 0x1e2   :  { %v373_v13 = vpop.xlane.xlu1 %372 }
 0x1e3   :  { %v384_v14 = vmul.f32 %v984_v2, %v373_v13 }
 0x1e5   :  { %v994_v15 = vsub.f32 %v363_v28, %v384_v14 }
 0x1e7   :  { %v392_v16 = vmul.f32 %v994_v15, %v994_v15 }
 0x1e9   :  { %399 = vadd.xlane.f32.xlu1 %v392_v16 }
 0x244   :  { %v394_v17 = vpop.xlane.xlu2 %393 }
 0x245   :  { %v401_v18 = vmul.f32 %v394_v17, %v984_v2 }
 0x247   :  { %v405_v19 = vadd.f32 1e-05, %v401_v18 }
 0x249   :  { %739 = vrsqrt.f32 %v405_v19  ;;  %vm415_vm2 = vweird.f32 %v405_v19 }
 0x24c   :  { %v396_v20 = vpop.xlane.xlu2 %395 }
 0x24d   :  { %v402_v21 = vmul.f32 %v396_v20, %v984_v2 }
 0x24f   :  { %v740_v22 = vpop.eup %739  ;;  %v406_v23 = vadd.f32 1e-05, %v402_v21 }
 0x250   :  { %v410_v24 = vmul.f32 %v740_v22, %v405_v19  ;;  %vm416_vm1 = vweird.f32 %v740_v22 }
 0x251   :  { %741 = vrsqrt.f32 %v406_v23  ;;  %vm417_vm3 = vmor %vm415_vm2, %vm416_vm1  ;;  %vm425_vm5 = vweird.f32 %v406_v23 }
 0x252   :  { %v411_v25 = vmul.f32 %v740_v22, %v410_v24 }
 0x254   :  { %v412_v26 = vmul.f32 0.5, %v411_v25  ;;  %v398_v27 = vpop.xlane.xlu0 %397 }
 0x255   :  { %v403_v30 = vmul.f32 %v398_v27, %v984_v2 }
 0x256   :  { %v413_v31 = vsub.f32 1.5, %v412_v26 }
 0x257   :  { %v742_v32 = vpop.eup %741  ;;  %v407_v33 = vadd.f32 1e-05, %v403_v30 }
 0x258   :  { %v414_v34 = vmul.f32 %v740_v22, %v413_v31  ;;  %v420_v35 = vmul.f32 %v742_v32, %v406_v23  ;;  %vm426_vm4 = vweird.f32 %v742_v32 }
 0x259   :  { %743 = vrsqrt.f32 %v407_v33  ;;  %vm427_vm6 = vmor %vm425_vm5, %vm426_vm4  ;;  %vm435_vm8 = vweird.f32 %v407_v33 }
 0x25a   :  { %v421_v37 = vmul.f32 %v742_v32, %v420_v35  ;;  %v418_v38 = vsel %vm417_vm3, %v740_v22, %v414_v34 }
 0x25b   :  { %v449_v39 = vmul.f32 %v418_v38, %v385_v4 }
 0x25c   :  { %v422_v41 = vmul.f32 0.5, %v421_v37  ;;  %v400_v42 = vpop.xlane.xlu1 %399 }
 0x25d   :  { %v404_v45 = vmul.f32 %v400_v42, %v984_v2  ;;  %v456_v46 = vmul.f32 %v733_v36, %v449_v39 }
 0x25e   :  { %v423_v47 = vsub.f32 1.5, %v422_v41 }
 0x25f   :  { %v744_v48 = vpop.eup %743  ;;  %v408_v49 = vadd.f32 1e-05, %v404_v45  ;;  %v463_v50 = vadd.f32 %v734_v40, %v456_v46  ;;  %v735_v45 = vld [vmem:[%s1053_s7] ss:$0 sm:$0xff] }
 0x260   :  { %v424_v51 = vmul.f32 %v742_v32, %v423_v47  ;;  %v430_v52 = vmul.f32 %v744_v48, %v407_v33  ;;  %vm436_vm7 = vweird.f32 %v744_v48 }
 0x261   :  { %745 = vrsqrt.f32 %v408_v49  ;;  %469 = vadd.xlane.f32.xlu2 %v463_v50  ;;  %vm437_vm9 = vmor %vm435_vm8, %vm436_vm7  ;;  %vm445_vm11 = vweird.f32 %v408_v49 }
 0x262   :  { %v431_v53 = vmul.f32 %v744_v48, %v430_v52  ;;  %v428_v54 = vsel %vm427_vm6, %v742_v32, %v424_v51 }
 0x263   :  { %v450_v55 = vmul.f32 %v428_v54, %v386_v7 }
 0x264   :  { %v432_v56 = vmul.f32 0.5, %v431_v53 }
 0x265   :  { %v457_v57 = vmul.f32 %v733_v36, %v450_v55 }
 0x266   :  { %v433_v58 = vsub.f32 1.5, %v432_v56 }
 0x267   :  { %v746_v59 = vpop.eup %745  ;;  %v464_v60 = vadd.f32 %v734_v40, %v457_v57 }
 0x268   :  { %v434_v28 = vmul.f32 %v744_v48, %v433_v58  ;;  %v440_v61 = vmul.f32 %v746_v59, %v408_v49  ;;  %vm446_vm10 = vweird.f32 %v746_v59 }
 0x269   :  { %471 = vadd.xlane.f32.xlu0 %v464_v60  ;;  %vm447_vm12 = vmor %vm445_vm11, %vm446_vm10 }
 0x26a   :  { %v441_v62 = vmul.f32 %v746_v59, %v440_v61  ;;  %v438_v63 = vsel %vm437_vm9, %v744_v48, %v434_v28  ;;  %v736_v48 = vld [vmem:[%s1054_s8] ss:$0 sm:$0xff] }
 0x26b   :  { %v451_v29 = vmul.f32 %v438_v63, %v989_v11 }
 0x26c   :  { %v442_v0 = vmul.f32 0.5, %v441_v62 }
 0x26d   :  { %v458_v1 = vmul.f32 %v733_v36, %v451_v29 }
 0x26e   :  { %v443_v3 = vsub.f32 1.5, %v442_v0 }
 0x26f   :  { %v465_v43 = vadd.f32 %v734_v40, %v458_v1 }
 0x270   :  { %v444_v4 = vmul.f32 %v746_v59, %v443_v3 }
 0x271   :  { %473 = vadd.xlane.f32.xlu1 %v465_v43 }
 0x272   :  { %v448_v5 = vsel %vm447_vm12, %v746_v59, %v444_v4 }
 0x273   :  { %v452_v6 = vmul.f32 %v448_v5, %v994_v15 }
 0x275   :  { %v459_v44 = vmul.f32 %v733_v36, %v452_v6 }
 0x277   :  { %v466_v7 = vadd.f32 %v734_v40, %v459_v44 }
 0x279   :  { %475 = vadd.xlane.f32.xlu2 %v466_v7 }
 0x2d4   :  { %v470_v8 = vpop.xlane.xlu2 %469 }
 0x2d5   :  { %v477_v9 = vmul.f32 %v470_v8, %v984_v2 }
 0x2d7   :  { %v481_v10 = vsub.f32 %v463_v50, %v477_v9 }
 0x2d9   :  { %v485_v11 = vmul.f32 %v481_v10, %v481_v10 }
 0x2db   :  { %489 = vadd.xlane.f32.xlu0 %v485_v11 }
 0x2dc   :  { %v472_v12 = vpop.xlane.xlu0 %471 }
 0x2dd   :  { %v478_v13 = vmul.f32 %v472_v12, %v984_v2 }
 0x2df   :  { %v482_v14 = vsub.f32 %v464_v60, %v478_v13 }
 0x2e1   :  { %v486_v16 = vmul.f32 %v482_v14, %v482_v14 }
 0x2e3   :  { %491 = vadd.xlane.f32.xlu1 %v486_v16 }
 0x2e4   :  { %v474_v17 = vpop.xlane.xlu1 %473 }
 0x2e5   :  { %v479_v18 = vmul.f32 %v474_v17, %v984_v2 }
 0x2e7   :  { %v1013_v19 = vsub.f32 %v465_v43, %v479_v18 }
 0x2e9   :  { %v487_v15 = vmul.f32 %v1013_v19, %v1013_v19 }
 0x2eb   :  { %493 = vadd.xlane.f32.xlu2 %v487_v15 }
 0x2ec   :  { %v476_v20 = vpop.xlane.xlu2 %475 }
 0x2ed   :  { %v480_v21 = vmul.f32 %v476_v20, %v984_v2 }
 0x2ef   :  { %v1018_v22 = vsub.f32 %v466_v7, %v480_v21 }
 0x2f1   :  { %v488_v23 = vmul.f32 %v1018_v22, %v1018_v22 }
 0x2f3   :  { %495 = vadd.xlane.f32.xlu0 %v488_v23 }
 0x34e   :  { %v490_v24 = vpop.xlane.xlu0 %489 }
 0x34f   :  { %v497_v25 = vmul.f32 %v490_v24, %v984_v2 }
 0x351   :  { %v501_v26 = vadd.f32 1e-05, %v497_v25 }
 0x353   :  { %747 = vrsqrt.f32 %v501_v26  ;;  %vm511_vm14 = vweird.f32 %v501_v26 }
 0x356   :  { %v492_v27 = vpop.xlane.xlu1 %491 }
 0x357   :  { %v498_v30 = vmul.f32 %v492_v27, %v984_v2 }
 0x359   :  { %v748_v31 = vpop.eup %747  ;;  %v502_v32 = vadd.f32 1e-05, %v498_v30 }
 0x35a   :  { %v506_v33 = vmul.f32 %v748_v31, %v501_v26  ;;  %vm512_vm13 = vweird.f32 %v748_v31 }
 0x35b   :  { %749 = vrsqrt.f32 %v502_v32  ;;  %vm513_vm15 = vmor %vm511_vm14, %vm512_vm13  ;;  %vm521_vm1 = vweird.f32 %v502_v32 }
 0x35c   :  { %v507_v34 = vmul.f32 %v748_v31, %v506_v33 }
 0x35e   :  { %v508_v35 = vmul.f32 0.5, %v507_v34  ;;  %v494_v36 = vpop.xlane.xlu2 %493 }
 0x35f   :  { %v499_v37 = vmul.f32 %v494_v36, %v984_v2 }
 0x360   :  { %v509_v38 = vsub.f32 1.5, %v508_v35 }
 0x361   :  { %v750_v39 = vpop.eup %749  ;;  %v503_v40 = vadd.f32 1e-05, %v499_v37 }
 0x362   :  { %v510_v41 = vmul.f32 %v748_v31, %v509_v38  ;;  %v516_v42 = vmul.f32 %v750_v39, %v502_v32  ;;  %vm522_vm0 = vweird.f32 %v750_v39 }
 0x363   :  { %751 = vrsqrt.f32 %v503_v40  ;;  %vm523_vm2 = vmor %vm521_vm1, %vm522_vm0  ;;  %vm531_vm4 = vweird.f32 %v503_v40 }
 0x364   :  { %v514_v46 = vsel %vm513_vm15, %v748_v31, %v510_v41  ;;  %v517_v47 = vmul.f32 %v750_v39, %v516_v42 }
 0x365   :  { %v545_v49 = vmul.f32 %v514_v46, %v481_v10 }
 0x366   :  { %v518_v50 = vmul.f32 0.5, %v517_v47  ;;  %v496_v51 = vpop.xlane.xlu0 %495 }
 0x367   :  { %v552_v52 = vmul.f32 %v735_v45, %v545_v49  ;;  %v500_v53 = vmul.f32 %v496_v51, %v984_v2 }
 0x368   :  { %v519_v54 = vsub.f32 1.5, %v518_v50 }
 0x369   :  { %v752_v55 = vpop.eup %751  ;;  %v559_v56 = vadd.f32 %v736_v48, %v552_v52  ;;  %v504_v57 = vadd.f32 1e-05, %v500_v53 }
 0x36a   :  { %v520_v58 = vmul.f32 %v750_v39, %v519_v54  ;;  %v526_v59 = vmul.f32 %v752_v55, %v503_v40  ;;  %vm532_vm3 = vweird.f32 %v752_v55 }
 0x36b   :  { %563 = vst [vmem:[%s1055_s9] sm:$0xff] %v559_v56  ;;  %753 = vrsqrt.f32 %v504_v57  ;;  %vm533_vm5 = vmor %vm531_vm4, %vm532_vm3  ;;  %vm541_vm7 = vweird.f32 %v504_v57 }
 0x36c   :  { %v524_v60 = vsel %vm523_vm2, %v750_v39, %v520_v58  ;;  %v527_v28 = vmul.f32 %v752_v55, %v526_v59 }
 0x36d   :  { %v546_v61 = vmul.f32 %v524_v60, %v482_v14 }
 0x36e   :  { %v528_v62 = vmul.f32 0.5, %v527_v28 }
 0x36f   :  { %v553_v63 = vmul.f32 %v735_v45, %v546_v61 }
 0x370   :  { %v529_v2 = vsub.f32 1.5, %v528_v62 }
 0x371   :  { %v754_v29 = vpop.eup %753  ;;  %v560_v0 = vadd.f32 %v736_v48, %v553_v63 }
 0x372   :  { %v530_v1 = vmul.f32 %v752_v55, %v529_v2  ;;  %v536_v3 = vmul.f32 %v754_v29, %v504_v57  ;;  %vm542_vm6 = vweird.f32 %v754_v29 }
 0x373   :  { %564 = vst [vmem:[%s1055_s9 + $0x8] sm:$0xff] %v560_v0  ;;  %vm543_vm8 = vmor %vm541_vm7, %vm542_vm6 }
 0x374   :  { %v534_v43 = vsel %vm533_vm5, %v752_v55, %v530_v1  ;;  %v537_v4 = vmul.f32 %v754_v29, %v536_v3 }
 0x375   :  { %v547_v5 = vmul.f32 %v534_v43, %v1013_v19 }
 0x376   :  { %v538_v6 = vmul.f32 0.5, %v537_v4 }
 0x377   :  { %v554_v44 = vmul.f32 %v735_v45, %v547_v5 }
 0x378   :  { %v539_v7 = vsub.f32 1.5, %v538_v6 }
 0x379   :  { %v561_v8 = vadd.f32 %v736_v48, %v554_v44 }
 0x37a   :  { %v540_v9 = vmul.f32 %v754_v29, %v539_v7 }
 0x37b   :  { %565 = vst [vmem:[%s1055_s9 + $0x10] sm:$0xff] %v561_v8 }
 0x37c   :  { %v544_v10 = vsel %vm543_vm8, %v754_v29, %v540_v9 }
 0x37d   :  { %v548_v11 = vmul.f32 %v544_v10, %v1018_v22 }
 0x37f   :  { %v555_v12 = vmul.f32 %v735_v45, %v548_v11 }
 0x381   :  { %v562_v13 = vadd.f32 %v736_v48, %v555_v12 }
 0x383   :  { %566 = vst [vmem:[%s1055_s9 + $0x18] sm:$0xff] %v562_v13 }

// kernel: transformer_encoder_forward.5
= control target key start
LH: loop header
LB: loop body
LE: loop exit
PB: predicated region body
PF: predicated region fallthrough
CT: control target
= control target key end

     0   :  { %s890_s1 = inlined_call_operand.vmem [shape: bf16[256,128], index: 1, kind: input, shape index: {}]   ;;  %s891_s3 = inlined_call_operand.vmem [shape: bf16[128,256], index: 3, kind: input, shape index: {}]   ;;  %s892_s0 = inlined_call_operand.vmem [shape: f32[32,128], index: 0, kind: input, shape index: {}]   ;;  %s893_s4 = inlined_call_operand.vmem [shape: f32[1,128], index: 4, kind: input, shape index: {}]   ;;  %s894_s2 = inlined_call_operand.vmem [shape: f32[1,256], index: 2, kind: input, shape index: {}]   ;;  %s895_s5 = inlined_call_operand.vmem [shape: f32[1,128], index: 5, kind: input, shape index: {}]   ;;  %s896_s6 = inlined_call_operand.vmem [shape: f32[1,128], index: 6, kind: input, shape index: {}]   ;;  %s897_s7 = inlined_call_operand.vmem [shape: f32[32,128], index: 7, kind: output, shape index: {}]  }
   0x1   :  { %v604_v0 = vld [vmem:[%s890_s1 + $0x38] sm:$0xff]  ;;  %v603_v2 = vld [vmem:[%s890_s1 + $0x30] sm:$0xff]  ;;  %v602_v4 = vld [vmem:[%s890_s1 + $0x28] sm:$0xff] }
   0x2   :  { %v612_v1 = vld [vmem:[%s890_s1 + $0x78] sm:$0xff]  ;;  %166 = vmatpush.bf16.xpose.msra.mxu0 %v604_v0  ;;  %v611_v3 = vld [vmem:[%s890_s1 + $0x70] sm:$0xff]  ;;  %v610_v5 = vld [vmem:[%s890_s1 + $0x68] sm:$0xff] }
   0x3   :  { %185 = vmatpush.bf16.xpose.msra.mxu1 %v612_v1  ;;  %v601_v6 = vld [vmem:[%s890_s1 + $0x20] sm:$0xff]  ;;  %v600_v8 = vld [vmem:[%s890_s1 + $0x18] sm:$0xff]  ;;  %v599_v10 = vld [vmem:[%s890_s1 + $0x10] sm:$0xff] }
   0x4   :  { %v609_v7 = vld [vmem:[%s890_s1 + $0x60] sm:$0xff]  ;;  %v608_v9 = vld [vmem:[%s890_s1 + $0x58] sm:$0xff]  ;;  %v607_v11 = vld [vmem:[%s890_s1 + $0x50] sm:$0xff] }
   0x5   :  { %v598_v12 = vld [vmem:[%s890_s1 + $0x8] sm:$0xff]  ;;  %v591_v14 = vld [vmem:[%s891_s3 + $0x70] sm:$0xf]  ;;  %v628_v15 = vld [vmem:[%s891_s3 + $0x74] sm:$0xf0] }
   0x6   :  { %v606_v13 = vld [vmem:[%s890_s1 + $0x48] sm:$0xff]  ;;  %v627_v16 = vld [vmem:[%s891_s3 + $0x74] sm:$0xf]  ;;  %v592_v17 = vor.u32 %v628_v15, %v591_v14  ;;  %v593_v18 = vld [vmem:[%s891_s3 + $0x78] sm:$0xf0] }
   0x7   :  { %v596_v19 = vor.u32 %v627_v16, %v593_v18  ;;  %v597_v20 = vld [vmem:[%s890_s1] sm:$0xff]  ;;  %v626_v22 = vld [vmem:[%s891_s3 + $0x64] sm:$0xf0]  ;;  %v585_v25 = vld [vmem:[%s891_s3 + $0x68] sm:$0xf0] }
   0x8   :  { %316 = vmatpush.bf16.xpose.msra.mxu2 %v592_v17  ;;  %v583_v21 = vld [vmem:[%s891_s3 + $0x60] sm:$0xf]  ;;  %v625_v24 = vld [vmem:[%s891_s3 + $0x64] sm:$0xf]  ;;  %v764_v29 = vld [vmem:[%s892_s0 + $0x8] sm:$0xff] }
   0x9   :  { %335 = vmatpush.bf16.xpose.msra.mxu3 %v596_v19  ;;  %v605_v23 = vld [vmem:[%s890_s1 + $0x40] sm:$0xff]  ;;  %v584_v26 = vor.u32 %v626_v22, %v583_v21  ;;  %v588_v27 = vor.u32 %v625_v24, %v585_v25  ;;  %v575_v31 = vld [vmem:[%s891_s3 + $0x50] sm:$0xf]  ;;  %v624_v32 = vld [vmem:[%s891_s3 + $0x54] sm:$0xf0] }
   0xa   :  { %167 = vmatpush.bf16.xpose.msra.mxu0 %v603_v2  ;;  %v759_v28 = vld [vmem:[%s892_s0] sm:$0xff]  ;;  %v623_v33 = vld [vmem:[%s891_s3 + $0x54] sm:$0xf]  ;;  %v577_v34 = vld [vmem:[%s891_s3 + $0x58] sm:$0xf0]  ;;  %v576_v35 = vor.u32 %v624_v32, %v575_v31 }
   0xb   :  { %186 = vmatpush.bf16.xpose.msra.mxu1 %v611_v3  ;;  %v62_v30 = vpack.c.bf16 %v764_v29, %v759_v28  ;;  %v580_v36 = vor.u32 %v623_v33, %v577_v34  ;;  %v567_v37 = vld [vmem:[%s891_s3 + $0x40] sm:$0xf]  ;;  %v622_v38 = vld [vmem:[%s891_s3 + $0x44] sm:$0xf0]  ;;  %v621_v39 = vld [vmem:[%s891_s3 + $0x44] sm:$0xf] }
   0xc   :  { %v569_v40 = vld [vmem:[%s891_s3 + $0x48] sm:$0xf0]  ;;  %v568_v41 = vor.u32 %v622_v38, %v567_v37  ;;  %v795_v43 = vld [vmem:[%s892_s0 + $0x10] sm:$0xff]  ;;  %v800_v44 = vld [vmem:[%s892_s0 + $0x18] sm:$0xff] }
   0xd   :  { %v572_v42 = vor.u32 %v621_v39, %v569_v40  ;;  %v63_v45 = vpack.c.bf16 %v800_v44, %v795_v43  ;;  %v559_v46 = vld [vmem:[%s891_s3 + $0x30] sm:$0xf]  ;;  %v620_v47 = vld [vmem:[%s891_s3 + $0x34] sm:$0xf0]  ;;  %v619_v48 = vld [vmem:[%s891_s3 + $0x34] sm:$0xf] }
   0xe   :  { %v561_v49 = vld [vmem:[%s891_s3 + $0x38] sm:$0xf0]  ;;  %v560_v50 = vor.u32 %v620_v47, %v559_v46  ;;  %v551_v52 = vld [vmem:[%s891_s3 + $0x20] sm:$0xf]  ;;  %v618_v53 = vld [vmem:[%s891_s3 + $0x24] sm:$0xf0] }
   0xf   :  { %v564_v51 = vor.u32 %v619_v48, %v561_v49  ;;  %v617_v54 = vld [vmem:[%s891_s3 + $0x24] sm:$0xf]  ;;  %v553_v55 = vld [vmem:[%s891_s3 + $0x28] sm:$0xf0]  ;;  %v552_v56 = vor.u32 %v618_v53, %v551_v52  ;;  %v543_v58 = vld [vmem:[%s891_s3 + $0x10] sm:$0xf] }
  0x10   :  { %317 = vmatpush.bf16.xpose.msra.mxu2 %v584_v26  ;;  %v556_v57 = vor.u32 %v617_v54, %v553_v55  ;;  %v616_v59 = vld [vmem:[%s891_s3 + $0x14] sm:$0xf0]  ;;  %v615_v60 = vld [vmem:[%s891_s3 + $0x14] sm:$0xf]  ;;  %v545_v62 = vld [vmem:[%s891_s3 + $0x18] sm:$0xf0] }
  0x11   :  { %336 = vmatpush.bf16.xpose.msra.mxu3 %v588_v27  ;;  %v544_v61 = vor.u32 %v616_v59, %v543_v58  ;;  %v548_v63 = vor.u32 %v615_v60, %v545_v62  ;;  %v535_v0 = vld [vmem:[%s891_s3] sm:$0xf]  ;;  %v614_v1 = vld [vmem:[%s891_s3 + $0x4] sm:$0xf0]  ;;  %v613_v2 = vld [vmem:[%s891_s3 + $0x4] sm:$0xf] }
  0x12   :  { %168 = vmatpush.bf16.xpose.msra.mxu0 %v602_v4  ;;  %v536_v3 = vor.u32 %v614_v1, %v535_v0  ;;  %v537_v4 = vld [vmem:[%s891_s3 + $0x8] sm:$0xf0]  ;;  %v630_v39 = vld [vmem:[%s893_s4] ss:$0 sm:$0xff] }
  0x13   :  { %187 = vmatpush.bf16.xpose.msra.mxu1 %v610_v5  ;;  %v540_v5 = vor.u32 %v613_v2, %v537_v4 }
  0x18   :  { %318 = vmatpush.bf16.xpose.msra.mxu2 %v576_v35 }
  0x19   :  { %337 = vmatpush.bf16.xpose.msra.mxu3 %v580_v36 }
  0x1a   :  { %169 = vmatpush.bf16.xpose.msra.mxu0 %v601_v6  ;;  %v64_v6 = vld [vmem:[%s894_s2] sm:$0x3] }
  0x1b   :  { %188 = vmatpush.bf16.xpose.msra.mxu1 %v609_v7 }
  0x20   :  { %319 = vmatpush.bf16.xpose.msra.mxu2 %v568_v41 }
  0x21   :  { %338 = vmatpush.bf16.xpose.msra.mxu3 %v572_v42 }
  0x22   :  { %170 = vmatpush.bf16.xpose.msra.mxu0 %v600_v8 }
  0x23   :  { %189 = vmatpush.bf16.xpose.msra.mxu1 %v608_v9  ;;  %v66_v9 = vperm.slane %v64_v6, 0 }
  0x28   :  { %320 = vmatpush.bf16.xpose.msra.mxu2 %v560_v50 }
  0x29   :  { %339 = vmatpush.bf16.xpose.msra.mxu3 %v564_v51 }
  0x2a   :  { %171 = vmatpush.bf16.xpose.msra.mxu0 %v599_v10  ;;  %v67_v10 = vperm.slane %v64_v6, 1 }
  0x2b   :  { %190 = vmatpush.bf16.xpose.msra.mxu1 %v607_v11 }
  0x30   :  { %321 = vmatpush.bf16.xpose.msra.mxu2 %v552_v56 }
  0x31   :  { %340 = vmatpush.bf16.xpose.msra.mxu3 %v556_v57 }
  0x32   :  { %172 = vmatpush.bf16.xpose.msra.mxu0 %v598_v12 }
  0x33   :  { %191 = vmatpush.bf16.xpose.msra.mxu1 %v606_v13 }
  0x38   :  { %322 = vmatpush.bf16.xpose.msra.mxu2 %v544_v61  ;;  %v643_v61 = vmov 128.0  }
  0x39   :  { %341 = vmatpush.bf16.xpose.msra.mxu3 %v548_v63  ;;  %633 = vrcp.f32 %v643_v61 }
  0x3a   :  { %173 = vmatpush.bf16.xpose.msra.mxu0 %v597_v20 }
  0x3b   :  { %192 = vmatpush.bf16.xpose.msra.mxu1 %v605_v23 }
  0x3f   :  { %v634_v62 = vpop.eup %633 }
  0x40   :  { %323 = vmatpush.bf16.xpose.msra.mxu2 %v536_v3  ;;  %v369_v63 = vmul.f32 128.0, %v634_v62  ;;  %vm373_vm0 = vweird.f32 %v634_v62 }
  0x41   :  { %174 = vmatmul.bf16.vlgmr.msra.gmra.mxu0 %v62_v30  ;;  %342 = vmatpush.bf16.xpose.msra.mxu3 %v540_v5 }
  0x42   :  { %193 = vmatmul.bf16.vlgmr.msra.gmra.mxu1 %v62_v30 }
  0x51   :  { %179 = vmatmul.bf16.gmra.mxu0 %v63_v45 }
  0x52   :  { %198 = vmatmul.bf16.gmra.mxu1 %v63_v45 }
  0xbe   :  { %v175_v7 = vpop.f32.mrf.mxu0 }
  0xbf   :  { %v194_v8 = vpop.f32.mrf.mxu1  ;;  %v176_v11 = vadd.f32 %v175_v7, %v66_v9 }
  0xc0   :  { %v195_v12 = vadd.f32 %v194_v8, %v67_v10 }
  0xc1   :  { %v204_v17 = vmax.f32 %v176_v11, 0.0 }
  0xc2   :  { %v205_v18 = vmax.f32 %v195_v12, 0.0 }
  0xc6   :  { %v177_v13 = vpop.f32.mrf.mxu0 }
  0xc7   :  { %v196_v14 = vpop.f32.mrf.mxu1  ;;  %v178_v15 = vadd.f32 %v177_v13, %v66_v9 }
  0xc8   :  { %v197_v16 = vadd.f32 %v196_v14, %v67_v10 }
  0xc9   :  { %v206_v19 = vmax.f32 %v178_v15, 0.0 }
  0xca   :  { %v207_v20 = vmax.f32 %v197_v16, 0.0 }
  0xcb   :  { %v228_v21 = vpack.c.bf16 %v206_v19, %v204_v17 }
  0xcc   :  { %v229_v22 = vpack.c.bf16 %v207_v20, %v205_v18 }
  0xcd   :  { %324 = vmatmul.bf16.vlgmr.msra.gmra.mxu2 %v228_v21 }
  0xce   :  { %343 = vmatmul.bf16.vlgmr.msra.gmra.mxu3 %v229_v22  ;;  %v180_v23 = vpop.f32.mrf.mxu0 }
  0xcf   :  { %v199_v24 = vpop.f32.mrf.mxu1  ;;  %v181_v25 = vadd.f32 %v180_v23, %v66_v9 }
  0xd0   :  { %v200_v26 = vadd.f32 %v199_v24, %v67_v10 }
  0xd1   :  { %v208_v33 = vmax.f32 %v181_v25, 0.0 }
  0xd2   :  { %v209_v34 = vmax.f32 %v200_v26, 0.0 }
  0xd6   :  { %v182_v27 = vpop.f32.mrf.mxu0 }
  0xd7   :  { %v201_v30 = vpop.f32.mrf.mxu1  ;;  %v183_v31 = vadd.f32 %v182_v27, %v66_v9 }
  0xd8   :  { %v202_v32 = vadd.f32 %v201_v30, %v67_v10 }
  0xd9   :  { %v210_v35 = vmax.f32 %v183_v31, 0.0 }
  0xda   :  { %v211_v36 = vmax.f32 %v202_v32, 0.0 }
  0xdb   :  { %v230_v37 = vpack.c.bf16 %v210_v35, %v208_v33 }
  0xdc   :  { %v231_v38 = vpack.c.bf16 %v211_v36, %v209_v34  ;;  %v631_v36 = vld [vmem:[%s895_s5] ss:$0 sm:$0xff] }
  0xdd   :  { %329 = vmatmul.bf16.gmra.mxu2 %v230_v37 }
  0xde   :  { %348 = vmatmul.bf16.gmra.mxu3 %v231_v38 }
 0x150   :  { %v325_v40 = vpop.f32.mrf.mxu2 }
 0x151   :  { %v344_v41 = vpop.f32.mrf.mxu3  ;;  %v326_v42 = vadd.f32 %v630_v39, %v325_v40 }
 0x153   :  { %v345_v45 = vadd.f32 %v344_v41, %v326_v42 }
 0x155   :  { %v354_v46 = vadd.f32 %v345_v45, %v759_v28 }
 0x157   :  { %360 = vadd.xlane.f32.xlu0 %v354_v46 }
 0x158   :  { %v327_v47 = vpop.f32.mrf.mxu2 }
 0x159   :  { %v346_v48 = vpop.f32.mrf.mxu3  ;;  %v328_v49 = vadd.f32 %v630_v39, %v327_v47 }
 0x15b   :  { %v347_v50 = vadd.f32 %v346_v48, %v328_v49 }
 0x15d   :  { %v355_v51 = vadd.f32 %v347_v50, %v764_v29  ;;  %v370_v29 = vsub.f32 1.0, %v369_v63 }
 0x15f   :  { %362 = vadd.xlane.f32.xlu0 %v355_v51  ;;  %v371_v0 = vmul.f32 %v634_v62, %v370_v29 }
 0x160   :  { %v330_v52 = vpop.f32.mrf.mxu2 }
 0x161   :  { %v349_v53 = vpop.f32.mrf.mxu3  ;;  %v331_v54 = vadd.f32 %v630_v39, %v330_v52  ;;  %v372_v1 = vadd.f32 %v634_v62, %v371_v0 }
 0x163   :  { %v350_v55 = vadd.f32 %v349_v53, %v331_v54  ;;  %v374_v2 = vsel %vm373_vm0, %v634_v62, %v372_v1 }
 0x165   :  { %v356_v56 = vadd.f32 %v350_v55, %v795_v43 }
 0x167   :  { %364 = vadd.xlane.f32.xlu1 %v356_v56 }
 0x168   :  { %v332_v57 = vpop.f32.mrf.mxu2 }
 0x169   :  { %v333_v58 = vadd.f32 %v630_v39, %v332_v57  ;;  %v351_v59 = vpop.f32.mrf.mxu3  ;;  %v632_v39 = vld [vmem:[%s896_s6] ss:$0 sm:$0xff] }
 0x16b   :  { %v352_v60 = vadd.f32 %v351_v59, %v333_v58 }
 0x16d   :  { %v357_v28 = vadd.f32 %v352_v60, %v800_v44 }
 0x16f   :  { %366 = vadd.xlane.f32.xlu1 %v357_v28 }
 0x1ca   :  { %v361_v3 = vpop.xlane.xlu0 %360 }
 0x1cb   :  { %v375_v4 = vmul.f32 %v374_v2, %v361_v3 }
 0x1cd   :  { %v379_v43 = vsub.f32 %v354_v46, %v375_v4 }
 0x1cf   :  { %v383_v5 = vmul.f32 %v379_v43, %v379_v43 }
 0x1d1   :  { %387 = vadd.xlane.f32.xlu2 %v383_v5 }
 0x1d2   :  { %v363_v6 = vpop.xlane.xlu0 %362 }
 0x1d3   :  { %v376_v7 = vmul.f32 %v374_v2, %v363_v6 }
 0x1d5   :  { %v380_v8 = vsub.f32 %v355_v51, %v376_v7 }
 0x1d7   :  { %v384_v9 = vmul.f32 %v380_v8, %v380_v8 }
 0x1d9   :  { %389 = vadd.xlane.f32.xlu2 %v384_v9 }
 0x1da   :  { %v365_v44 = vpop.xlane.xlu1 %364 }
 0x1db   :  { %v377_v10 = vmul.f32 %v374_v2, %v365_v44 }
 0x1dd   :  { %v862_v11 = vsub.f32 %v356_v56, %v377_v10 }
 0x1df   :  { %v385_v12 = vmul.f32 %v862_v11, %v862_v11 }
 0x1e1   :  { %391 = vadd.xlane.f32.xlu0 %v385_v12 }
 0x1e2   :  { %v367_v13 = vpop.xlane.xlu1 %366 }
 0x1e3   :  { %v378_v14 = vmul.f32 %v374_v2, %v367_v13 }
 0x1e5   :  { %v866_v15 = vsub.f32 %v357_v28, %v378_v14 }
 0x1e7   :  { %v386_v16 = vmul.f32 %v866_v15, %v866_v15 }
 0x1e9   :  { %393 = vadd.xlane.f32.xlu1 %v386_v16 }
 0x244   :  { %v388_v17 = vpop.xlane.xlu2 %387 }
 0x245   :  { %v395_v18 = vmul.f32 %v388_v17, %v374_v2 }
 0x247   :  { %v399_v19 = vadd.f32 1e-05, %v395_v18 }
 0x249   :  { %635 = vrsqrt.f32 %v399_v19  ;;  %vm409_vm2 = vweird.f32 %v399_v19 }
 0x24c   :  { %v390_v20 = vpop.xlane.xlu2 %389 }
 0x24d   :  { %v396_v21 = vmul.f32 %v390_v20, %v374_v2 }
 0x24f   :  { %v636_v22 = vpop.eup %635  ;;  %v400_v23 = vadd.f32 1e-05, %v396_v21 }
 0x250   :  { %v404_v24 = vmul.f32 %v636_v22, %v399_v19  ;;  %vm410_vm1 = vweird.f32 %v636_v22 }
 0x251   :  { %637 = vrsqrt.f32 %v400_v23  ;;  %vm411_vm3 = vmor %vm409_vm2, %vm410_vm1  ;;  %vm419_vm5 = vweird.f32 %v400_v23 }
 0x252   :  { %v405_v25 = vmul.f32 %v636_v22, %v404_v24 }
 0x254   :  { %v406_v26 = vmul.f32 0.5, %v405_v25  ;;  %v392_v27 = vpop.xlane.xlu0 %391 }
 0x255   :  { %v397_v30 = vmul.f32 %v392_v27, %v374_v2 }
 0x256   :  { %v407_v31 = vsub.f32 1.5, %v406_v26 }
 0x257   :  { %v638_v32 = vpop.eup %637  ;;  %v401_v33 = vadd.f32 1e-05, %v397_v30 }
 0x258   :  { %v408_v34 = vmul.f32 %v636_v22, %v407_v31  ;;  %v414_v35 = vmul.f32 %v638_v32, %v400_v23  ;;  %vm420_vm4 = vweird.f32 %v638_v32 }
 0x259   :  { %639 = vrsqrt.f32 %v401_v33  ;;  %vm421_vm6 = vmor %vm419_vm5, %vm420_vm4  ;;  %vm429_vm8 = vweird.f32 %v401_v33 }
 0x25a   :  { %v412_v37 = vsel %vm411_vm3, %v636_v22, %v408_v34  ;;  %v415_v38 = vmul.f32 %v638_v32, %v414_v35 }
 0x25b   :  { %v443_v40 = vmul.f32 %v412_v37, %v379_v43 }
 0x25c   :  { %v416_v41 = vmul.f32 0.5, %v415_v38  ;;  %v394_v42 = vpop.xlane.xlu1 %393 }
 0x25d   :  { %v450_v45 = vmul.f32 %v631_v36, %v443_v40  ;;  %v398_v46 = vmul.f32 %v394_v42, %v374_v2 }
 0x25e   :  { %v417_v47 = vsub.f32 1.5, %v416_v41 }
 0x25f   :  { %v640_v48 = vpop.eup %639  ;;  %v457_v49 = vadd.f32 %v632_v39, %v450_v45  ;;  %v402_v50 = vadd.f32 1e-05, %v398_v46 }
 0x260   :  { %v418_v51 = vmul.f32 %v638_v32, %v417_v47  ;;  %v424_v52 = vmul.f32 %v640_v48, %v401_v33  ;;  %vm430_vm7 = vweird.f32 %v640_v48 }
 0x261   :  { %461 = vst [vmem:[%s897_s7] sm:$0xff] %v457_v49  ;;  %641 = vrsqrt.f32 %v402_v50  ;;  %vm431_vm9 = vmor %vm429_vm8, %vm430_vm7  ;;  %vm439_vm11 = vweird.f32 %v402_v50 }
 0x262   :  { %v422_v53 = vsel %vm421_vm6, %v638_v32, %v418_v51  ;;  %v425_v54 = vmul.f32 %v640_v48, %v424_v52 }
 0x263   :  { %v444_v55 = vmul.f32 %v422_v53, %v380_v8 }
 0x264   :  { %v426_v56 = vmul.f32 0.5, %v425_v54 }
 0x265   :  { %v451_v57 = vmul.f32 %v631_v36, %v444_v55 }
 0x266   :  { %v427_v58 = vsub.f32 1.5, %v426_v56 }
 0x267   :  { %v642_v59 = vpop.eup %641  ;;  %v458_v60 = vadd.f32 %v632_v39, %v451_v57 }
 0x268   :  { %v428_v28 = vmul.f32 %v640_v48, %v427_v58  ;;  %v434_v61 = vmul.f32 %v642_v59, %v402_v50  ;;  %vm440_vm10 = vweird.f32 %v642_v59 }
 0x269   :  { %462 = vst [vmem:[%s897_s7 + $0x8] sm:$0xff] %v458_v60  ;;  %vm441_vm12 = vmor %vm439_vm11, %vm440_vm10 }
 0x26a   :  { %v432_v62 = vsel %vm431_vm9, %v640_v48, %v428_v28  ;;  %v435_v63 = vmul.f32 %v642_v59, %v434_v61 }
 0x26b   :  { %v445_v29 = vmul.f32 %v432_v62, %v862_v11 }
 0x26c   :  { %v436_v0 = vmul.f32 0.5, %v435_v63 }
 0x26d   :  { %v452_v1 = vmul.f32 %v631_v36, %v445_v29 }
 0x26e   :  { %v437_v2 = vsub.f32 1.5, %v436_v0 }
 0x26f   :  { %v459_v3 = vadd.f32 %v632_v39, %v452_v1 }
 0x270   :  { %v438_v4 = vmul.f32 %v642_v59, %v437_v2 }
 0x271   :  { %463 = vst [vmem:[%s897_s7 + $0x10] sm:$0xff] %v459_v3 }
 0x272   :  { %v442_v43 = vsel %vm441_vm12, %v642_v59, %v438_v4 }
 0x273   :  { %v446_v5 = vmul.f32 %v442_v43, %v866_v15 }
 0x275   :  { %v453_v6 = vmul.f32 %v631_v36, %v446_v5 }
 0x277   :  { %v460_v7 = vadd.f32 %v632_v39, %v453_v6 }
 0x279   :  { %464 = vst [vmem:[%s897_s7 + $0x18] sm:$0xff] %v460_v7 }

// kernel: transformer_encoder_forward.4
= control target key start
LH: loop header
LB: loop body
LE: loop exit
PB: predicated region body
PF: predicated region fallthrough
CT: control target
= control target key end

     0   :  { %s1961_s30 = smov 0   ;;  %s1963_s10 = smov 0   ;;  %s2385_s0 = inlined_call_operand.vmem [shape: f32[2,16,128], index: 0, kind: input, shape index: {}]   ;;  %s2386_s1 = inlined_call_operand.vmem [shape: f32[2,16,128], index: 1, kind: input, shape index: {}]   ;;  %s2387_s2 = inlined_call_operand.vmem [shape: f32[2,1,16], index: 2, kind: input, shape index: {}]   ;;  %s2388_s3 = inlined_call_operand.vmem [shape: bf16[384,128], index: 3, kind: input, shape index: {}]   ;;  %s2389_s4 = inlined_call_operand.vmem [shape: f32[1,384], index: 4, kind: input, shape index: {}]   ;;  %s2390_s5 = inlined_call_operand.vmem [shape: bf16[128,128], index: 5, kind: input, shape index: {}]   ;;  %s2391_s6 = inlined_call_operand.vmem [shape: f32[1,128], index: 6, kind: input, shape index: {}]   ;;  %s2392_s7 = inlined_call_operand.vmem [shape: f32[1,128], index: 7, kind: input, shape index: {}]   ;;  %s2393_s8 = inlined_call_operand.vmem [shape: f32[1,128], index: 8, kind: input, shape index: {}]   ;;  %s2394_s9 = inlined_call_operand.vmem [shape: f32[2,16,128], index: 9, kind: output, shape index: {}]  }
   0x1   :  { %s1965_s11 = smov 0  }
   0x2 LB: > { %s31_s12 = sadd.s32 1, %s1897_s10  ;;  %p1562_p0 = scmp.ge.s32.totalorder %s1901_s11, 1  ;;  %s1901_s11 = sphi %s1965_s11, %s19_s11   ;;  %s1897_s10 = sphi %s1963_s10, %s2396_s10   ;;  %s1893_s30 = sphi %s1961_s30, %s2395_s30  }
   0x3   : > { %p33_p1 = scmp.ge.s32.totalorder %s31_s12, 2  ;;  %p319_p2 = scmp.lt.s32.totalorder %s1901_s11, 3 }
   0x5   : > { %s2398_s12 = smov (%p33_p1, %s31_s12), 0  ;;  %p320_p3 = pnand %p1562_p0, %p319_p2 }
   0x6   : > { %p367_p4 = scmp.lt.s32.totalorder (!%p320_p3), %s1893_s30, 1  ;;  %s1903_s13 = smov (!%p320_p3), 80  }
   0x7   : > { %323 = sbr.rel (%p320_p3) target bundleno = 1950 (0x79e), region = 56  ;;  %s1904_s14 = smov (!%p320_p3), 112  }
   0x8   : > { %s1906_s16 = smov (!%p320_p3), 64   ;;  %s1907_s17 = smov (!%p320_p3), 48  }
   0x9   : > { %s1908_s18 = smov (!%p320_p3), 32  }
   0xc   : > { %v1733_v0 = vld [vmem:[%s2388_s3 + $0x78] sm:$0xff]  ;;  %s2400_s30 = smov (!%p367_p4, %s1893_s30), 1  ;;  %v1732_v3 = vld [vmem:[%s2388_s3 + $0x70] sm:$0xff]  ;;  %v1731_v6 = vld [vmem:[%s2388_s3 + $0x68] sm:$0xff]  ;;  %vm689_vm0 = vcmask 130048   ;;  %vm833_vm1 = vcmask 261248  }
   0xd   : > { %v1749_v1 = vld [vmem:[%s2388_s3 + $0x38] sm:$0xff]  ;;  %470 = vmatpush.bf16.xpose.msra.mxu0 %v1733_v0  ;;  %v1748_v4 = vld [vmem:[%s2388_s3 + $0x30] sm:$0xff]  ;;  %s379_s25 = scalar_lea.vmem %s2387_s2, %s2400_s30  ;;  %v1747_v7 = vld [vmem:[%s2388_s3 + $0x28] sm:$0xff]  ;;  %s2046_s23 = sshll.u32 %s2400_s30, 4  ;;  %vm911_vm2 = vcmask 392448   ;;  %vm989_vm3 = vcmask 523648  }
   0xe   : > { %v1741_v2 = vld [vmem:[%s2388_s3 + $0xb8] sm:$0xff]  ;;  %653 = vmatpush.bf16.xpose.msra.mxu2 %v1749_v1  ;;  %v1740_v5 = vld [vmem:[%s2388_s3 + $0xb0] sm:$0xff]  ;;  %v1739_v8 = vld [vmem:[%s2388_s3 + $0xa8] sm:$0xff]  ;;  %s371_s29 = scalar_lea.vmem %s2385_s0, %s2046_s23  ;;  %s376_s15 = scalar_lea.vmem %s2386_s1, %s2046_s23  ;;  %vm1067_vm4 = vcmask 654848   ;;  %vm1145_vm5 = vcmask 786048   ;;  %vm1223_vm6 = vcmask 917248  }
   0xf   : > { %553 = vmatpush.bf16.xpose.msra.mxu1 %v1741_v2  ;;  %v1730_v9 = vld [vmem:[%s2388_s3 + $0x60] sm:$0xff]  ;;  %v1729_v12 = vld [vmem:[%s2388_s3 + $0x58] sm:$0xff]  ;;  %v1728_v15 = vld [vmem:[%s2388_s3 + $0x50] sm:$0xff]  ;;  %s1909_s30 = smov 16   ;;  %vm1301_vm7 = vcmask 1048448  }
  0x10   : > { %v1746_v10 = vld [vmem:[%s2388_s3 + $0x20] sm:$0xff]  ;;  %v1745_v13 = vld [vmem:[%s2388_s3 + $0x18] sm:$0xff]  ;;  %v1744_v16 = vld [vmem:[%s2388_s3 + $0x10] sm:$0xff] }
  0x11   : > { %v1738_v11 = vld [vmem:[%s2388_s3 + $0xa0] sm:$0xff]  ;;  %v1737_v14 = vld [vmem:[%s2388_s3 + $0x98] sm:$0xff]  ;;  %v1736_v17 = vld [vmem:[%s2388_s3 + $0x90] sm:$0xff] }
  0x12   : > { %v1727_v18 = vld [vmem:[%s2388_s3 + $0x48] sm:$0xff]  ;;  %v1726_v21 = vld [vmem:[%s2388_s3 + $0x40] sm:$0xff] }
  0x13   : > { %v1743_v19 = vld [vmem:[%s2388_s3 + $0x8] sm:$0xff]  ;;  %v1742_v22 = vld [vmem:[%s2388_s3] sm:$0xff] }
  0x14   : > { %v1735_v20 = vld [vmem:[%s2388_s3 + $0x88] sm:$0xff]  ;;  %v2065_v23 = vld [vmem:[%s371_s29] sm:$0xff] }
  0x15   : > { %471 = vmatpush.bf16.xpose.msra.mxu0 %v1732_v3  ;;  %v2067_v24 = vld [vmem:[%s371_s29 + $0x8] sm:$0xff]  ;;  %v397_v25 = vld [vmem:[%s376_s15] sm:$0xff]  ;;  %s388_s29 = scalar_lea.vmem %s2394_s9, %s2046_s23 }
  0x16   : > { %654 = vmatpush.bf16.xpose.msra.mxu2 %v1748_v4  ;;  %v398_v26 = vld [vmem:[%s376_s15 + $0x8] sm:$0xff]  ;;  %v1734_v27 = vld [vmem:[%s2388_s3 + $0x80] sm:$0xff]  ;;  %v399_v28 = vadd.f32 %v397_v25, %v2065_v23  ;;  %v500_v31 = vpack.c.bf16 %v2067_v24, %v2065_v23  ;;  %s1905_s15 = smov 96  }
  0x17   : > { %554 = vmatpush.bf16.xpose.msra.mxu1 %v1740_v5  ;;  %v400_v29 = vadd.f32 %v398_v26, %v2067_v24  ;;  %v1805_v34 = vld [vmem:[%s2389_s4 + $0x2] ss:$0 sm:$0xff]  ;;  %v1803_v35 = vld [vmem:[%s2389_s4 + $0x1] ss:$0 sm:$0xff]  ;;  %v1804_v42 = vld [vmem:[%s2389_s4] ss:$0 sm:$0xff] }
  0x18   : > { %v2124_v3 = vld [vmem:[%s379_s25] ss:$0 sm:$0xff] }
  0x19   : > { %v417_v30 = vpack.c.bf16 %v400_v29, %v399_v28 }
  0x1d   : > { %472 = vmatpush.bf16.xpose.msra.mxu0 %v1731_v6 }
  0x1e   : > { %655 = vmatpush.bf16.xpose.msra.mxu2 %v1747_v7 }
  0x1f   : > { %555 = vmatpush.bf16.xpose.msra.mxu1 %v1739_v8 }
  0x25   : > { %473 = vmatpush.bf16.xpose.msra.mxu0 %v1730_v9 }
  0x26   : > { %656 = vmatpush.bf16.xpose.msra.mxu2 %v1746_v10 }
  0x27   : > { %556 = vmatpush.bf16.xpose.msra.mxu1 %v1738_v11 }
  0x2d   : > { %474 = vmatpush.bf16.xpose.msra.mxu0 %v1729_v12 }
  0x2e   : > { %657 = vmatpush.bf16.xpose.msra.mxu2 %v1745_v13 }
  0x2f   : > { %557 = vmatpush.bf16.xpose.msra.mxu1 %v1737_v14 }
  0x35   : > { %475 = vmatpush.bf16.xpose.msra.mxu0 %v1728_v15 }
  0x36   : > { %658 = vmatpush.bf16.xpose.msra.mxu2 %v1744_v16 }
  0x37   : > { %558 = vmatpush.bf16.xpose.msra.mxu1 %v1736_v17 }
  0x3d   : > { %476 = vmatpush.bf16.xpose.msra.mxu0 %v1727_v18 }
  0x3e   : > { %659 = vmatpush.bf16.xpose.msra.mxu2 %v1743_v19 }
  0x3f   : > { %559 = vmatpush.bf16.xpose.msra.mxu1 %v1735_v20 }
  0x45   : > { %477 = vmatpush.bf16.xpose.msra.mxu0 %v1726_v21 }
  0x46   : > { %660 = vmatpush.bf16.xpose.msra.mxu2 %v1742_v22 }
  0x47   : > { %560 = vmatpush.bf16.xpose.msra.mxu1 %v1734_v27 }
  0x4c   : > { %478 = vmatmul.bf16.vlgmr.msra.gmra.mxu0 %v417_v30 }
  0x4d   : > { %661 = vmatmul.bf16.vlgmr.msra.gmra.mxu2 %v417_v30 }
  0x4e   : > { %561 = vmatmul.bf16.vlgmr.msra.gmra.mxu1 %v500_v31 }
  0xc9   : > { %v479_v32 = vpop.f32.mrf.mxu0 }
  0xca   : > { %v480_v39 = vadd.f32 %v1803_v35, %v479_v32 }
  0xcb   : > { %v562_v33 = vpop.f32.mrf.mxu1 }
  0xcc   : > { %v563_v38 = vadd.f32 %v1805_v34, %v562_v33 }
  0xd0   : > { %v662_v36 = vpop.f32.mrf.mxu2 }
  0xd1   : > { %v481_v37 = vpop.f32.mrf.mxu0  ;;  %v663_v46 = vadd.f32 %v1804_v42, %v662_v36 }
  0xd2   : > { %v482_v40 = vadd.f32 %v1803_v35, %v481_v37 }
  0xd3   : > { %v564_v41 = vpop.f32.mrf.mxu1  ;;  %v667_v50 = vmul.f32 0.25, %v663_v46 }
  0xd4   : > { %v565_v43 = vadd.f32 %v1805_v34, %v564_v41  ;;  %v1763_v44 = vpack.c.bf16 %v482_v40, %v480_v39 }
  0xd5   : > { %v669_v54 = vpack.c.bf16 %v667_v50, %v667_v50 }
  0xd6   : > { %v1768_v45 = vpack.c.bf16 %v565_v43, %v563_v38  ;;  %1764 = vst [vmem:[#allocation2] sm:$0xff] %v1763_v44  }
  0xd7   : > { %v681_v57 = vunpack.c.l.b16 %v669_v54 }
  0xd8   : > { %v664_v47 = vpop.f32.mrf.mxu2  ;;  %1769 = vst [vmem:[#allocation3] sm:$0xff] %v1768_v45  }
  0xd9   : > { %v665_v48 = vadd.f32 %v1804_v42, %v664_v47 }
  0xdb   : > { %v668_v49 = vmul.f32 0.25, %v665_v48 }
  0xdd   : > { %v670_v51 = vpack.c.bf16 %v668_v49, %v668_v49  ;;  %v2085_v52 = vld [vmem:[#allocation2] sm:$0xff] }
  0xde   : > { %916 = vrot.lane.b32.xlu2 %v2085_v52, %s1903_s13  ;;  %760 = vrot.lane.b32.xlu0 %v2085_v52, %s1904_s14  ;;  %v694_v55 = vsel %vm689_vm0, %v2085_v52, 0 }
  0xdf   : > { %v2087_v53 = vld [vmem:[#allocation3] sm:$0xff]  ;;  %703 = vmatpush.bf16.xpose.msrb.mxu0 %v694_v55  ;;  %v682_v56 = vunpack.c.l.b16 %v670_v51 }
  0xe0   : > { %749 = vmatpush.bf16.msrb.mxu2 %v2087_v53 }
  0xe1   : > { %v2096_v58 = vpack.c.b16 %v682_v56, %v681_v57 }
  0xe6   : > { %758 = vrot.lane.b32.xlu0 %v2096_v58, %s1904_s14  ;;  %1669 = vmatmul.msk.bf16.vlgmr.msrb.gmra.mxu0 %vm689_vm0, %v2096_v58 }
  0xee   : > { %805 = vrot.lane.b32.xlu0 %v2087_v53, %s1904_s14 }
  0xf6   : > { %836 = vrot.lane.b32.xlu0 %v2096_v58, %s1905_s15 }
  0xfe   : > { %914 = vrot.lane.b32.xlu0 %v2096_v58, %s1903_s13 }
 0x106   : > { %994 = vrot.lane.b32.xlu0 %v2085_v52, %s1906_s16 }
 0x10e   : > { %1070 = vrot.lane.b32.xlu0 %v2096_v58, %s1907_s17 }
 0x116   : > { %1148 = vrot.lane.b32.xlu0 %v2096_v58, %s1908_s18 }
 0x138   : > { %v917_v59 = vpop.permute.xlu2 %916 }
 0x139   : > { %v922_v62 = vsel %vm689_vm0, %v917_v59, 0 }
 0x150   : > { %v761_v60 = vpop.permute.xlu0 %760 }
 0x151   : > { %v766_v61 = vsel %vm689_vm0, %v761_v60, 0 }
 0x152   : > { %775 = vmatpush.bf16.xpose.msrb.mxu1 %v766_v61 }
 0x158   : > { %v759_v63 = vpop.permute.xlu0 %758 }
 0x159   : > { %1675 = vmatmul.msk.bf16.vlgmr.msrb.gmra.mxu1 %vm689_vm0, %v759_v63 }
 0x15a   : > { %931 = vmatpush.bf16.xpose.msra.mxu1 %v922_v62 }
 0x160   : > { %v806_v0 = vpop.permute.xlu0 %805 }
 0x161   : > { %818 = vmatpush.bf16.msra.mxu3 %v806_v0 }
 0x163   : > { %v705_v1 = vpop.f32.mrf.mxu0 }
 0x164   : > { %v2143_v15 = vadd.f32 %v2124_v3, %v705_v1 }
 0x166   : > { %v710_v16 = vsel %vm689_vm0, %v2143_v15, -inf }
 0x168   : > { %v2117_v2 = vpop.permute.xlu0 %836 }
 0x16b   : > { %v707_v4 = vpop.f32.mrf.mxu0 }
 0x16c   : > { %v2127_v5 = vadd.f32 %v2124_v3, %v707_v4 }
 0x16e   : > { %v713_v6 = vsel %vm689_vm0, %v2127_v5, -inf }
 0x16f   : > { %714 = vmax.xlane.f32.xlu0 %v713_v6 }
 0x170   : > { %v915_v7 = vpop.permute.xlu0 %914 }
 0x171   : > { %1679 = vmatmul.msk.bf16.vlgmr.msra.gmra.mxu1 %vm689_vm0, %v915_v7 }
 0x178   : > { %v995_v40 = vpop.permute.xlu0 %994 }
 0x179   : > { %v1000_v49 = vsel %vm689_vm0, %v995_v40, 0 }
 0x180   : > { %v1071_v50 = vpop.permute.xlu0 %1070 }
 0x188   : > { %v1149_v55 = vpop.permute.xlu0 %1148 }
 0x1d6   : > { %v777_v8 = vpop.f32.mrf.mxu1 }
 0x1d7   : > { %v778_v9 = vadd.f32 %v2124_v3, %v777_v8 }
 0x1d9   : > { %v782_v10 = vsel %vm689_vm0, %v778_v9, -inf }
 0x1da   : > { %783 = vmax.xlane.f32.xlu1 %v782_v10 }
 0x1de   : > { %v779_v11 = vpop.f32.mrf.mxu1 }
 0x1df   : > { %v780_v12 = vadd.f32 %v2124_v3, %v779_v11 }
 0x1e1   : > { %v785_v13 = vsel %vm689_vm0, %v780_v12, -inf }
 0x1e2   : > { %786 = vmax.xlane.f32.xlu1 %v785_v13  ;;  %v715_v63 = vpop.xlane.xlu0 %714 }
 0x1e3   : > { %v717_v4 = vsub.f32 %v2127_v5, %v715_v63 }
 0x1e5   : > { %v720_v8 = vmul.f32 1.442695, %v717_v4 }
 0x1ee   : > { %v933_v14 = vpop.f32.mrf.mxu1 }
 0x1ef   : > { %v2162_v34 = vadd.f32 %v2124_v3, %v933_v14 }
 0x1f1   : > { %v938_v35 = vsel %vm689_vm0, %v2162_v34, -inf }
 0x1f6   : > { %v935_v17 = vpop.f32.mrf.mxu1 }
 0x1f7   : > { %v2148_v18 = vadd.f32 %v2124_v3, %v935_v17 }
 0x1f9   : > { %v941_v19 = vsel %vm689_vm0, %v2148_v18, -inf }
 0x1fb   : > { %838 = vrot.lane.b32.xlu1 %v2085_v52, %s1905_s15 }
 0x203   : > { %992 = vrot.lane.b32.xlu1 %v2096_v58, %s1906_s16 }
 0x20b   : > { %1228 = vrot.lane.b32.xlu1 %v2085_v52, %s1909_s30 }
 0x235   : > { %711 = vmax.xlane.f32.xlu1 %v710_v16 }
 0x23d   : > { %942 = vmax.xlane.f32.xlu1 %v941_v19 }
 0x24d   : > { %v784_v20 = vpop.xlane.xlu1 %783 }
 0x24e   : > { %v788_v21 = vsub.f32 %v778_v9, %v784_v20 }
 0x250   : > { %v790_v22 = vmul.f32 1.442695, %v788_v21 }
 0x252   : > { %1809 = vpow2.f32 %v790_v22 }
 0x255   : > { %v787_v25 = vpop.xlane.xlu1 %786 }
 0x256   : > { %v789_v26 = vsub.f32 %v780_v12, %v787_v25 }
 0x258   : > { %v1810_v27 = vpop.eup %1809  ;;  %v792_v28 = vmul.f32 1.442695, %v789_v26 }
 0x259   : > { %v794_v29 = vsel %vm689_vm0, %v1810_v27, 0.0 }
 0x25a   : > { %1811 = vpow2.f32 %v792_v28  ;;  %795 = vadd.xlane.f32.xlu2 %v794_v29 }
 0x260   : > { %v1812_v30 = vpop.eup %1811 }
 0x261   : > { %v797_v31 = vsel %vm689_vm0, %v1812_v30, 0.0 }
 0x262   : > { %798 = vadd.xlane.f32.xlu2 %v797_v31 }
 0x26d   : > { %v839_v32 = vpop.permute.xlu1 %838 }
 0x26e   : > { %v844_v33 = vsel %vm689_vm0, %v839_v32, 0 }
 0x26f   : > { %853 = vmatpush.bf16.xpose.msrb.mxu3 %v844_v33 }
 0x275   : > { %v993_v37 = vpop.permute.xlu1 %992 }
 0x27a   : > { %1072 = vrot.lane.b32.xlu2 %v2085_v52, %s1907_s17 }
 0x27d   : > { %v1229_v42 = vpop.permute.xlu1 %1228 }
 0x27e   : > { %v1234_v47 = vsel %vm689_vm0, %v1229_v42, 0 }
 0x282   : > { %1150 = vrot.lane.b32.xlu2 %v2085_v52, %s1908_s18 }
 0x28a   : > { %1226 = vrot.lane.b32.xlu2 %v2096_v58, %s1909_s30 }
 0x2a8   : > { %v712_v56 = vpop.xlane.xlu1 %711 }
 0x2a9   : > { %v716_v57 = vsub.f32 %v2143_v15, %v712_v56 }
 0x2ab   : > { %v718_v58 = vmul.f32 1.442695, %v716_v57 }
 0x2b0   : > { %v943_v9 = vpop.xlane.xlu1 %942 }
 0x2b1   : > { %v945_v13 = vsub.f32 %v2148_v18, %v943_v9 }
 0x2b3   : > { %939 = vmax.xlane.f32.xlu2 %v938_v35  ;;  %v948_v16 = vmul.f32 1.442695, %v945_v13 }
 0x2cd   : > { %v796_v36 = vpop.xlane.xlu2 %795 }
 0x2ce   : > { %1813 = vrcp.f32 %v796_v36 }
 0x2d4   : > { %v1814_v39 = vpop.eup %1813 }
 0x2d5   : > { %v799_v38 = vpop.xlane.xlu2 %798  ;;  %v802_v44 = vmul.f32 %v1814_v39, %v1810_v27 }
 0x2d6   : > { %1815 = vrcp.f32 %v799_v38 }
 0x2d7   : > { %1817 = vpow2.f32 %v718_v58 }
 0x2d8   : > { %1819 = vpow2.f32 %v720_v8 }
 0x2d9   : > { %1821 = vpow2.f32 %v948_v16 }
 0x2dc   : > { %v1816_v41 = vpop.eup %1815 }
 0x2dd   : > { %v1073_v43 = vpop.permute.xlu2 %1072  ;;  %v803_v45 = vmul.f32 %v1816_v41, %v1812_v30  ;;  %v2185_v0 = vpop.eup %1817 }
 0x2de   : > { %v1078_v46 = vsel %vm689_vm0, %v1073_v43, 0  ;;  %v722_v7 = vsel %vm689_vm0, %v2185_v0, 0.0  ;;  %v2204_v19 = vpop.eup %1819 }
 0x2df   : > { %1087 = vmatpush.bf16.xpose.msrb.mxu1 %v1078_v46  ;;  %v804_v48 = vpack.c.bf16 %v803_v45, %v802_v44  ;;  %v725_v25 = vsel %vm689_vm0, %v2204_v19, 0.0  ;;  %v2213_v26 = vpop.eup %1821 }
 0x2e0   : > { %v953_v30 = vsel %vm689_vm0, %v2213_v26, 0.0 }
 0x2e1   : > { %1676 = vmatmul.msk.bf16.vlgmr.msra.gmra.mxu3 %vm689_vm0, %v804_v48 }
 0x2e2   : > { %1009 = vmatpush.bf16.xpose.msra.mxu3 %v1000_v49 }
 0x2e5   : > { %v1151_v51 = vpop.permute.xlu2 %1150 }
 0x2e6   : > { %1683 = vmatmul.msk.bf16.vlgmr.msrb.gmra.mxu1 %vm689_vm0, %v1071_v50  ;;  %v1156_v52 = vsel %vm689_vm0, %v1151_v51, 0 }
 0x2e7   : > { %1243 = vmatpush.bf16.xpose.msra.mxu1 %v1234_v47 }
 0x2ed   : > { %v1227_v54 = vpop.permute.xlu2 %1226 }
 0x2f1   : > { %1677 = vmatmul.msk.bf16.vlgmr.msrb.gmra.mxu3 %vm689_vm0, %v2117_v2 }
 0x2f2   : > { %1165 = vmatpush.bf16.xpose.msrb.mxu3 %v1156_v52 }
 0x2f6   : > { %1687 = vmatmul.msk.bf16.vlgmr.msra.gmra.mxu1 %vm689_vm0, %v1227_v54 }
 0x301   : > { %1681 = vmatmul.msk.bf16.vlgmr.msra.gmra.mxu3 %vm689_vm0, %v993_v37 }
 0x311   : > { %1685 = vmatmul.msk.bf16.vlgmr.msrb.gmra.mxu3 %vm689_vm0, %v1149_v55 }
 0x326   : > { %v940_v11 = vpop.xlane.xlu2 %939 }
 0x327   : > { %v944_v5 = vsub.f32 %v2162_v34, %v940_v11 }
 0x329   : > { %v946_v17 = vmul.f32 1.442695, %v944_v5 }
 0x32b   : > { %1823 = vpow2.f32 %v946_v17 }
 0x331   : > { %v2215_v27 = vpop.eup %1823 }
 0x332   : > { %v950_v29 = vsel %vm689_vm0, %v2215_v27, 0.0 }
 0x363   : > { %v1089_v59 = vpop.f32.mrf.mxu1 }
 0x364   : > { %v2179_v60 = vadd.f32 %v2124_v3, %v1089_v59  ;;  %v2183_v62 = vpop.f32.mrf.mxu3 }
 0x366   : > { %v1094_v61 = vsel %vm689_vm0, %v2179_v60, -inf }
 0x367   : > { %1095 = vmax.xlane.f32.xlu1 %v1094_v61 }
 0x36b   : > { %v1091_v1 = vpop.f32.mrf.mxu1 }
 0x36c   : > { %v2188_v2 = vadd.f32 %v2124_v3, %v1091_v1  ;;  %v2195_v10 = vpop.f32.mrf.mxu3 }
 0x36e   : > { %v1097_v6 = vsel %vm689_vm0, %v2188_v2, -inf }
 0x36f   : > { %1098 = vmax.xlane.f32.xlu2 %v1097_v6  ;;  %723 = vadd.xlane.f32.xlu1 %v722_v7 }
 0x373   : > { %v1245_v12 = vpop.f32.mrf.mxu1 }
 0x374   : > { %v2199_v14 = vadd.f32 %v2124_v3, %v1245_v12  ;;  %v855_v20 = vpop.f32.mrf.mxu3 }
 0x375   : > { %v856_v31 = vadd.f32 %v2124_v3, %v855_v20 }
 0x376   : > { %v1250_v15 = vsel %vm689_vm0, %v2199_v14, -inf }
 0x377   : > { %1251 = vmax.xlane.f32.xlu2 %v1250_v15  ;;  %v860_v33 = vsel %vm689_vm0, %v856_v31, -inf }
 0x37b   : > { %v1247_v21 = vpop.f32.mrf.mxu1 }
 0x37c   : > { %v2207_v22 = vadd.f32 %v2124_v3, %v1247_v21  ;;  %v857_v28 = vpop.f32.mrf.mxu3 }
 0x37d   : > { %v858_v32 = vadd.f32 %v2124_v3, %v857_v28 }
 0x37e   : > { %v1253_v18 = vsel %vm689_vm0, %v2207_v22, -inf }
 0x37f   : > { %1254 = vmax.xlane.f32.xlu0 %v1253_v18  ;;  %726 = vadd.xlane.f32.xlu2 %v725_v25  ;;  %v863_v34 = vsel %vm689_vm0, %v858_v32, -inf }
 0x384   : > { %v1011_v35 = vpop.f32.mrf.mxu3 }
 0x385   : > { %v1012_v36 = vadd.f32 %v2124_v3, %v1011_v35 }
 0x387   : > { %951 = vadd.xlane.f32.xlu2 %v950_v29  ;;  %954 = vadd.xlane.f32.xlu0 %v953_v30  ;;  %v1016_v37 = vsel %vm689_vm0, %v1012_v36, -inf }
 0x388   : > { %883 = vrot.lane.b32.xlu1 %v2087_v53, %s1905_s15 }
 0x38c   : > { %v1013_v38 = vpop.f32.mrf.mxu3 }
 0x38d   : > { %v2232_v39 = vadd.f32 %v2124_v3, %v1013_v38 }
 0x38f   : > { %861 = vmax.xlane.f32.xlu2 %v860_v33  ;;  %864 = vmax.xlane.f32.xlu0 %v863_v34  ;;  %v1019_v40 = vsel %vm689_vm0, %v2232_v39, -inf }
 0x394   : > { %v1167_v41 = vpop.f32.mrf.mxu3 }
 0x395   : > { %v2239_v42 = vadd.f32 %v2124_v3, %v1167_v41 }
 0x397   : > { %1017 = vmax.xlane.f32.xlu0 %v1016_v37  ;;  %v1172_v43 = vsel %vm689_vm0, %v2239_v42, -inf }
 0x39c   : > { %v1169_v55 = vpop.f32.mrf.mxu3 }
 0x39d   : > { %v2254_v58 = vadd.f32 %v2124_v3, %v1169_v55 }
 0x39f   : > { %v1175_v61 = vsel %vm689_vm0, %v2254_v58, -inf }
 0x3ab   : > { %961 = vrot.lane.b32.xlu0 %v2087_v53, %s1903_s13 }
 0x3b2   : > { %1020 = vmax.xlane.f32.xlu1 %v1019_v40 }
 0x3cb   : > { %1117 = vrot.lane.b32.xlu1 %v2087_v53, %s1907_s17 }
 0x3d5   : > { %1173 = vmax.xlane.f32.xlu0 %v1172_v43 }
 0x3da   : > { %v1096_v44 = vpop.xlane.xlu1 %1095 }
 0x3db   : > { %v1100_v45 = vsub.f32 %v2179_v60, %v1096_v44 }
 0x3dd   : > { %v1102_v46 = vmul.f32 1.442695, %v1100_v45 }
 0x3df   : > { %1825 = vpow2.f32 %v1102_v46 }
 0x3e2   : > { %v1099_v47 = vpop.xlane.xlu2 %1098  ;;  %v724_v56 = vpop.xlane.xlu1 %723 }
 0x3e3   : > { %v1101_v48 = vsub.f32 %v2188_v2, %v1099_v47 }
 0x3e5   : > { %v2245_v49 = vpop.eup %1825  ;;  %v1104_v50 = vmul.f32 1.442695, %v1101_v48 }
 0x3e6   : > { %v1106_v51 = vsel %vm689_vm0, %v2245_v49, 0.0 }
 0x3e7   : > { %1827 = vpow2.f32 %v1104_v50  ;;  %1107 = vadd.xlane.f32.xlu2 %v1106_v51 }
 0x3e8   : > { %1829 = vrcp.f32 %v724_v56 }
 0x3ea   : > { %v1252_v52 = vpop.xlane.xlu2 %1251 }
 0x3eb   : > { %v1256_v5 = vsub.f32 %v2199_v14, %v1252_v52 }
 0x3ed   : > { %v2249_v54 = vpop.eup %1827 }
 0x3ee   : > { %v1109_v57 = vsel %vm689_vm0, %v2249_v54, 0.0  ;;  %v1830_v63 = vpop.eup %1829 }
 0x3ef   : > { %1110 = vadd.xlane.f32.xlu2 %v1109_v57  ;;  %v730_v2 = vmul.f32 %v1830_v63, %v2185_v0  ;;  %v1258_v0 = vmul.f32 1.442695, %v1256_v5 }
 0x3f2   : > { %v727_v59 = vpop.xlane.xlu2 %726  ;;  %v2256_v60 = vpop.xlane.xlu0 %1254 }
 0x3f3   : > { %1831 = vrcp.f32 %v727_v59  ;;  %v1257_v50 = vsub.f32 %v2207_v22, %v2256_v60 }
 0x3f5   : > { %1176 = vmax.xlane.f32.xlu1 %v1175_v61  ;;  %v1260_v52 = vmul.f32 1.442695, %v1257_v50 }
 0x3f9   : > { %v1832_v1 = vpop.eup %1831 }
 0x3fa   : > { %v731_v4 = vmul.f32 %v1832_v1, %v2204_v19  ;;  %v952_v6 = vpop.xlane.xlu2 %951  ;;  %v955_v7 = vpop.xlane.xlu0 %954 }
 0x3fb   : > { %v884_v8 = vpop.permute.xlu1 %883 }
 0x3fc   : > { %896 = vmatpush.bf16.msra.mxu0 %v884_v8  ;;  %v732_v3 = vpack.c.bf16 %v731_v4, %v730_v2 }
 0x3fe   : > { %1674 = vmatmul.msk.bf16.vlgmr.msrb.gmra.mxu2 %vm689_vm0, %v732_v3 }
 0x402   : > { %v862_v9 = vpop.xlane.xlu2 %861  ;;  %v865_v11 = vpop.xlane.xlu0 %864 }
 0x403   : > { %v866_v12 = vsub.f32 %v856_v31, %v862_v9  ;;  %v867_v13 = vsub.f32 %v858_v32, %v865_v11 }
 0x405   : > { %v868_v15 = vmul.f32 1.442695, %v866_v12  ;;  %v870_v16 = vmul.f32 1.442695, %v867_v13 }
 0x407   : > { %1833 = vpow2.f32 %v868_v15 }
 0x408   : > { %1835 = vpow2.f32 %v870_v16 }
 0x409   : > { %1837 = vpow2.f32 %v1258_v0 }
 0x40a   : > { %v1018_v17 = vpop.xlane.xlu0 %1017 }
 0x40b   : > { %v1022_v19 = vsub.f32 %v1012_v36, %v1018_v17 }
 0x40d   : > { %v2264_v20 = vpop.eup %1833  ;;  %v1024_v21 = vmul.f32 1.442695, %v1022_v19 }
 0x40e   : > { %v2266_v18 = vpop.eup %1835  ;;  %v872_v25 = vsel %vm689_vm0, %v2264_v20, 0.0 }
 0x40f   : > { %1839 = vpow2.f32 %v1024_v21  ;;  %873 = vadd.xlane.f32.xlu1 %v872_v25  ;;  %v875_v14 = vsel %vm689_vm0, %v2266_v18, 0.0  ;;  %v2272_v28 = vpop.eup %1837 }
 0x410   : > { %876 = vadd.xlane.f32.xlu2 %v875_v14  ;;  %1841 = vrcp.f32 %v952_v6  ;;  %v1262_v30 = vsel %vm689_vm0, %v2272_v28, 0.0 }
 0x411   : > { %1843 = vrcp.f32 %v955_v7 }
 0x415   : > { %v2274_v29 = vpop.eup %1839 }
 0x416   : > { %v1028_v31 = vsel %vm689_vm0, %v2274_v29, 0.0  ;;  %v1842_v32 = vpop.eup %1841 }
 0x417   : > { %1263 = vadd.xlane.f32.xlu1 %v1262_v30  ;;  %1029 = vadd.xlane.f32.xlu0 %v1028_v31  ;;  %v1844_v33 = vpop.eup %1843  ;;  %v958_v34 = vmul.f32 %v1842_v32, %v2215_v27 }
 0x418   : > { %v959_v35 = vmul.f32 %v1844_v33, %v2213_v26 }
 0x41a   : > { %v960_v37 = vpack.c.bf16 %v959_v35, %v958_v34 }
 0x41d   : > { %v962_v36 = vpop.permute.xlu0 %961 }
 0x41e   : > { %974 = vmatpush.bf16.msra.mxu2 %v962_v36 }
 0x421   : > { %1680 = vmatmul.msk.bf16.vlgmr.msra.gmra.mxu2 %vm689_vm0, %v960_v37 }
 0x425   : > { %v1021_v38 = vpop.xlane.xlu1 %1020 }
 0x426   : > { %v1023_v40 = vsub.f32 %v2232_v39, %v1021_v38 }
 0x428   : > { %v1026_v41 = vmul.f32 1.442695, %v1023_v40 }
 0x42a   : > { %1845 = vpow2.f32 %v1026_v41 }
 0x430   : > { %v2284_v43 = vpop.eup %1845  ;;  %1273 = vrot.lane.b32.xlu1 %v2087_v53, %s1909_s30 }
 0x431   : > { %v1031_v27 = vsel %vm689_vm0, %v2284_v43, 0.0 }
 0x432   : > { %1032 = vadd.xlane.f32.xlu2 %v1031_v27 }
 0x43d   : > { %v1118_v26 = vpop.permute.xlu1 %1117 }
 0x43e   : > { %1130 = vmatpush.bf16.msrb.mxu2 %v1118_v26 }
 0x448   : > { %v1174_v44 = vpop.xlane.xlu0 %1173 }
 0x449   : > { %v1178_v45 = vsub.f32 %v2239_v42, %v1174_v44 }
 0x44a   : > { %1039 = vrot.lane.b32.xlu2 %v2087_v53, %s1906_s16 }
 0x44b   : > { %v1180_v39 = vmul.f32 1.442695, %v1178_v45 }
 0x44d   : > { %1847 = vpow2.f32 %v1180_v39 }
 0x453   : > { %v2293_v46 = vpop.eup %1847 }
 0x454   : > { %v1184_v47 = vsel %vm689_vm0, %v2293_v46, 0.0 }
 0x455   : > { %1185 = vadd.xlane.f32.xlu0 %v1184_v47 }
 0x45a   : > { %v1108_v48 = vpop.xlane.xlu2 %1107 }
 0x45b   : > { %1849 = vrcp.f32 %v1108_v48 }
 0x461   : > { %v1850_v42 = vpop.eup %1849 }
 0x462   : > { %v1111_v51 = vpop.xlane.xlu2 %1110  ;;  %v1114_v59 = vmul.f32 %v1850_v42, %v2245_v49  ;;  %v1759_v42 = vld [vmem:[%s2390_s5 + $0x38] sm:$0xff] }
 0x463   : > { %1851 = vrcp.f32 %v1111_v51  ;;  %1375 = vmatpush.bf16.xpose.msra.mxu3 %v1759_v42 }
 0x464   : > { %1853 = vpow2.f32 %v1260_v52 }
 0x468   : > { %v1177_v55 = vpop.xlane.xlu1 %1176 }
 0x469   : > { %v1852_v56 = vpop.eup %1851  ;;  %v1179_v57 = vsub.f32 %v2254_v58, %v1177_v55 }
 0x46a   : > { %v1115_v61 = vmul.f32 %v1852_v56, %v2249_v54  ;;  %v1854_v22 = vpop.eup %1853 }
 0x46b   : > { %v1182_v63 = vmul.f32 1.442695, %v1179_v57  ;;  %v1265_v60 = vsel %vm689_vm0, %v1854_v22, 0.0 }
 0x46c   : > { %v1116_v1 = vpack.c.bf16 %v1115_v61, %v1114_v59  ;;  %v1758_v59 = vld [vmem:[%s2390_s5 + $0x30] sm:$0xff]  ;;  %v1757_v61 = vld [vmem:[%s2390_s5 + $0x28] sm:$0xff] }
 0x46d   : > { %1855 = vpow2.f32 %v1182_v63  ;;  %1376 = vmatpush.bf16.xpose.msra.mxu3 %v1758_v59 }
 0x46e   : > { %1684 = vmatmul.msk.bf16.vlgmr.msrb.gmra.mxu2 %vm689_vm0, %v1116_v1 }
 0x473   : > { %v1856_v2 = vpop.eup %1855  ;;  %1266 = vadd.xlane.f32.xlu2 %v1265_v60  ;;  %v1755_v60 = vld [vmem:[%s2390_s5 + $0x18] sm:$0xff] }
 0x474   : > { %v1187_v4 = vsel %vm689_vm0, %v1856_v2, 0.0 }
 0x475   : > { %1188 = vadd.xlane.f32.xlu0 %v1187_v4  ;;  %1377 = vmatpush.bf16.xpose.msra.mxu3 %v1757_v61  ;;  %v1753_v4 = vld [vmem:[%s2390_s5 + $0x8] sm:$0xff] }
 0x481   : > { %v751_v6 = vpop.f32.mrf.mxu2 }
 0x482   : > { %756 = vst.msk [vmem:[#allocation4] sm:$0xff] %vm689_vm0, %v751_v6  ;;  %v874_v58 = vpop.xlane.xlu1 %873 }
 0x483   : > { %v877_v49 = vpop.xlane.xlu2 %876  ;;  %1857 = vrcp.f32 %v874_v58  ;;  %v1752_v58 = vld [vmem:[%s2390_s5] sm:$0xff] }
 0x484   : > { %1859 = vrcp.f32 %v877_v49 }
 0x489   : > { %v1858_v54 = vpop.eup %1857  ;;  %v753_v7 = vpop.f32.mrf.mxu2  ;;  %1195 = vrot.lane.b32.xlu0 %v2087_v53, %s1908_s18 }
 0x48a   : > { %v1860_v8 = vpop.eup %1859  ;;  %v880_v3 = vmul.f32 %v1858_v54, %v2264_v20  ;;  %757 = vst.msk [vmem:[#allocation4 + $0x8] sm:$0xff] %vm689_vm0, %v753_v7  ;;  %v1264_v12 = vpop.xlane.xlu1 %1263 }
 0x48b   : > { %v881_v9 = vmul.f32 %v1860_v8, %v2266_v18  ;;  %827 = vrot.lane.b32.xlu2 %v2183_v62, %s1909_s30  ;;  %v1030_v13 = vpop.xlane.xlu0 %1029 }
 0x48c   : > { %1861 = vrcp.f32 %v1030_v13 }
 0x48d   : > { %v882_v11 = vpack.c.bf16 %v881_v9, %v880_v3 }
 0x48f   : > { %1678 = vmatmul.msk.bf16.vlgmr.msra.gmra.mxu0 %vm689_vm0, %v882_v11  ;;  %v1806_v11 = vld [vmem:[%s2391_s6] ss:$0 sm:$0xff] }
 0x491   : > { %829 = vrot.lane.b32.xlu0 %v2195_v10, %s1909_s30 }
 0x492   : > { %v1862_v16 = vpop.eup %1861 }
 0x493   : > { %v1036_v62 = vmul.f32 %v1862_v16, %v2274_v29 }
 0x4a2   : > { %v1274_v5 = vpop.permute.xlu1 %1273 }
 0x4a3   : > { %1286 = vmatpush.bf16.msra.mxu2 %v1274_v5 }
 0x4a4   : > { %v976_v53 = vpop.f32.mrf.mxu2 }
 0x4a5   : > { %983 = vrot.lane.b32.xlu1 %v976_v53, %s1907_s17  ;;  %v1033_v15 = vpop.xlane.xlu2 %1032 }
 0x4a6   : > { %1863 = vrcp.f32 %v1033_v15 }
 0x4a7   : > { %1865 = vrcp.f32 %v1264_v12 }
 0x4ac   : > { %v1864_v0 = vpop.eup %1863  ;;  %v978_v17 = vpop.f32.mrf.mxu2 }
 0x4ad   : > { %v1037_v19 = vmul.f32 %v1864_v0, %v2284_v43  ;;  %v1040_v20 = vpop.permute.xlu2 %1039  ;;  %985 = vrot.lane.b32.xlu0 %v978_v17, %s1907_s17  ;;  %v1866_v25 = vpop.eup %1865  ;;  %v1910_v0 = vmov 128.0  }
 0x4ae   : > { %1052 = vmatpush.bf16.msrb.mxu0 %v1040_v20  ;;  %v1270_v31 = vmul.f32 %v1866_v25, %v2272_v28 }
 0x4af   : > { %v1038_v10 = vpack.c.bf16 %v1037_v19, %v1036_v62 }
 0x4b1   : > { %1682 = vmatmul.msk.bf16.vlgmr.msrb.gmra.mxu0 %vm689_vm0, %v1038_v10 }
 0x4c8   : > { %v1186_v21 = vpop.xlane.xlu0 %1185 }
 0x4e6   : > { %v1267_v18 = vpop.xlane.xlu2 %1266 }
 0x4e7   : > { %1867 = vrcp.f32 %v1267_v18 }
 0x4e8   : > { %v1189_v30 = vpop.xlane.xlu0 %1188 }
 0x4e9   : > { %1869 = vrcp.f32 %v1189_v30 }
 0x4ea   : > { %1871 = vrcp.f32 %v1186_v21 }
 0x4eb   : > { %1873 = vrcp.f32 %v1910_v0 }
 0x4ed   : > { %v1868_v14 = vpop.eup %1867 }
 0x4ee   : > { %v1271_v29 = vmul.f32 %v1868_v14, %v1854_v22  ;;  %v828_v32 = vpop.permute.xlu2 %827  ;;  %v1756_v22 = vld [vmem:[%s2390_s5 + $0x20] sm:$0xff] }
 0x4ef   : > { %834 = vst.msk [vmem:[#allocation4] sm:$0xff] %vm833_vm1, %v828_v32  ;;  %v1870_v35 = vpop.eup %1869  ;;  %1378 = vmatpush.bf16.xpose.msra.mxu3 %v1756_v22 }
 0x4f0   : > { %v1272_v33 = vpack.c.bf16 %v1271_v29, %v1270_v31  ;;  %v1872_v36 = vpop.eup %1871  ;;  %v1193_v37 = vmul.f32 %v1870_v35, %v1856_v2  ;;  %v1754_v2 = vld [vmem:[%s2390_s5 + $0x10] sm:$0xff] }
 0x4f1   : > { %v1132_v34 = vpop.f32.mrf.mxu2  ;;  %v1192_v28 = vmul.f32 %v1872_v36, %v2293_v46  ;;  %v1874_v17 = vpop.eup %1873 }
 0x4f2   : > { %1139 = vrot.lane.b32.xlu0 %v1132_v34, %s1903_s13  ;;  %1688 = vmatmul.msk.bf16.vlgmr.msra.gmra.mxu2 %vm689_vm0, %v1272_v33  ;;  %v1398_v62 = vmul.f32 128.0, %v1874_v17  ;;  %vm1402_vm8 = vweird.f32 %v1874_v17 }
 0x4f3   : > { %v1194_v41 = vpack.c.bf16 %v1193_v37, %v1192_v28 }
 0x4f4   : > { %v1399_v19 = vsub.f32 1.0, %v1398_v62 }
 0x4f6   : > { %v1400_v20 = vmul.f32 %v1874_v17, %v1399_v19 }
 0x4f7   : > { %1379 = vmatpush.bf16.xpose.msra.mxu3 %v1755_v60 }
 0x4f8   : > { %v1401_v10 = vadd.f32 %v1874_v17, %v1400_v20 }
 0x4f9   : > { %v1134_v38 = vpop.f32.mrf.mxu2 }
 0x4fa   : > { %1141 = vrot.lane.b32.xlu1 %v1134_v38, %s1903_s13  ;;  %v1403_v21 = vsel %vm1402_vm8, %v1874_v17, %v1401_v10 }
 0x4fb   : > { %v1196_v40 = vpop.permute.xlu0 %1195 }
 0x4fc   : > { %1208 = vmatpush.bf16.msra.mxu0 %v1196_v40 }
 0x4ff   : > { %1686 = vmatmul.msk.bf16.vlgmr.msra.gmra.mxu0 %vm689_vm0, %v1194_v41  ;;  %1380 = vmatpush.bf16.xpose.msra.mxu3 %v1754_v2 }
 0x503   : > { %v830_v43 = vpop.permute.xlu0 %829 }
 0x504   : > { %835 = vst.msk [vmem:[#allocation4 + $0x8] sm:$0xff] %vm833_vm1, %v830_v43 }
 0x507   : > { %1381 = vmatpush.bf16.xpose.msra.mxu3 %v1753_v4 }
 0x50c   : > { %v898_v27 = vpop.f32.mrf.mxu0 }
 0x50d   : > { %905 = vrot.lane.b32.xlu1 %v898_v27, %s1908_s18 }
 0x50f   : > { %1382 = vmatpush.bf16.xpose.msra.mxu3 %v1752_v58 }
 0x514   : > { %v900_v26 = vpop.f32.mrf.mxu0 }
 0x515   : > { %907 = vrot.lane.b32.xlu0 %v900_v26, %s1908_s18 }
 0x517   : > { %v984_v39 = vpop.permute.xlu1 %983 }
 0x51f   : > { %v986_v47 = vpop.permute.xlu0 %985 }
 0x52e   : > { %v1054_v44 = vpop.f32.mrf.mxu0 }
 0x52f   : > { %1061 = vrot.lane.b32.xlu1 %v1054_v44, %s1906_s16 }
 0x536   : > { %v1056_v45 = vpop.f32.mrf.mxu0 }
 0x537   : > { %1063 = vrot.lane.b32.xlu2 %v1056_v45, %s1906_s16  ;;  %v1807_v45 = vld [vmem:[%s2392_s7] ss:$0 sm:$0xff] }
 0x564   : > { %v1140_v51 = vpop.permute.xlu0 %1139 }
 0x56c   : > { %v1142_v48 = vpop.permute.xlu1 %1141 }
 0x575   : > { %v1288_v46 = vpop.f32.mrf.mxu2 }
 0x576   : > { %1295 = vrot.lane.b32.xlu1 %v1288_v46, %s1904_s14 }
 0x57c   : > { %v1210_v50 = vpop.f32.mrf.mxu0 }
 0x57d   : > { %1217 = vrot.lane.b32.xlu2 %v1210_v50, %s1905_s15  ;;  %v1290_v55 = vpop.f32.mrf.mxu2 }
 0x57f   : > { %v906_v52 = vpop.permute.xlu1 %905 }
 0x580   : > { %912 = vst.msk [vmem:[#allocation4] sm:$0xff] %vm911_vm2, %v906_v52 }
 0x581   : > { %990 = vst.msk [vmem:[#allocation4] sm:$0xff] %vm989_vm3, %v984_v39 }
 0x584   : > { %v1212_v56 = vpop.f32.mrf.mxu0 }
 0x585   : > { %1219 = vrot.lane.b32.xlu0 %v1212_v56, %s1905_s15  ;;  %1297 = vrot.lane.b32.xlu2 %v1290_v55, %s1904_s14 }
 0x587   : > { %v908_v57 = vpop.permute.xlu0 %907 }
 0x588   : > { %913 = vst.msk [vmem:[#allocation4 + $0x8] sm:$0xff] %vm911_vm2, %v908_v57 }
 0x589   : > { %991 = vst.msk [vmem:[#allocation4 + $0x8] sm:$0xff] %vm989_vm3, %v986_v47  ;;  %v1808_v47 = vld [vmem:[%s2393_s8] ss:$0 sm:$0xff] }
 0x591   : > { %v1064_v63 = vpop.permute.xlu2 %1063 }
 0x592   : > { %1069 = vst.msk [vmem:[#allocation4 + $0x8] sm:$0xff] %vm1067_vm4, %v1064_v63 }
 0x593   : > { %1147 = vst.msk [vmem:[#allocation4 + $0x8] sm:$0xff] %vm1145_vm5, %v1142_v48 }
 0x5a1   : > { %v1062_v1 = vpop.permute.xlu1 %1061 }
 0x5a2   : > { %1068 = vst.msk [vmem:[#allocation4] sm:$0xff] %vm1067_vm4, %v1062_v1 }
 0x5a3   : > { %1146 = vst.msk [vmem:[#allocation4] sm:$0xff] %vm1145_vm5, %v1140_v51 }
 0x5d7   : > { %v1218_v6 = vpop.permute.xlu2 %1217 }
 0x5d8   : > { %1224 = vst.msk [vmem:[#allocation4] sm:$0xff] %vm1223_vm6, %v1218_v6 }
 0x5df   : > { %v1298_v7 = vpop.permute.xlu2 %1297 }
 0x5e8   : > { %v1296_v49 = vpop.permute.xlu1 %1295 }
 0x5e9   : > { %1302 = vst.msk [vmem:[#allocation4] sm:$0xff] %vm1301_vm7, %v1296_v49 }
 0x5f0   : > { %v1304_v8 = vld [vmem:[#allocation4] sm:$0xff] }
 0x5f7   : > { %v1220_v54 = vpop.permute.xlu0 %1219 }
 0x5f8   : > { %1225 = vst.msk [vmem:[#allocation4 + $0x8] sm:$0xff] %vm1223_vm6, %v1220_v54 }
 0x5f9   : > { %1303 = vst.msk [vmem:[#allocation4 + $0x8] sm:$0xff] %vm1301_vm7, %v1298_v7 }
 0x600   : > { %v1305_v3 = vld [vmem:[#allocation4 + $0x8] sm:$0xff] }
 0x601   : > { %v1322_v9 = vpack.c.bf16 %v1305_v3, %v1304_v8 }
 0x603   : > { %1383 = vmatmul.bf16.vlgmr.msra.gmra.mxu3 %v1322_v9 }
 0x686   : > { %v1384_v12 = vpop.f32.mrf.mxu3 }
 0x687   : > { %v1385_v13 = vadd.f32 %v1806_v11, %v1384_v12 }
 0x689   : > { %v1389_v5 = vadd.f32 %v1385_v13, %v2065_v23 }
 0x68b   : > { %1393 = vadd.xlane.f32.xlu0 %v1389_v5 }
 0x68e   : > { %v1386_v53 = vpop.f32.mrf.mxu3 }
 0x68f   : > { %v1387_v15 = vadd.f32 %v1806_v11, %v1386_v53 }
 0x691   : > { %v1390_v16 = vadd.f32 %v1387_v15, %v2067_v24 }
 0x693   : > { %1395 = vadd.xlane.f32.xlu1 %v1390_v16 }
 0x6fe   : > { %v1394_v18 = vpop.xlane.xlu0 %1393 }
 0x6ff   : > { %v1404_v25 = vmul.f32 %v1403_v21, %v1394_v18 }
 0x701   : > { %v1406_v14 = vsub.f32 %v1389_v5, %v1404_v25 }
 0x703   : > { %v1408_v30 = vmul.f32 %v1406_v14, %v1406_v14 }
 0x705   : > { %1410 = vadd.xlane.f32.xlu2 %v1408_v30 }
 0x706   : > { %v1396_v23 = vpop.xlane.xlu1 %1395 }
 0x707   : > { %v1405_v31 = vmul.f32 %v1403_v21, %v1396_v23 }
 0x709   : > { %v1407_v29 = vsub.f32 %v1390_v16, %v1405_v31 }
 0x70b   : > { %v1409_v32 = vmul.f32 %v1407_v29, %v1407_v29 }
 0x70d   : > { %1412 = vadd.xlane.f32.xlu0 %v1409_v32 }
 0x778   : > { %v1411_v24 = vpop.xlane.xlu2 %1410 }
 0x779   : > { %v1414_v33 = vmul.f32 %v1411_v24, %v1403_v21 }
 0x77b   : > { %v1416_v34 = vadd.f32 1e-05, %v1414_v33 }
 0x77d   : > { %1875 = vrsqrt.f32 %v1416_v34  ;;  %vm1424_vm10 = vweird.f32 %v1416_v34 }
 0x780   : > { %v1413_v35 = vpop.xlane.xlu0 %1412 }
 0x781   : > { %v1415_v36 = vmul.f32 %v1413_v35, %v1403_v21 }
 0x783   : > { %v1876_v37 = vpop.eup %1875  ;;  %v1417_v38 = vadd.f32 1e-05, %v1415_v36 }
 0x784   : > { %v1419_v28 = vmul.f32 %v1876_v37, %v1416_v34  ;;  %vm1425_vm9 = vweird.f32 %v1876_v37 }
 0x785   : > { %1877 = vrsqrt.f32 %v1417_v38  ;;  %vm1426_vm11 = vmor %vm1424_vm10, %vm1425_vm9  ;;  %vm1434_vm13 = vweird.f32 %v1417_v38 }
 0x786   : > { %v1420_v40 = vmul.f32 %v1876_v37, %v1419_v28 }
 0x788   : > { %v1421_v41 = vmul.f32 0.5, %v1420_v40 }
 0x78a   : > { %v1422_v43 = vsub.f32 1.5, %v1421_v41 }
 0x78b   : > { %v1878_v27 = vpop.eup %1877 }
 0x78c   : > { %v1423_v26 = vmul.f32 %v1876_v37, %v1422_v43  ;;  %v1429_v44 = vmul.f32 %v1878_v27, %v1417_v38  ;;  %vm1435_vm12 = vweird.f32 %v1878_v27 }
 0x78d   : > { %vm1436_vm14 = vmor %vm1434_vm13, %vm1435_vm12 }
 0x78e   : > { %v1427_v39 = vsel %vm1426_vm11, %v1876_v37, %v1423_v26  ;;  %v1430_v46 = vmul.f32 %v1878_v27, %v1429_v44 }
 0x78f   : > { %v1438_v48 = vmul.f32 %v1427_v39, %v1406_v14 }
 0x790   : > { %v1431_v50 = vmul.f32 0.5, %v1430_v46 }
 0x791   : > { %v1443_v51 = vmul.f32 %v1807_v45, %v1438_v48 }
 0x792   : > { %v1432_v52 = vsub.f32 1.5, %v1431_v50 }
 0x793   : > { %v1448_v42 = vadd.f32 %v1808_v47, %v1443_v51 }
 0x794   : > { %v1433_v55 = vmul.f32 %v1878_v27, %v1432_v52 }
 0x795   : > { %1450 = vst [vmem:[%s388_s29] sm:$0xff] %v1448_v42 }
 0x796   : > { %v1437_v56 = vsel %vm1436_vm14, %v1878_v27, %v1433_v55 }
 0x797   : > { %v1439_v57 = vmul.f32 %v1437_v56, %v1407_v29 }
 0x799   : > { %v1444_v59 = vmul.f32 %v1807_v45, %v1439_v57 }
 0x79b   : > { %v1449_v61 = vadd.f32 %v1808_v47, %v1444_v59 }
 0x79d   : > { %1451 = vst [vmem:[%s388_s29 + $0x8] sm:$0xff] %v1449_v61 }
 0x79e PF: > { %s19_s11 = sadd.s32 1, %s1901_s11   ;;  %s2395_s30 = smov %s1897_s10 }
 0x79f   : > { %p16_p5 = scmp.ge.s32.totalorder %s19_s11, 4   ;;  %s2396_s10 = smov %s2398_s12 }
 0x7a1   :  { %18 = sbr.rel (!%p16_p5) target bundleno = 2 (0x2), region = 98 }

</bundles_post_ra>
